<compile_context>
chip_gen: v7x
topology: tpu7x:2x2x1
jax: 0.10.0
libtpu: 0.0.40
codegen_flags: <defaults>
</compile_context>

<pallas_src>
import jax
import jax.numpy as jnp
from jax import lax
from jax.experimental import pallas as pl
from jax.experimental.pallas import tpu as pltpu


# (Cin, Cout, kernel, stride, activation) -- mirrors the PyTorch Decoder.__init__.
LAYER_CFG = (
    (128, 64, 3, 2, "relu"),
    (64, 64, 3, 2, "relu"),
    (64, 16, 3, 2, "relu"),
    (16, 16, 3, 2, "relu"),
    (16, 1, 4, 2, "tanh"),
)


def _spatial_sizes():
    sizes = [1]
    for (_, _, k, s, _) in LAYER_CFG:
        sizes.append((sizes[-1] - 1) * s + k)
    return tuple(sizes)


SPATIAL = _spatial_sizes()        # (1, 3, 7, 15, 31, 64)
OUT_HW = SPATIAL[-1]              # 64


# ----------------------------- Pallas kernel --------------------------------
def _decoder_kernel(x_ref, *refs):
    """All 5 ConvTranspose2d + activation layers for one batch element.

    x_ref : [1, 1, 128]                       latent as [b, Hin=1, Win*Cin=128]
    refs  : 5 x M-stack [k, Win*Cin, Wo*Cout] (bf16)
            5 x bias row [1, Wo*Cout]         (f32)
            1 x output   [1, 64, 64]          (f32)
    """
    n = len(LAYER_CFG)
    m_refs = refs[:n]
    b_refs = refs[n:2 * n]
    o_ref = refs[2 * n]

    x = x_ref[0].astype(jnp.float32)                      # [Hin, Win*Cin] = [1,128]
    for li, (_cin, cout, k, s, act) in enumerate(LAYER_CFG):
        hin = SPATIAL[li]
        ho = SPATIAL[li + 1]
        ncols = ho * cout                                  # Wo*Cout (square images)
        x16 = x.astype(jnp.bfloat16)                       # bf16 MXU operands
        acc = jnp.zeros((ho, ncols), jnp.float32)
        for ky in range(k):
            # Data matmul on the MXU: [Hin, Win*Cin] @ [Win*Cin, Wo*Cout], f32 acc.
            t = jnp.dot(x16, m_refs[li][ky],
                        preferred_element_type=jnp.float32)          # [hin, ncols]
            # H-axis stride-s scatter of the hin rows into ho output rows (tap ky).
            if hin == 1:
                oy = lax.broadcasted_iota(jnp.int32, (ho, 1), 0)
                acc = acc + (oy == ky).astype(jnp.float32) * t
            else:
                oy = lax.broadcasted_iota(jnp.int32, (ho, hin), 0)
                iy = lax.broadcasted_iota(jnp.int32, (ho, hin), 1)
                uh = (oy == s * iy + ky).astype(jnp.float32)          # [ho, hin] 0/1
                acc = acc + jnp.dot(uh, t, preferred_element_type=jnp.float32)
        acc = acc + b_refs[li][...]                        # bias (f32)
        x = jnp.maximum(acc, 0.0) if act == "relu" else jnp.tanh(acc)

    o_ref[0] = x.astype(o_ref.dtype)                       # [64, 64]


# ------------------------- weight-only preprocessing -------------------------
def _build_layer_mats(w, b, hin, stride):
    """Fold the W-axis transposed-conv overlap-add into the weights.

    w: [Cin, Cout, k, k] (PyTorch ConvTranspose2d layout), b: [Cout].
    M[ky, ix*Cin+ci, ox*Cout+co] = w[ci, co, ky, ox - stride*ix]  (0 if outside [0,k))
    """
    cin, cout, k, _ = w.shape
    win = hin
    wo = (win - 1) * stride + k
    ox = jnp.arange(wo)[None, :]                 # [1, Wo]
    ix = jnp.arange(win)[:, None]                # [Win, 1]
    kx = ox - stride * ix                        # [Win, Wo]
    valid = (kx >= 0) & (kx < k)
    kxc = jnp.clip(kx, 0, k - 1)
    wk = jnp.transpose(w, (2, 0, 1, 3))          # [k(ky), Cin, Cout, k(kx)]
    g = wk[:, :, :, kxc]                         # [k, Cin, Cout, Win, Wo]
    g = jnp.where(valid[None, None, None], g, 0.0)
    g = jnp.transpose(g, (0, 3, 1, 4, 2))        # [k, Win, Cin, Wo, Cout]
    m = g.reshape(k, win * cin, wo * cout).astype(jnp.bfloat16)
    b_row = jnp.tile(b, wo).reshape(1, wo * cout).astype(jnp.float32)
    return m, b_row


def prepare_params(params):
    m_stacks, bias_rows = [], []
    for (w, b), (_, _, _, s, _), hin in zip(params, LAYER_CFG, SPATIAL[:-1]):
        m, br = _build_layer_mats(w, b, hin, s)
        m_stacks.append(m)
        bias_rows.append(br)
    return tuple(m_stacks), tuple(bias_rows)


# ------------------------------- pallas_call ---------------------------------
def _decoder_pallas(x3d, m_stacks, bias_rows):
    B = x3d.shape[0]
    in_specs = [pl.BlockSpec((1, 1, x3d.shape[2]), lambda b: (b, 0, 0))]
    for m in m_stacks:
        in_specs.append(pl.BlockSpec(m.shape, lambda b: (0, 0, 0)))
    for br in bias_rows:
        in_specs.append(pl.BlockSpec(br.shape, lambda b: (0, 0)))
    return pl.pallas_call(
        _decoder_kernel,
        out_shape=jax.ShapeDtypeStruct((B, OUT_HW, OUT_HW), jnp.float32),
        grid=(B,),
        in_specs=in_specs,
        out_specs=pl.BlockSpec((1, OUT_HW, OUT_HW), lambda b: (b, 0, 0)),
        compiler_params=pltpu.CompilerParams(
            dimension_semantics=("parallel",)),   # 2 steps -> both v7x TCs busy
    )(x3d, *m_stacks, *bias_rows)


@jax.jit
def decoder_forward(x, params):
    """x: [B, 128] -> [B, 1, 64, 64]; matches PyTorch Decoder.forward."""
    # Weight-only reorganization (no activation bytes; hoist out of the hot
    # loop / do once at load time in production).
    m_stacks, bias_rows = prepare_params(params)
    out = _decoder_pallas(x.reshape(x.shape[0], 1, x.shape[1]), m_stacks, bias_rows)
    return out.reshape(x.shape[0], 1, OUT_HW, OUT_HW)


# ----------------------------- reference & init ------------------------------
def init_params(key):
    """Deterministic synthetic params (PyTorch-style uniform fan-in bound)."""
    params = []
    for (cin, cout, k, _, _) in LAYER_CFG:
        key, kw, kb = jax.random.split(key, 3)
        bound = 1.0 / jnp.sqrt(jnp.float32(cin * k * k))
        w = jax.random.uniform(kw, (cin, cout, k, k), jnp.float32, -bound, bound)
        b = jax.random.uniform(kb, (cout,), jnp.float32, -bound, bound)
        params.append((w, b))
    return params


def _conv_transpose_ref(x, w, b, s):
    """Direct PyTorch ConvTranspose2d definition (scatter form), pure XLA, f32."""
    _, _, hin, win = x.shape
    cout, k = w.shape[1], w.shape[2]
    ho, wo = (hin - 1) * s + k, (win - 1) * s + k
    out = jnp.zeros((x.shape[0], cout, ho, wo), jnp.float32)
    for ky in range(k):
        for kx in range(k):
            contrib = jnp.einsum("bchw,cd->bdhw", x, w[:, :, ky, kx])
            out = out.at[:, :, ky:ky + (hin - 1) * s + 1:s,
                         kx:kx + (win - 1) * s + 1:s].add(contrib)
    return out + b[None, :, None, None]


def decoder_reference(x, params):
    out = x.reshape(x.shape[0], x.shape[1], 1, 1)
    for (w, b), (_, _, _, s, act) in zip(params, LAYER_CFG):
        out = _conv_transpose_ref(out, w, b, s)
        out = jnp.maximum(out, 0.0) if act == "relu" else jnp.tanh(out)
    return out


if __name__ == "__main__":
    key = jax.random.PRNGKey(0)
    kx, kp = jax.random.split(key)
    B = 2
    x = jax.random.normal(kx, (B, 128), jnp.float32)   # 128 forced by layer-1 Cin
    params = init_params(kp)

    out = jax.block_until_ready(decoder_forward(x, params))

    assert out.shape == (B, 1, OUT_HW, OUT_HW), out.shape
    assert bool(jnp.all(jnp.isfinite(out)))
    assert bool(jnp.all(jnp.abs(out) <= 1.0 + 1e-6))   # final Tanh

    ref = decoder_reference(x, params)                 # f32 reference
    err = float(jnp.max(jnp.abs(out - ref)))
    assert err < 2e-2, f"max abs err vs reference: {err}"
    print("KERNEL_OK")
</pallas_src>

<mosaic_0001>
module attributes {stable_mosaic.version = 11 : i64} {
  func.func @_decoder_kernel(%arg0: i32, %arg1: memref<1x1x128xf32, #tpu.memory_space<vmem>>, %arg2: memref<3x128x192xbf16, #tpu.memory_space<vmem>>, %arg3: memref<3x192x448xbf16, #tpu.memory_space<vmem>>, %arg4: memref<3x448x240xbf16, #tpu.memory_space<vmem>>, %arg5: memref<3x240x496xbf16, #tpu.memory_space<vmem>>, %arg6: memref<4x496x64xbf16, #tpu.memory_space<vmem>>, %arg7: memref<1x192xf32, #tpu.memory_space<vmem>>, %arg8: memref<1x448xf32, #tpu.memory_space<vmem>>, %arg9: memref<1x240xf32, #tpu.memory_space<vmem>>, %arg10: memref<1x496xf32, #tpu.memory_space<vmem>>, %arg11: memref<1x64xf32, #tpu.memory_space<vmem>>, %arg12: memref<1x64x64xf32, #tpu.memory_space<vmem>>) attributes {dimension_semantics = [#tpu.dimension_semantics<parallel>], iteration_bounds = array<i64: 2>, scalar_prefetch = 0 : i64, scratch_operands = 0 : i64, tpu.core_type = #tpu.core_type<tc>, window_params = [{transform_indices = @transform_0, window_bounds = array<i64: 1, 1, 128>}, {pipeline_mode = #tpu.pipeline_mode<synchronous>, transform_indices = @transform_1, window_bounds = array<i64: 3, 128, 192>}, {pipeline_mode = #tpu.pipeline_mode<synchronous>, transform_indices = @transform_2, window_bounds = array<i64: 3, 192, 448>}, {pipeline_mode = #tpu.pipeline_mode<synchronous>, transform_indices = @transform_3, window_bounds = array<i64: 3, 448, 240>}, {pipeline_mode = #tpu.pipeline_mode<synchronous>, transform_indices = @transform_4, window_bounds = array<i64: 3, 240, 496>}, {pipeline_mode = #tpu.pipeline_mode<synchronous>, transform_indices = @transform_5, window_bounds = array<i64: 4, 496, 64>}, {pipeline_mode = #tpu.pipeline_mode<synchronous>, transform_indices = @transform_6, window_bounds = array<i64: 1, 192>}, {pipeline_mode = #tpu.pipeline_mode<synchronous>, transform_indices = @transform_7, window_bounds = array<i64: 1, 448>}, {pipeline_mode = #tpu.pipeline_mode<synchronous>, transform_indices = @transform_8, window_bounds = array<i64: 1, 240>}, {pipeline_mode = #tpu.pipeline_mode<synchronous>, transform_indices = @transform_9, window_bounds = array<i64: 1, 496>}, {pipeline_mode = #tpu.pipeline_mode<synchronous>, transform_indices = @transform_10, window_bounds = array<i64: 1, 64>}, {transform_indices = @transform_11, window_bounds = array<i64: 1, 64, 64>}]} {
    %c0 = arith.constant 0 : index
    %c0_0 = arith.constant 0 : index
    %c0_1 = arith.constant 0 : index
    %0 = vector.load %arg1[%c0, %c0_0, %c0_1] : memref<1x1x128xf32, #tpu.memory_space<vmem>>, vector<1x1x128xf32>
    %1 = vector.shape_cast %0 : vector<1x1x128xf32> to vector<1x128xf32>
    %2 = arith.truncf %1 : vector<1x128xf32> to vector<1x128xbf16>
    %cst = arith.constant 0.000000e+00 : f32
    %3 = vector.broadcast %cst : f32 to vector<3x192xf32>
    %c0_2 = arith.constant 0 : index
    %c0_3 = arith.constant 0 : index
    %c0_4 = arith.constant 0 : index
    %4 = vector.load %arg2[%c0_2, %c0_3, %c0_4] : memref<3x128x192xbf16, #tpu.memory_space<vmem>>, vector<1x128x192xbf16>
    %5 = vector.shape_cast %4 : vector<1x128x192xbf16> to vector<128x192xbf16>
    %cst_5 = arith.constant dense<0.000000e+00> : vector<1x192xf32>
    %6 = tpu.matmul %2, %5, %cst_5 {dimension_numbers = #tpu.dot_dimension_numbers<[1], [0], [0], [1], [0, 0, 1, 1], [], []>} : vector<1x128xbf16>, vector<128x192xbf16>, vector<1x192xf32> -> vector<1x192xf32>
    %7 = tpu.iota {dimensions = array<i32: 0>} : vector<3x1xi32>
    %c0_i32 = arith.constant 0 : i32
    %8 = vector.broadcast %c0_i32 : i32 to vector<3x1xi32>
    %9 = arith.cmpi eq, %7, %8 : vector<3x1xi32>
    %10 = arith.extui %9 : vector<3x1xi1> to vector<3x1xi32>
    %11 = arith.sitofp %10 : vector<3x1xi32> to vector<3x1xf32>
    %12 = vector.broadcast %11 : vector<3x1xf32> to vector<3x192xf32>
    %13 = vector.broadcast %6 : vector<1x192xf32> to vector<3x192xf32>
    %14 = arith.mulf %12, %13 : vector<3x192xf32>
    %15 = arith.addf %3, %14 : vector<3x192xf32>
    %c1 = arith.constant 1 : index
    %c0_6 = arith.constant 0 : index
    %c0_7 = arith.constant 0 : index
    %16 = vector.load %arg2[%c1, %c0_6, %c0_7] : memref<3x128x192xbf16, #tpu.memory_space<vmem>>, vector<1x128x192xbf16>
    %17 = vector.shape_cast %16 : vector<1x128x192xbf16> to vector<128x192xbf16>
    %cst_8 = arith.constant dense<0.000000e+00> : vector<1x192xf32>
    %18 = tpu.matmul %2, %17, %cst_8 {dimension_numbers = #tpu.dot_dimension_numbers<[1], [0], [0], [1], [0, 0, 1, 1], [], []>} : vector<1x128xbf16>, vector<128x192xbf16>, vector<1x192xf32> -> vector<1x192xf32>
    %19 = tpu.iota {dimensions = array<i32: 0>} : vector<3x1xi32>
    %c1_i32 = arith.constant 1 : i32
    %20 = vector.broadcast %c1_i32 : i32 to vector<3x1xi32>
    %21 = arith.cmpi eq, %19, %20 : vector<3x1xi32>
    %22 = arith.extui %21 : vector<3x1xi1> to vector<3x1xi32>
    %23 = arith.sitofp %22 : vector<3x1xi32> to vector<3x1xf32>
    %24 = vector.broadcast %23 : vector<3x1xf32> to vector<3x192xf32>
    %25 = vector.broadcast %18 : vector<1x192xf32> to vector<3x192xf32>
    %26 = arith.mulf %24, %25 : vector<3x192xf32>
    %27 = arith.addf %15, %26 : vector<3x192xf32>
    %c2 = arith.constant 2 : index
    %c0_9 = arith.constant 0 : index
    %c0_10 = arith.constant 0 : index
    %28 = vector.load %arg2[%c2, %c0_9, %c0_10] : memref<3x128x192xbf16, #tpu.memory_space<vmem>>, vector<1x128x192xbf16>
    %29 = vector.shape_cast %28 : vector<1x128x192xbf16> to vector<128x192xbf16>
    %cst_11 = arith.constant dense<0.000000e+00> : vector<1x192xf32>
    %30 = tpu.matmul %2, %29, %cst_11 {dimension_numbers = #tpu.dot_dimension_numbers<[1], [0], [0], [1], [0, 0, 1, 1], [], []>} : vector<1x128xbf16>, vector<128x192xbf16>, vector<1x192xf32> -> vector<1x192xf32>
    %31 = tpu.iota {dimensions = array<i32: 0>} : vector<3x1xi32>
    %c2_i32 = arith.constant 2 : i32
    %32 = vector.broadcast %c2_i32 : i32 to vector<3x1xi32>
    %33 = arith.cmpi eq, %31, %32 : vector<3x1xi32>
    %34 = arith.extui %33 : vector<3x1xi1> to vector<3x1xi32>
    %35 = arith.sitofp %34 : vector<3x1xi32> to vector<3x1xf32>
    %36 = vector.broadcast %35 : vector<3x1xf32> to vector<3x192xf32>
    %37 = vector.broadcast %30 : vector<1x192xf32> to vector<3x192xf32>
    %38 = arith.mulf %36, %37 : vector<3x192xf32>
    %39 = arith.addf %27, %38 : vector<3x192xf32>
    %c0_12 = arith.constant 0 : index
    %c0_13 = arith.constant 0 : index
    %40 = vector.load %arg7[%c0_12, %c0_13] : memref<1x192xf32, #tpu.memory_space<vmem>>, vector<1x192xf32>
    %41 = vector.broadcast %40 : vector<1x192xf32> to vector<3x192xf32>
    %42 = arith.addf %39, %41 : vector<3x192xf32>
    %cst_14 = arith.constant 0.000000e+00 : f32
    %43 = vector.broadcast %cst_14 : f32 to vector<3x192xf32>
    %44 = arith.maximumf %42, %43 : vector<3x192xf32>
    %45 = arith.truncf %44 : vector<3x192xf32> to vector<3x192xbf16>
    %cst_15 = arith.constant 0.000000e+00 : f32
    %46 = vector.broadcast %cst_15 : f32 to vector<7x448xf32>
    %c0_16 = arith.constant 0 : index
    %c0_17 = arith.constant 0 : index
    %c0_18 = arith.constant 0 : index
    %47 = vector.load %arg3[%c0_16, %c0_17, %c0_18] : memref<3x192x448xbf16, #tpu.memory_space<vmem>>, vector<1x192x448xbf16>
    %48 = vector.shape_cast %47 : vector<1x192x448xbf16> to vector<192x448xbf16>
    %cst_19 = arith.constant dense<0.000000e+00> : vector<3x448xf32>
    %49 = tpu.matmul %45, %48, %cst_19 {dimension_numbers = #tpu.dot_dimension_numbers<[1], [0], [0], [1], [0, 0, 1, 1], [], []>} : vector<3x192xbf16>, vector<192x448xbf16>, vector<3x448xf32> -> vector<3x448xf32>
    %50 = tpu.iota {dimensions = array<i32: 0>} : vector<7x3xi32>
    %51 = tpu.iota {dimensions = array<i32: 1>} : vector<7x3xi32>
    %c2_i32_20 = arith.constant 2 : i32
    %52 = vector.broadcast %c2_i32_20 : i32 to vector<7x3xi32>
    %53 = arith.muli %52, %51 : vector<7x3xi32>
    %c0_i32_21 = arith.constant 0 : i32
    %54 = vector.broadcast %c0_i32_21 : i32 to vector<7x3xi32>
    %55 = arith.addi %53, %54 : vector<7x3xi32>
    %56 = arith.cmpi eq, %50, %55 : vector<7x3xi32>
    %57 = arith.extui %56 : vector<7x3xi1> to vector<7x3xi32>
    %58 = arith.sitofp %57 : vector<7x3xi32> to vector<7x3xf32>
    %cst_22 = arith.constant dense<0.000000e+00> : vector<7x448xf32>
    %59 = tpu.matmul %58, %49, %cst_22 {dimension_numbers = #tpu.dot_dimension_numbers<[1], [0], [0], [1], [0, 0, 1, 1], [], []>} : vector<7x3xf32>, vector<3x448xf32>, vector<7x448xf32> -> vector<7x448xf32>
    %60 = arith.addf %46, %59 : vector<7x448xf32>
    %c1_23 = arith.constant 1 : index
    %c0_24 = arith.constant 0 : index
    %c0_25 = arith.constant 0 : index
    %61 = vector.load %arg3[%c1_23, %c0_24, %c0_25] : memref<3x192x448xbf16, #tpu.memory_space<vmem>>, vector<1x192x448xbf16>
    %62 = vector.shape_cast %61 : vector<1x192x448xbf16> to vector<192x448xbf16>
    %cst_26 = arith.constant dense<0.000000e+00> : vector<3x448xf32>
    %63 = tpu.matmul %45, %62, %cst_26 {dimension_numbers = #tpu.dot_dimension_numbers<[1], [0], [0], [1], [0, 0, 1, 1], [], []>} : vector<3x192xbf16>, vector<192x448xbf16>, vector<3x448xf32> -> vector<3x448xf32>
    %64 = tpu.iota {dimensions = array<i32: 0>} : vector<7x3xi32>
    %65 = tpu.iota {dimensions = array<i32: 1>} : vector<7x3xi32>
    %c2_i32_27 = arith.constant 2 : i32
    %66 = vector.broadcast %c2_i32_27 : i32 to vector<7x3xi32>
    %67 = arith.muli %66, %65 : vector<7x3xi32>
    %c1_i32_28 = arith.constant 1 : i32
    %68 = vector.broadcast %c1_i32_28 : i32 to vector<7x3xi32>
    %69 = arith.addi %67, %68 : vector<7x3xi32>
    %70 = arith.cmpi eq, %64, %69 : vector<7x3xi32>
    %71 = arith.extui %70 : vector<7x3xi1> to vector<7x3xi32>
    %72 = arith.sitofp %71 : vector<7x3xi32> to vector<7x3xf32>
    %cst_29 = arith.constant dense<0.000000e+00> : vector<7x448xf32>
    %73 = tpu.matmul %72, %63, %cst_29 {dimension_numbers = #tpu.dot_dimension_numbers<[1], [0], [0], [1], [0, 0, 1, 1], [], []>} : vector<7x3xf32>, vector<3x448xf32>, vector<7x448xf32> -> vector<7x448xf32>
    %74 = arith.addf %60, %73 : vector<7x448xf32>
    %c2_30 = arith.constant 2 : index
    %c0_31 = arith.constant 0 : index
    %c0_32 = arith.constant 0 : index
    %75 = vector.load %arg3[%c2_30, %c0_31, %c0_32] : memref<3x192x448xbf16, #tpu.memory_space<vmem>>, vector<1x192x448xbf16>
    %76 = vector.shape_cast %75 : vector<1x192x448xbf16> to vector<192x448xbf16>
    %cst_33 = arith.constant dense<0.000000e+00> : vector<3x448xf32>
    %77 = tpu.matmul %45, %76, %cst_33 {dimension_numbers = #tpu.dot_dimension_numbers<[1], [0], [0], [1], [0, 0, 1, 1], [], []>} : vector<3x192xbf16>, vector<192x448xbf16>, vector<3x448xf32> -> vector<3x448xf32>
    %78 = tpu.iota {dimensions = array<i32: 0>} : vector<7x3xi32>
    %79 = tpu.iota {dimensions = array<i32: 1>} : vector<7x3xi32>
    %c2_i32_34 = arith.constant 2 : i32
    %80 = vector.broadcast %c2_i32_34 : i32 to vector<7x3xi32>
    %81 = arith.muli %80, %79 : vector<7x3xi32>
    %c2_i32_35 = arith.constant 2 : i32
    %82 = vector.broadcast %c2_i32_35 : i32 to vector<7x3xi32>
    %83 = arith.addi %81, %82 : vector<7x3xi32>
    %84 = arith.cmpi eq, %78, %83 : vector<7x3xi32>
    %85 = arith.extui %84 : vector<7x3xi1> to vector<7x3xi32>
    %86 = arith.sitofp %85 : vector<7x3xi32> to vector<7x3xf32>
    %cst_36 = arith.constant dense<0.000000e+00> : vector<7x448xf32>
    %87 = tpu.matmul %86, %77, %cst_36 {dimension_numbers = #tpu.dot_dimension_numbers<[1], [0], [0], [1], [0, 0, 1, 1], [], []>} : vector<7x3xf32>, vector<3x448xf32>, vector<7x448xf32> -> vector<7x448xf32>
    %88 = arith.addf %74, %87 : vector<7x448xf32>
    %c0_37 = arith.constant 0 : index
    %c0_38 = arith.constant 0 : index
    %89 = vector.load %arg8[%c0_37, %c0_38] : memref<1x448xf32, #tpu.memory_space<vmem>>, vector<1x448xf32>
    %90 = vector.broadcast %89 : vector<1x448xf32> to vector<7x448xf32>
    %91 = arith.addf %88, %90 : vector<7x448xf32>
    %cst_39 = arith.constant 0.000000e+00 : f32
    %92 = vector.broadcast %cst_39 : f32 to vector<7x448xf32>
    %93 = arith.maximumf %91, %92 : vector<7x448xf32>
    %94 = arith.truncf %93 : vector<7x448xf32> to vector<7x448xbf16>
    %cst_40 = arith.constant 0.000000e+00 : f32
    %95 = vector.broadcast %cst_40 : f32 to vector<15x240xf32>
    %c0_41 = arith.constant 0 : index
    %c0_42 = arith.constant 0 : index
    %c0_43 = arith.constant 0 : index
    %96 = vector.load %arg4[%c0_41, %c0_42, %c0_43] : memref<3x448x240xbf16, #tpu.memory_space<vmem>>, vector<1x448x240xbf16>
    %97 = vector.shape_cast %96 : vector<1x448x240xbf16> to vector<448x240xbf16>
    %cst_44 = arith.constant dense<0.000000e+00> : vector<7x240xf32>
    %98 = tpu.matmul %94, %97, %cst_44 {dimension_numbers = #tpu.dot_dimension_numbers<[1], [0], [0], [1], [0, 0, 1, 1], [], []>} : vector<7x448xbf16>, vector<448x240xbf16>, vector<7x240xf32> -> vector<7x240xf32>
    %99 = tpu.iota {dimensions = array<i32: 0>} : vector<15x7xi32>
    %100 = tpu.iota {dimensions = array<i32: 1>} : vector<15x7xi32>
    %c2_i32_45 = arith.constant 2 : i32
    %101 = vector.broadcast %c2_i32_45 : i32 to vector<15x7xi32>
    %102 = arith.muli %101, %100 : vector<15x7xi32>
    %c0_i32_46 = arith.constant 0 : i32
    %103 = vector.broadcast %c0_i32_46 : i32 to vector<15x7xi32>
    %104 = arith.addi %102, %103 : vector<15x7xi32>
    %105 = arith.cmpi eq, %99, %104 : vector<15x7xi32>
    %106 = arith.extui %105 : vector<15x7xi1> to vector<15x7xi32>
    %107 = arith.sitofp %106 : vector<15x7xi32> to vector<15x7xf32>
    %cst_47 = arith.constant dense<0.000000e+00> : vector<15x240xf32>
    %108 = tpu.matmul %107, %98, %cst_47 {dimension_numbers = #tpu.dot_dimension_numbers<[1], [0], [0], [1], [0, 0, 1, 1], [], []>} : vector<15x7xf32>, vector<7x240xf32>, vector<15x240xf32> -> vector<15x240xf32>
    %109 = arith.addf %95, %108 : vector<15x240xf32>
    %c1_48 = arith.constant 1 : index
    %c0_49 = arith.constant 0 : index
    %c0_50 = arith.constant 0 : index
    %110 = vector.load %arg4[%c1_48, %c0_49, %c0_50] : memref<3x448x240xbf16, #tpu.memory_space<vmem>>, vector<1x448x240xbf16>
    %111 = vector.shape_cast %110 : vector<1x448x240xbf16> to vector<448x240xbf16>
    %cst_51 = arith.constant dense<0.000000e+00> : vector<7x240xf32>
    %112 = tpu.matmul %94, %111, %cst_51 {dimension_numbers = #tpu.dot_dimension_numbers<[1], [0], [0], [1], [0, 0, 1, 1], [], []>} : vector<7x448xbf16>, vector<448x240xbf16>, vector<7x240xf32> -> vector<7x240xf32>
    %113 = tpu.iota {dimensions = array<i32: 0>} : vector<15x7xi32>
    %114 = tpu.iota {dimensions = array<i32: 1>} : vector<15x7xi32>
    %c2_i32_52 = arith.constant 2 : i32
    %115 = vector.broadcast %c2_i32_52 : i32 to vector<15x7xi32>
    %116 = arith.muli %115, %114 : vector<15x7xi32>
    %c1_i32_53 = arith.constant 1 : i32
    %117 = vector.broadcast %c1_i32_53 : i32 to vector<15x7xi32>
    %118 = arith.addi %116, %117 : vector<15x7xi32>
    %119 = arith.cmpi eq, %113, %118 : vector<15x7xi32>
    %120 = arith.extui %119 : vector<15x7xi1> to vector<15x7xi32>
    %121 = arith.sitofp %120 : vector<15x7xi32> to vector<15x7xf32>
    %cst_54 = arith.constant dense<0.000000e+00> : vector<15x240xf32>
    %122 = tpu.matmul %121, %112, %cst_54 {dimension_numbers = #tpu.dot_dimension_numbers<[1], [0], [0], [1], [0, 0, 1, 1], [], []>} : vector<15x7xf32>, vector<7x240xf32>, vector<15x240xf32> -> vector<15x240xf32>
    %123 = arith.addf %109, %122 : vector<15x240xf32>
    %c2_55 = arith.constant 2 : index
    %c0_56 = arith.constant 0 : index
    %c0_57 = arith.constant 0 : index
    %124 = vector.load %arg4[%c2_55, %c0_56, %c0_57] : memref<3x448x240xbf16, #tpu.memory_space<vmem>>, vector<1x448x240xbf16>
    %125 = vector.shape_cast %124 : vector<1x448x240xbf16> to vector<448x240xbf16>
    %cst_58 = arith.constant dense<0.000000e+00> : vector<7x240xf32>
    %126 = tpu.matmul %94, %125, %cst_58 {dimension_numbers = #tpu.dot_dimension_numbers<[1], [0], [0], [1], [0, 0, 1, 1], [], []>} : vector<7x448xbf16>, vector<448x240xbf16>, vector<7x240xf32> -> vector<7x240xf32>
    %127 = tpu.iota {dimensions = array<i32: 0>} : vector<15x7xi32>
    %128 = tpu.iota {dimensions = array<i32: 1>} : vector<15x7xi32>
    %c2_i32_59 = arith.constant 2 : i32
    %129 = vector.broadcast %c2_i32_59 : i32 to vector<15x7xi32>
    %130 = arith.muli %129, %128 : vector<15x7xi32>
    %c2_i32_60 = arith.constant 2 : i32
    %131 = vector.broadcast %c2_i32_60 : i32 to vector<15x7xi32>
    %132 = arith.addi %130, %131 : vector<15x7xi32>
    %133 = arith.cmpi eq, %127, %132 : vector<15x7xi32>
    %134 = arith.extui %133 : vector<15x7xi1> to vector<15x7xi32>
    %135 = arith.sitofp %134 : vector<15x7xi32> to vector<15x7xf32>
    %cst_61 = arith.constant dense<0.000000e+00> : vector<15x240xf32>
    %136 = tpu.matmul %135, %126, %cst_61 {dimension_numbers = #tpu.dot_dimension_numbers<[1], [0], [0], [1], [0, 0, 1, 1], [], []>} : vector<15x7xf32>, vector<7x240xf32>, vector<15x240xf32> -> vector<15x240xf32>
    %137 = arith.addf %123, %136 : vector<15x240xf32>
    %c0_62 = arith.constant 0 : index
    %c0_63 = arith.constant 0 : index
    %138 = vector.load %arg9[%c0_62, %c0_63] : memref<1x240xf32, #tpu.memory_space<vmem>>, vector<1x240xf32>
    %139 = vector.broadcast %138 : vector<1x240xf32> to vector<15x240xf32>
    %140 = arith.addf %137, %139 : vector<15x240xf32>
    %cst_64 = arith.constant 0.000000e+00 : f32
    %141 = vector.broadcast %cst_64 : f32 to vector<15x240xf32>
    %142 = arith.maximumf %140, %141 : vector<15x240xf32>
    %143 = arith.truncf %142 : vector<15x240xf32> to vector<15x240xbf16>
    %cst_65 = arith.constant 0.000000e+00 : f32
    %144 = vector.broadcast %cst_65 : f32 to vector<31x496xf32>
    %c0_66 = arith.constant 0 : index
    %c0_67 = arith.constant 0 : index
    %c0_68 = arith.constant 0 : index
    %145 = vector.load %arg5[%c0_66, %c0_67, %c0_68] : memref<3x240x496xbf16, #tpu.memory_space<vmem>>, vector<1x240x496xbf16>
    %146 = vector.shape_cast %145 : vector<1x240x496xbf16> to vector<240x496xbf16>
    %cst_69 = arith.constant dense<0.000000e+00> : vector<15x496xf32>
    %147 = tpu.matmul %143, %146, %cst_69 {dimension_numbers = #tpu.dot_dimension_numbers<[1], [0], [0], [1], [0, 0, 1, 1], [], []>} : vector<15x240xbf16>, vector<240x496xbf16>, vector<15x496xf32> -> vector<15x496xf32>
    %148 = tpu.iota {dimensions = array<i32: 0>} : vector<31x15xi32>
    %149 = tpu.iota {dimensions = array<i32: 1>} : vector<31x15xi32>
    %c2_i32_70 = arith.constant 2 : i32
    %150 = vector.broadcast %c2_i32_70 : i32 to vector<31x15xi32>
    %151 = arith.muli %150, %149 : vector<31x15xi32>
    %c0_i32_71 = arith.constant 0 : i32
    %152 = vector.broadcast %c0_i32_71 : i32 to vector<31x15xi32>
    %153 = arith.addi %151, %152 : vector<31x15xi32>
    %154 = arith.cmpi eq, %148, %153 : vector<31x15xi32>
    %155 = arith.extui %154 : vector<31x15xi1> to vector<31x15xi32>
    %156 = arith.sitofp %155 : vector<31x15xi32> to vector<31x15xf32>
    %cst_72 = arith.constant dense<0.000000e+00> : vector<31x496xf32>
    %157 = tpu.matmul %156, %147, %cst_72 {dimension_numbers = #tpu.dot_dimension_numbers<[1], [0], [0], [1], [0, 0, 1, 1], [], []>} : vector<31x15xf32>, vector<15x496xf32>, vector<31x496xf32> -> vector<31x496xf32>
    %158 = arith.addf %144, %157 : vector<31x496xf32>
    %c1_73 = arith.constant 1 : index
    %c0_74 = arith.constant 0 : index
    %c0_75 = arith.constant 0 : index
    %159 = vector.load %arg5[%c1_73, %c0_74, %c0_75] : memref<3x240x496xbf16, #tpu.memory_space<vmem>>, vector<1x240x496xbf16>
    %160 = vector.shape_cast %159 : vector<1x240x496xbf16> to vector<240x496xbf16>
    %cst_76 = arith.constant dense<0.000000e+00> : vector<15x496xf32>
    %161 = tpu.matmul %143, %160, %cst_76 {dimension_numbers = #tpu.dot_dimension_numbers<[1], [0], [0], [1], [0, 0, 1, 1], [], []>} : vector<15x240xbf16>, vector<240x496xbf16>, vector<15x496xf32> -> vector<15x496xf32>
    %162 = tpu.iota {dimensions = array<i32: 0>} : vector<31x15xi32>
    %163 = tpu.iota {dimensions = array<i32: 1>} : vector<31x15xi32>
    %c2_i32_77 = arith.constant 2 : i32
    %164 = vector.broadcast %c2_i32_77 : i32 to vector<31x15xi32>
    %165 = arith.muli %164, %163 : vector<31x15xi32>
    %c1_i32_78 = arith.constant 1 : i32
    %166 = vector.broadcast %c1_i32_78 : i32 to vector<31x15xi32>
    %167 = arith.addi %165, %166 : vector<31x15xi32>
    %168 = arith.cmpi eq, %162, %167 : vector<31x15xi32>
    %169 = arith.extui %168 : vector<31x15xi1> to vector<31x15xi32>
    %170 = arith.sitofp %169 : vector<31x15xi32> to vector<31x15xf32>
    %cst_79 = arith.constant dense<0.000000e+00> : vector<31x496xf32>
    %171 = tpu.matmul %170, %161, %cst_79 {dimension_numbers = #tpu.dot_dimension_numbers<[1], [0], [0], [1], [0, 0, 1, 1], [], []>} : vector<31x15xf32>, vector<15x496xf32>, vector<31x496xf32> -> vector<31x496xf32>
    %172 = arith.addf %158, %171 : vector<31x496xf32>
    %c2_80 = arith.constant 2 : index
    %c0_81 = arith.constant 0 : index
    %c0_82 = arith.constant 0 : index
    %173 = vector.load %arg5[%c2_80, %c0_81, %c0_82] : memref<3x240x496xbf16, #tpu.memory_space<vmem>>, vector<1x240x496xbf16>
    %174 = vector.shape_cast %173 : vector<1x240x496xbf16> to vector<240x496xbf16>
    %cst_83 = arith.constant dense<0.000000e+00> : vector<15x496xf32>
    %175 = tpu.matmul %143, %174, %cst_83 {dimension_numbers = #tpu.dot_dimension_numbers<[1], [0], [0], [1], [0, 0, 1, 1], [], []>} : vector<15x240xbf16>, vector<240x496xbf16>, vector<15x496xf32> -> vector<15x496xf32>
    %176 = tpu.iota {dimensions = array<i32: 0>} : vector<31x15xi32>
    %177 = tpu.iota {dimensions = array<i32: 1>} : vector<31x15xi32>
    %c2_i32_84 = arith.constant 2 : i32
    %178 = vector.broadcast %c2_i32_84 : i32 to vector<31x15xi32>
    %179 = arith.muli %178, %177 : vector<31x15xi32>
    %c2_i32_85 = arith.constant 2 : i32
    %180 = vector.broadcast %c2_i32_85 : i32 to vector<31x15xi32>
    %181 = arith.addi %179, %180 : vector<31x15xi32>
    %182 = arith.cmpi eq, %176, %181 : vector<31x15xi32>
    %183 = arith.extui %182 : vector<31x15xi1> to vector<31x15xi32>
    %184 = arith.sitofp %183 : vector<31x15xi32> to vector<31x15xf32>
    %cst_86 = arith.constant dense<0.000000e+00> : vector<31x496xf32>
    %185 = tpu.matmul %184, %175, %cst_86 {dimension_numbers = #tpu.dot_dimension_numbers<[1], [0], [0], [1], [0, 0, 1, 1], [], []>} : vector<31x15xf32>, vector<15x496xf32>, vector<31x496xf32> -> vector<31x496xf32>
    %186 = arith.addf %172, %185 : vector<31x496xf32>
    %c0_87 = arith.constant 0 : index
    %c0_88 = arith.constant 0 : index
    %187 = vector.load %arg10[%c0_87, %c0_88] : memref<1x496xf32, #tpu.memory_space<vmem>>, vector<1x496xf32>
    %188 = vector.broadcast %187 : vector<1x496xf32> to vector<31x496xf32>
    %189 = arith.addf %186, %188 : vector<31x496xf32>
    %cst_89 = arith.constant 0.000000e+00 : f32
    %190 = vector.broadcast %cst_89 : f32 to vector<31x496xf32>
    %191 = arith.maximumf %189, %190 : vector<31x496xf32>
    %192 = arith.truncf %191 : vector<31x496xf32> to vector<31x496xbf16>
    %cst_90 = arith.constant 0.000000e+00 : f32
    %193 = vector.broadcast %cst_90 : f32 to vector<64x64xf32>
    %c0_91 = arith.constant 0 : index
    %c0_92 = arith.constant 0 : index
    %c0_93 = arith.constant 0 : index
    %194 = vector.load %arg6[%c0_91, %c0_92, %c0_93] : memref<4x496x64xbf16, #tpu.memory_space<vmem>>, vector<1x496x64xbf16>
    %195 = vector.shape_cast %194 : vector<1x496x64xbf16> to vector<496x64xbf16>
    %cst_94 = arith.constant dense<0.000000e+00> : vector<31x64xf32>
    %196 = tpu.matmul %192, %195, %cst_94 {dimension_numbers = #tpu.dot_dimension_numbers<[1], [0], [0], [1], [0, 0, 1, 1], [], []>} : vector<31x496xbf16>, vector<496x64xbf16>, vector<31x64xf32> -> vector<31x64xf32>
    %197 = tpu.iota {dimensions = array<i32: 0>} : vector<64x31xi32>
    %198 = tpu.iota {dimensions = array<i32: 1>} : vector<64x31xi32>
    %c2_i32_95 = arith.constant 2 : i32
    %199 = vector.broadcast %c2_i32_95 : i32 to vector<64x31xi32>
    %200 = arith.muli %199, %198 : vector<64x31xi32>
    %c0_i32_96 = arith.constant 0 : i32
    %201 = vector.broadcast %c0_i32_96 : i32 to vector<64x31xi32>
    %202 = arith.addi %200, %201 : vector<64x31xi32>
    %203 = arith.cmpi eq, %197, %202 : vector<64x31xi32>
    %204 = arith.extui %203 : vector<64x31xi1> to vector<64x31xi32>
    %205 = arith.sitofp %204 : vector<64x31xi32> to vector<64x31xf32>
    %cst_97 = arith.constant dense<0.000000e+00> : vector<64x64xf32>
    %206 = tpu.matmul %205, %196, %cst_97 {dimension_numbers = #tpu.dot_dimension_numbers<[1], [0], [0], [1], [0, 0, 1, 1], [], []>} : vector<64x31xf32>, vector<31x64xf32>, vector<64x64xf32> -> vector<64x64xf32>
    %207 = arith.addf %193, %206 : vector<64x64xf32>
    %c1_98 = arith.constant 1 : index
    %c0_99 = arith.constant 0 : index
    %c0_100 = arith.constant 0 : index
    %208 = vector.load %arg6[%c1_98, %c0_99, %c0_100] : memref<4x496x64xbf16, #tpu.memory_space<vmem>>, vector<1x496x64xbf16>
    %209 = vector.shape_cast %208 : vector<1x496x64xbf16> to vector<496x64xbf16>
    %cst_101 = arith.constant dense<0.000000e+00> : vector<31x64xf32>
    %210 = tpu.matmul %192, %209, %cst_101 {dimension_numbers = #tpu.dot_dimension_numbers<[1], [0], [0], [1], [0, 0, 1, 1], [], []>} : vector<31x496xbf16>, vector<496x64xbf16>, vector<31x64xf32> -> vector<31x64xf32>
    %211 = tpu.iota {dimensions = array<i32: 0>} : vector<64x31xi32>
    %212 = tpu.iota {dimensions = array<i32: 1>} : vector<64x31xi32>
    %c2_i32_102 = arith.constant 2 : i32
    %213 = vector.broadcast %c2_i32_102 : i32 to vector<64x31xi32>
    %214 = arith.muli %213, %212 : vector<64x31xi32>
    %c1_i32_103 = arith.constant 1 : i32
    %215 = vector.broadcast %c1_i32_103 : i32 to vector<64x31xi32>
    %216 = arith.addi %214, %215 : vector<64x31xi32>
    %217 = arith.cmpi eq, %211, %216 : vector<64x31xi32>
    %218 = arith.extui %217 : vector<64x31xi1> to vector<64x31xi32>
    %219 = arith.sitofp %218 : vector<64x31xi32> to vector<64x31xf32>
    %cst_104 = arith.constant dense<0.000000e+00> : vector<64x64xf32>
    %220 = tpu.matmul %219, %210, %cst_104 {dimension_numbers = #tpu.dot_dimension_numbers<[1], [0], [0], [1], [0, 0, 1, 1], [], []>} : vector<64x31xf32>, vector<31x64xf32>, vector<64x64xf32> -> vector<64x64xf32>
    %221 = arith.addf %207, %220 : vector<64x64xf32>
    %c2_105 = arith.constant 2 : index
    %c0_106 = arith.constant 0 : index
    %c0_107 = arith.constant 0 : index
    %222 = vector.load %arg6[%c2_105, %c0_106, %c0_107] : memref<4x496x64xbf16, #tpu.memory_space<vmem>>, vector<1x496x64xbf16>
    %223 = vector.shape_cast %222 : vector<1x496x64xbf16> to vector<496x64xbf16>
    %cst_108 = arith.constant dense<0.000000e+00> : vector<31x64xf32>
    %224 = tpu.matmul %192, %223, %cst_108 {dimension_numbers = #tpu.dot_dimension_numbers<[1], [0], [0], [1], [0, 0, 1, 1], [], []>} : vector<31x496xbf16>, vector<496x64xbf16>, vector<31x64xf32> -> vector<31x64xf32>
    %225 = tpu.iota {dimensions = array<i32: 0>} : vector<64x31xi32>
    %226 = tpu.iota {dimensions = array<i32: 1>} : vector<64x31xi32>
    %c2_i32_109 = arith.constant 2 : i32
    %227 = vector.broadcast %c2_i32_109 : i32 to vector<64x31xi32>
    %228 = arith.muli %227, %226 : vector<64x31xi32>
    %c2_i32_110 = arith.constant 2 : i32
    %229 = vector.broadcast %c2_i32_110 : i32 to vector<64x31xi32>
    %230 = arith.addi %228, %229 : vector<64x31xi32>
    %231 = arith.cmpi eq, %225, %230 : vector<64x31xi32>
    %232 = arith.extui %231 : vector<64x31xi1> to vector<64x31xi32>
    %233 = arith.sitofp %232 : vector<64x31xi32> to vector<64x31xf32>
    %cst_111 = arith.constant dense<0.000000e+00> : vector<64x64xf32>
    %234 = tpu.matmul %233, %224, %cst_111 {dimension_numbers = #tpu.dot_dimension_numbers<[1], [0], [0], [1], [0, 0, 1, 1], [], []>} : vector<64x31xf32>, vector<31x64xf32>, vector<64x64xf32> -> vector<64x64xf32>
    %235 = arith.addf %221, %234 : vector<64x64xf32>
    %c3 = arith.constant 3 : index
    %c0_112 = arith.constant 0 : index
    %c0_113 = arith.constant 0 : index
    %236 = vector.load %arg6[%c3, %c0_112, %c0_113] : memref<4x496x64xbf16, #tpu.memory_space<vmem>>, vector<1x496x64xbf16>
    %237 = vector.shape_cast %236 : vector<1x496x64xbf16> to vector<496x64xbf16>
    %cst_114 = arith.constant dense<0.000000e+00> : vector<31x64xf32>
    %238 = tpu.matmul %192, %237, %cst_114 {dimension_numbers = #tpu.dot_dimension_numbers<[1], [0], [0], [1], [0, 0, 1, 1], [], []>} : vector<31x496xbf16>, vector<496x64xbf16>, vector<31x64xf32> -> vector<31x64xf32>
    %239 = tpu.iota {dimensions = array<i32: 0>} : vector<64x31xi32>
    %240 = tpu.iota {dimensions = array<i32: 1>} : vector<64x31xi32>
    %c2_i32_115 = arith.constant 2 : i32
    %241 = vector.broadcast %c2_i32_115 : i32 to vector<64x31xi32>
    %242 = arith.muli %241, %240 : vector<64x31xi32>
    %c3_i32 = arith.constant 3 : i32
    %243 = vector.broadcast %c3_i32 : i32 to vector<64x31xi32>
    %244 = arith.addi %242, %243 : vector<64x31xi32>
    %245 = arith.cmpi eq, %239, %244 : vector<64x31xi32>
    %246 = arith.extui %245 : vector<64x31xi1> to vector<64x31xi32>
    %247 = arith.sitofp %246 : vector<64x31xi32> to vector<64x31xf32>
    %cst_116 = arith.constant dense<0.000000e+00> : vector<64x64xf32>
    %248 = tpu.matmul %247, %238, %cst_116 {dimension_numbers = #tpu.dot_dimension_numbers<[1], [0], [0], [1], [0, 0, 1, 1], [], []>} : vector<64x31xf32>, vector<31x64xf32>, vector<64x64xf32> -> vector<64x64xf32>
    %249 = arith.addf %235, %248 : vector<64x64xf32>
    %c0_117 = arith.constant 0 : index
    %c0_118 = arith.constant 0 : index
    %250 = vector.load %arg11[%c0_117, %c0_118] : memref<1x64xf32, #tpu.memory_space<vmem>>, vector<1x64xf32>
    %251 = vector.broadcast %250 : vector<1x64xf32> to vector<64x64xf32>
    %252 = arith.addf %249, %251 : vector<64x64xf32>
    %253 = math.tanh %252 : vector<64x64xf32>
    %c0_119 = arith.constant 0 : index
    %c0_120 = arith.constant 0 : index
    %c0_121 = arith.constant 0 : index
    %254 = vector.load %arg12[%c0_119, %c0_120, %c0_121] : memref<1x64x64xf32, #tpu.memory_space<vmem>>, vector<1x64x64xf32>
    %255 = vector.shape_cast %254 : vector<1x64x64xf32> to vector<64x64xf32>
    %256 = vector.shape_cast %253 : vector<64x64xf32> to vector<1x64x64xf32>
    tpu.vector_store %arg12[%c0_119, %c0_120, %c0_121], %256 {strides = array<i32>} : memref<1x64x64xf32, #tpu.memory_space<vmem>>, vector<1x64x64xf32>,
    return
  }
  func.func @transform_0(%arg0: i32) -> (i32, i32, i32) {
    %c0_i32 = arith.constant 0 : i32
    %c0_i32_0 = arith.constant 0 : i32
    %c0_i32_1 = arith.constant 0 : i32
    return %arg0, %c0_i32, %c0_i32_0 : i32, i32, i32
  }
  func.func @transform_1(%arg0: i32) -> (i32, i32, i32) {
    %c0_i32 = arith.constant 0 : i32
    %c0_i32_0 = arith.constant 0 : i32
    %c0_i32_1 = arith.constant 0 : i32
    %c0_i32_2 = arith.constant 0 : i32
    return %c0_i32, %c0_i32_0, %c0_i32_1 : i32, i32, i32
  }
  func.func @transform_2(%arg0: i32) -> (i32, i32, i32) {
    %c0_i32 = arith.constant 0 : i32
    %c0_i32_0 = arith.constant 0 : i32
    %c0_i32_1 = arith.constant 0 : i32
    %c0_i32_2 = arith.constant 0 : i32
    return %c0_i32, %c0_i32_0, %c0_i32_1 : i32, i32, i32
  }
  func.func @transform_3(%arg0: i32) -> (i32, i32, i32) {
    %c0_i32 = arith.constant 0 : i32
    %c0_i32_0 = arith.constant 0 : i32
    %c0_i32_1 = arith.constant 0 : i32
    %c0_i32_2 = arith.constant 0 : i32
    return %c0_i32, %c0_i32_0, %c0_i32_1 : i32, i32, i32
  }
  func.func @transform_4(%arg0: i32) -> (i32, i32, i32) {
    %c0_i32 = arith.constant 0 : i32
    %c0_i32_0 = arith.constant 0 : i32
    %c0_i32_1 = arith.constant 0 : i32
    %c0_i32_2 = arith.constant 0 : i32
    return %c0_i32, %c0_i32_0, %c0_i32_1 : i32, i32, i32
  }
  func.func @transform_5(%arg0: i32) -> (i32, i32, i32) {
    %c0_i32 = arith.constant 0 : i32
    %c0_i32_0 = arith.constant 0 : i32
    %c0_i32_1 = arith.constant 0 : i32
    %c0_i32_2 = arith.constant 0 : i32
    return %c0_i32, %c0_i32_0, %c0_i32_1 : i32, i32, i32
  }
  func.func @transform_6(%arg0: i32) -> (i32, i32) {
    %c0_i32 = arith.constant 0 : i32
    %c0_i32_0 = arith.constant 0 : i32
    %c0_i32_1 = arith.constant 0 : i32
    return %c0_i32, %c0_i32_0 : i32, i32
  }
  func.func @transform_7(%arg0: i32) -> (i32, i32) {
    %c0_i32 = arith.constant 0 : i32
    %c0_i32_0 = arith.constant 0 : i32
    %c0_i32_1 = arith.constant 0 : i32
    return %c0_i32, %c0_i32_0 : i32, i32
  }
  func.func @transform_8(%arg0: i32) -> (i32, i32) {
    %c0_i32 = arith.constant 0 : i32
    %c0_i32_0 = arith.constant 0 : i32
    %c0_i32_1 = arith.constant 0 : i32
    return %c0_i32, %c0_i32_0 : i32, i32
  }
  func.func @transform_9(%arg0: i32) -> (i32, i32) {
    %c0_i32 = arith.constant 0 : i32
    %c0_i32_0 = arith.constant 0 : i32
    %c0_i32_1 = arith.constant 0 : i32
    return %c0_i32, %c0_i32_0 : i32, i32
  }
  func.func @transform_10(%arg0: i32) -> (i32, i32) {
    %c0_i32 = arith.constant 0 : i32
    %c0_i32_0 = arith.constant 0 : i32
    %c0_i32_1 = arith.constant 0 : i32
    return %c0_i32, %c0_i32_0 : i32, i32
  }
  func.func @transform_11(%arg0: i32) -> (i32, i32, i32) {
    %c0_i32 = arith.constant 0 : i32
    %c0_i32_0 = arith.constant 0 : i32
    %c0_i32_1 = arith.constant 0 : i32
    return %arg0, %c0_i32, %c0_i32_0 : i32, i32, i32
  }
}

</mosaic_0001>

<bundles_post_ra>
// kernel: tile.43
= control target key start
LH: loop header
LB: loop body
LE: loop exit
PB: predicated region body
PF: predicated region fallthrough
CT: control target
= control target key end

     0   :  { %s40_s0 = inlined_call_operand.vmem [shape: f32[16], index: 0, kind: input, shape index: {}]   ;;  %s41_s1 = inlined_call_operand.vmem [shape: f32[31,16], index: 1, kind: output, shape index: {}]  }
   0x1   :  { %v4_v0 = vld [vmem:[%s40_s0] ss:$0 sm:$0xff] }
   0x2   :  { %5 = vst [vmem:[%s41_s1] sm:$0xff] %v4_v0  ;;  %12 = vst [vmem:[%s41_s1 + $0x8] sm:$0xff] %v4_v0 }
   0x3   :  { %13 = vst [vmem:[%s41_s1 + $0x10] sm:$0xff] %v4_v0  ;;  %14 = vst [vmem:[%s41_s1 + $0x18] sm:$0xff] %v4_v0 }

// kernel: tile.44
= control target key start
LH: loop header
LB: loop body
LE: loop exit
PB: predicated region body
PF: predicated region fallthrough
CT: control target
= control target key end

     0   :  { %s89_s8 = smov 112   ;;  %s90_s11 = smov 80   ;;  %vm3_vm0 = vcmask 130048   ;;  %vm9_vm1 = vcmask 1048448   ;;  %vm15_vm2 = vcmask 917248   ;;  %vm21_vm3 = vcmask 786048   ;;  %s142_s0 = inlined_call_operand.vmem [shape: f32[31,16], index: 0, kind: input, shape index: {}]   ;;  %s143_s1 = inlined_call_operand.vmem [shape: f32[1,496], index: 1, kind: output, shape index: {}]  }
   0x1   :  { %v72_v0 = vld [vmem:[%s142_s0 + $0x7] ss:$8 sm:$0x7]   ;;  %v74_v1 = vld [vmem:[%s142_s0 + $0x5] ss:$8 sm:$0xf]  }
   0x2   :  { %7 = vrot.lane.b32.xlu0 %v72_v0, %s89_s8  ;;  %19 = vrot.lane.b32.xlu1 %v74_v1, %s90_s11  ;;  %v73_v2 = vld [vmem:[%s142_s0 + $0x6] ss:$8 sm:$0xf]   ;;  %v75_v3 = vld [vmem:[%s142_s0 + $0x4] ss:$8 sm:$0xf]  }
   0x3   :  { %s91_s16 = smov 96   ;;  %v2_v4 = vld [vmem:[%s142_s0] ss:$8 sm:$0xf]   ;;  %s92_s19 = smov 64   ;;  %vm27_vm4 = vcmask 654848  }
   0x4   :  { %v76_v5 = vld [vmem:[%s142_s0 + $0x3] ss:$8 sm:$0xf]   ;;  %4 = vst.msk [vmem:[#allocation0] ss:$8 sm:$0xf] %vm3_vm0, %v2_v4  }
   0x5   :  { %v77_v6 = vld [vmem:[%s142_s0 + $0x2] ss:$8 sm:$0xf]   ;;  %s93_s24 = smov 48   ;;  %s94_s25 = smov 32   ;;  %vm33_vm5 = vcmask 523648  }
   0x6   :  { %13 = vrot.lane.b32.xlu0 %v73_v2, %s91_s16  ;;  %25 = vrot.lane.b32.xlu1 %v75_v3, %s92_s19  ;;  %v78_v7 = vld [vmem:[%s142_s0 + $0x1] ss:$8 sm:$0xf]   ;;  %s95_s0 = smov 16   ;;  %vm39_vm6 = vcmask 392448   ;;  %vm45_vm7 = vcmask 261248  }
   0xa   :  { %31 = vrot.lane.b32.xlu0 %v76_v5, %s93_s24  ;;  %37 = vrot.lane.b32.xlu1 %v77_v6, %s94_s25 }
   0xe   :  { %43 = vrot.lane.b32.xlu0 %v78_v7, %s95_s0 }
  0x74   :  { %v8_v8 = vpop.permute.xlu0 %7   ;;  %v20_v9 = vpop.permute.xlu1 %19  }
  0x75   :  { %10 = vst.msk [vmem:[#allocation0] ss:$8 sm:$0x7] %vm9_vm1, %v8_v8  }
  0x78   :  { %v14_v10 = vpop.permute.xlu0 %13   ;;  %v26_v11 = vpop.permute.xlu1 %25  }
  0x79   :  { %16 = vst.msk [vmem:[#allocation0] ss:$8 sm:$0xf] %vm15_vm2, %v14_v10  }
  0x7a   :  { %22 = vst.msk [vmem:[#allocation0] ss:$8 sm:$0xf] %vm21_vm3, %v20_v9  }
  0x7b   :  { %28 = vst.msk [vmem:[#allocation0] ss:$8 sm:$0xf] %vm27_vm4, %v26_v11  }
  0x7c   :  { %v32_v12 = vpop.permute.xlu0 %31   ;;  %v38_v13 = vpop.permute.xlu1 %37  }
  0x7d   :  { %34 = vst.msk [vmem:[#allocation0] ss:$8 sm:$0xf] %vm33_vm5, %v32_v12  }
  0x7e   :  { %40 = vst.msk [vmem:[#allocation0] ss:$8 sm:$0xf] %vm39_vm6, %v38_v13  }
  0x80   :  { %v44_v14 = vpop.permute.xlu0 %43  }
  0x81   :  { %46 = vst.msk [vmem:[#allocation0] ss:$8 sm:$0xf] %vm45_vm7, %v44_v14  }
  0x88   :  { %v50_v15 = vld [vmem:[#allocation0] sm:$0x1]  ;;  %v54_v16 = vld [vmem:[#allocation0 + $0x8] sm:$0x1]  ;;  %v59_v17 = vld [vmem:[#allocation0 + $0x10] sm:$0x1] }
  0x89   :  { %52 = vst [vmem:[%s143_s1] sm:$0x1] %v50_v15  ;;  %79 = vst [vmem:[%s143_s1 + $0x1] sm:$0x1] %v54_v16  ;;  %v65_v18 = vld [vmem:[#allocation0 + $0x18] sm:$0x1] }
  0x8a   :  { %80 = vst [vmem:[%s143_s1 + $0x2] sm:$0x1] %v59_v17  ;;  %81 = vst [vmem:[%s143_s1 + $0x3] sm:$0x1] %v65_v18 }

// kernel: tile.38
= control target key start
LH: loop header
LB: loop body
LE: loop exit
PB: predicated region body
PF: predicated region fallthrough
CT: control target
= control target key end

     0   :  { %s28_s0 = inlined_call_operand.vmem [shape: f32[16], index: 0, kind: input, shape index: {}]   ;;  %s29_s1 = inlined_call_operand.vmem [shape: f32[15,16], index: 1, kind: output, shape index: {}]  }
   0x1   :  { %v4_v0 = vld [vmem:[%s28_s0] ss:$0 sm:$0xff] }
   0x2   :  { %5 = vst [vmem:[%s29_s1] sm:$0xff] %v4_v0  ;;  %8 = vst [vmem:[%s29_s1 + $0x8] sm:$0xff] %v4_v0 }

// kernel: tile.39
= control target key start
LH: loop header
LB: loop body
LE: loop exit
PB: predicated region body
PF: predicated region fallthrough
CT: control target
= control target key end

     0   :  { %s20_s8 = smov 3  ;;  %s80_s9 = smov 112   ;;  %vm4_vm0 = vcmask 130048   ;;  %vm10_vm1 = vcmask 1048448   ;;  %vm17_vm2 = vcmask 917248   ;;  %vm24_vm3 = vcmask 786048   ;;  %s127_s0 = inlined_call_operand.vmem [shape: f32[15,16], index: 0, kind: input, shape index: {}]   ;;  %s128_s1 = inlined_call_operand.vmem [shape: f32[1,240], index: 1, kind: output, shape index: {}]  }
   0x1   :  { %v65_v0 = vld [vmem:[%s127_s0 + $0x7] sm:$0x1]   ;;  %v67_v1 = vld [vmem:[%s127_s0 + $0x5] ss:$8 sm:%s20_s8]   ;;  %s13_s12 = smov 3  ;;  %s81_s13 = smov 80  }
   0x2   :  { %8 = vrot.lane.b32.xlu0 %v65_v0, %s80_s9  ;;  %22 = vrot.lane.b32.xlu1 %v67_v1, %s81_s13  ;;  %v66_v2 = vld [vmem:[%s127_s0 + $0x6] ss:$8 sm:%s13_s12]   ;;  %s27_s16 = smov 3  ;;  %s34_s19 = smov 3  ;;  %vm31_vm4 = vcmask 654848   ;;  %vm38_vm5 = vcmask 523648  }
   0x3   :  { %v68_v3 = vld [vmem:[%s127_s0 + $0x4] ss:$8 sm:%s27_s16]   ;;  %s41_s20 = smov 3  ;;  %s82_s21 = smov 96   ;;  %v69_v4 = vld [vmem:[%s127_s0 + $0x3] ss:$8 sm:%s34_s19]  }
   0x4   :  { %s83_s22 = smov 64   ;;  %s2_s25 = smov 3  ;;  %v70_v5 = vld [vmem:[%s127_s0 + $0x2] ss:$8 sm:%s41_s20]   ;;  %vm45_vm6 = vcmask 392448   ;;  %vm52_vm7 = vcmask 261248  }
   0x5   :  { %s48_s28 = smov 3  ;;  %v3_v6 = vld [vmem:[%s127_s0] ss:$8 sm:%s2_s25]   ;;  %s84_s2 = smov 48  }
   0x6   :  { %15 = vrot.lane.b32.xlu0 %v66_v2, %s82_s21  ;;  %29 = vrot.lane.b32.xlu1 %v68_v3, %s83_s22  ;;  %5 = vst.msk [vmem:[#allocation0] ss:$8 sm:$0x3] %vm4_vm0, %v3_v6   ;;  %s85_s3 = smov 32   ;;  %v71_v7 = vld [vmem:[%s127_s0 + $0x1] ss:$8 sm:%s48_s28]  }
   0x7   :  { %s86_s0 = smov 16  }
   0xa   :  { %36 = vrot.lane.b32.xlu0 %v69_v4, %s84_s2  ;;  %43 = vrot.lane.b32.xlu1 %v70_v5, %s85_s3 }
   0xe   :  { %50 = vrot.lane.b32.xlu0 %v71_v7, %s86_s0 }
  0x74   :  { %v9_v8 = vpop.permute.xlu0 %8   ;;  %v23_v9 = vpop.permute.xlu1 %22  }
  0x75   :  { %11 = vst.msk [vmem:[#allocation0] sm:$0x1] %vm10_vm1, %v9_v8  }
  0x78   :  { %v16_v10 = vpop.permute.xlu0 %15   ;;  %v30_v11 = vpop.permute.xlu1 %29  }
  0x79   :  { %18 = vst.msk [vmem:[#allocation0] ss:$8 sm:$0x3] %vm17_vm2, %v16_v10  }
  0x7a   :  { %25 = vst.msk [vmem:[#allocation0] ss:$8 sm:$0x3] %vm24_vm3, %v23_v9  }
  0x7b   :  { %32 = vst.msk [vmem:[#allocation0] ss:$8 sm:$0x3] %vm31_vm4, %v30_v11  }
  0x7c   :  { %v37_v12 = vpop.permute.xlu0 %36   ;;  %v44_v13 = vpop.permute.xlu1 %43  }
  0x7d   :  { %39 = vst.msk [vmem:[#allocation0] ss:$8 sm:$0x3] %vm38_vm5, %v37_v12  }
  0x7e   :  { %46 = vst.msk [vmem:[#allocation0] ss:$8 sm:$0x3] %vm45_vm6, %v44_v13  }
  0x80   :  { %v51_v14 = vpop.permute.xlu0 %50  }
  0x81   :  { %53 = vst.msk [vmem:[#allocation0] ss:$8 sm:$0x3] %vm52_vm7, %v51_v14  }
  0x88   :  { %v57_v15 = vld [vmem:[#allocation0] sm:$0x1]  ;;  %v61_v16 = vld [vmem:[#allocation0 + $0x8] sm:$0x1] }
  0x89   :  { %59 = vst [vmem:[%s128_s1] sm:$0x1] %v57_v15  ;;  %72 = vst [vmem:[%s128_s1 + $0x1] sm:$0x1] %v61_v16 }

// kernel: tile.33
= control target key start
LH: loop header
LB: loop body
LE: loop exit
PB: predicated region body
PF: predicated region fallthrough
CT: control target
= control target key end

     0   :  { %s22_s0 = inlined_call_operand.vmem [shape: f32[64], index: 0, kind: input, shape index: {}]   ;;  %s23_s1 = inlined_call_operand.vmem [shape: f32[7,64], index: 1, kind: output, shape index: {}]  }
   0x1   :  { %v4_v0 = vld [vmem:[%s22_s0] ss:$0 sm:$0xff] }
   0x2   :  { %5 = vst [vmem:[%s23_s1] sm:$0xff] %v4_v0 }

// kernel: tile.34
= control target key start
LH: loop header
LB: loop body
LE: loop exit
PB: predicated region body
PF: predicated region fallthrough
CT: control target
= control target key end

     0   :  { %vm3_vm0 = vcmask 523264   ;;  %s41_s8 = smov 64   ;;  %vm9_vm1 = vcmask 1048064   ;;  %s70_s0 = inlined_call_operand.vmem [shape: f32[7,64], index: 0, kind: input, shape index: {}]   ;;  %s71_s1 = inlined_call_operand.vmem [shape: f32[1,448], index: 1, kind: output, shape index: {}]  }
   0x1   :  { %v36_v0 = vld [vmem:[%s70_s0 + $0x1] ss:$2 sm:$0x7]   ;;  %v2_v1 = vld [vmem:[%s70_s0] ss:$2 sm:$0xf]  }
   0x2   :  { %7 = vrot.lane.b32.xlu0 %v36_v0, %s41_s8  ;;  %4 = vst.msk [vmem:[#allocation0] ss:$8 sm:$0xf] %vm3_vm0, %v2_v1  }
   0x9   :  { %v29_v2 = vld [vmem:[#allocation0 + $0x18] sm:$0x1] }
   0xa   :  { %39 = vst [vmem:[%s71_s1 + $0x3] sm:$0x1] %v29_v2 }
  0x74   :  { %v8_v3 = vpop.permute.xlu0 %7  }
  0x75   :  { %10 = vst.msk [vmem:[#allocation0] ss:$8 sm:$0x7] %vm9_vm1, %v8_v3  }
  0x7c   :  { %v14_v4 = vld [vmem:[#allocation0] sm:$0x1]  ;;  %v18_v5 = vld [vmem:[#allocation0 + $0x8] sm:$0x1]  ;;  %v23_v6 = vld [vmem:[#allocation0 + $0x10] sm:$0x1] }
  0x7d   :  { %16 = vst [vmem:[%s71_s1] sm:$0x1] %v14_v4  ;;  %37 = vst [vmem:[%s71_s1 + $0x1] sm:$0x1] %v18_v5 }
  0x7e   :  { %38 = vst [vmem:[%s71_s1 + $0x2] sm:$0x1] %v23_v6 }

// kernel: tile.28
= control target key start
LH: loop header
LB: loop body
LE: loop exit
PB: predicated region body
PF: predicated region fallthrough
CT: control target
= control target key end

     0   :  { %s22_s0 = inlined_call_operand.vmem [shape: f32[64], index: 0, kind: input, shape index: {}]   ;;  %s23_s1 = inlined_call_operand.vmem [shape: f32[3,64], index: 1, kind: output, shape index: {}]  }
   0x1   :  { %v4_v0 = vld [vmem:[%s22_s0] ss:$0 sm:$0xff] }
   0x2   :  { %5 = vst [vmem:[%s23_s1] sm:$0xf] %v4_v0 }

// kernel: tile.29
= control target key start
LH: loop header
LB: loop body
LE: loop exit
PB: predicated region body
PF: predicated region fallthrough
CT: control target
= control target key end

     0   :  { %vm8_vm0 = vcmask 523264   ;;  %s29_s8 = smov 64   ;;  %vm14_vm1 = vcmask 1048064   ;;  %s49_s0 = inlined_call_operand.vmem [shape: f32[3,64], index: 0, kind: input, shape index: {}]   ;;  %s50_s1 = inlined_call_operand.vmem [shape: f32[1,192], index: 1, kind: output, shape index: {}]  }
   0x1   :  { %v4_v0 = vld [vmem:[%s49_s0] sm:$0xf]  ;;  %s6_s0 = smov 3 }
   0x2   :  { %5 = vst [vmem:[#allocation1] sm:$0xf] %v4_v0 }
   0x9   :  { %v11_v1 = vld [vmem:[#allocation1 + $0x1] sm:$0x1]   ;;  %v7_v2 = vld [vmem:[#allocation1] ss:$2 sm:%s6_s0]  }
   0xa   :  { %12 = vrot.lane.b32.xlu0 %v11_v1, %s29_s8  ;;  %9 = vst.msk [vmem:[#allocation0] ss:$8 sm:$0x3] %vm8_vm0, %v7_v2  }
  0x11   :  { %v23_v3 = vld [vmem:[#allocation0 + $0x8] sm:$0x1] }
  0x12   :  { %27 = vst [vmem:[%s50_s1 + $0x1] sm:$0x1] %v23_v3 }
  0x7c   :  { %v13_v4 = vpop.permute.xlu0 %12  }
  0x7d   :  { %15 = vst.msk [vmem:[#allocation0] sm:$0x1] %vm14_vm1, %v13_v4  }
  0x84   :  { %v19_v5 = vld [vmem:[#allocation0] sm:$0x1] }
  0x85   :  { %21 = vst [vmem:[%s50_s1] sm:$0x1] %v19_v5 }

// kernel: decoder_forward.1
= control target key start
LH: loop header
LB: loop body
LE: loop exit
PB: predicated region body
PF: predicated region fallthrough
CT: control target
= control target key end

     0   :  { %16 = vsyncpa [#allocation3], 0  ;;  %s13918_s0 = inlined_call_operand.vmem [shape: f32[2,1,128], index: 0, kind: input, shape index: {}]   ;;  %s13919_s1 = inlined_call_operand.vmem [shape: bf16[3,128,192], index: 1, kind: input, shape index: {}]   ;;  %s13920_s2 = inlined_call_operand.vmem [shape: bf16[3,192,448], index: 2, kind: input, shape index: {}]   ;;  %s13921_s3 = inlined_call_operand.vmem [shape: bf16[3,448,240], index: 3, kind: input, shape index: {}]   ;;  %s13922_s4 = inlined_call_operand.vmem [shape: bf16[3,240,496], index: 4, kind: input, shape index: {}]   ;;  %s13923_s5 = inlined_call_operand.vmem [shape: bf16[4,496,64], index: 5, kind: input, shape index: {}]   ;;  %s13924_s6 = inlined_call_operand.vmem [shape: f32[1,192], index: 6, kind: input, shape index: {}]   ;;  %s13925_s7 = inlined_call_operand.vmem [shape: f32[1,448], index: 7, kind: input, shape index: {}]   ;;  %s13926_s8 = inlined_call_operand.vmem [shape: f32[1,240], index: 8, kind: input, shape index: {}]   ;;  %s13927_s9 = inlined_call_operand.vmem [shape: f32[1,496], index: 9, kind: input, shape index: {}]   ;;  %s13928_s10 = inlined_call_operand.vmem [shape: f32[1,64], index: 10, kind: input, shape index: {}]   ;;  %s13929_s11 = inlined_call_operand.hbm [shape: f32[2,64,64], index: 11, kind: output, shape index: {}]  }
   0x1   :  { %18 = vsyncpa [#allocation3 + $0x1], 0  ;;  %s11110_s17 = smov 0   ;;  %s11112_s18 = smov 0  }
   0x2   :  { %s11114_s19 = smov 0   ;;  %s11116_s20 = smov 0  }
   0x3 LB: > { %13931 = sst [smem:[#allocation5_spill]] %s11038_s19  ;;  %s11131_s21 = sadd.s32 4294967295, %s11042_s20   ;;  %s11042_s20 = sphi %s11116_s20, %s13941_s20   ;;  %s11038_s19 = sphi %s11114_s19, %s13938_s19   ;;  %s11034_s18 = sphi %s11112_s18, %s13940_s18   ;;  %s11030_s17 = sphi %s11110_s17, %s13939_s17  }
   0x4   : > { %s8200_s22 = sadd.s32 4294967294, %s11042_s20   ;;  %s11135_s23 = sadd.s32 1, %s11042_s20  }
   0x5   : > { %s267_s24 = sadd.s32 1, %s11038_s19  ;;  %s264_s25 = ssub.s32 %s11042_s20, %s11135_s23 }
   0x6   : > { %p277_p0 = scmp.ne.s32.totalorder %s11038_s19, %s11034_s18  ;;  %p265_p1 = scmp.eq.s32.totalorder %s264_s25, 0 }
   0x7   : > { %p278_p2 = scmp.eq.s32.totalorder %s11131_s21, 1  ;;  %p283_p3 = scmp.ne.s32.totalorder %s11034_s18, %s11030_s17 }
   0x8   : > { %p284_p4 = scmp.eq.s32.totalorder %s8200_s22, 1  ;;  %p8203_p7 = scmp.ge.s32.totalorder %s11042_s20, 1 }
   0x9   : > { %s11146_s26 = scalar_select %p265_p1, %s11038_s19, %s267_s24  }
   0xa   : > { %p11148_p5 = por %p278_p2, %p277_p0  ;;  %p11152_p6 = por %p284_p4, %p283_p3 }
   0xb   : > { %13932 = sst [smem:[#allocation6_spill]] %s11146_s26  ;;  %p338_p8 = scmp.lt.s32.totalorder %s11042_s20, 3 }
   0xd   : > { %p339_p9 = pnand %p8203_p7, %p338_p8 }
   0xe   : > { %v10030_v0 = vld [vmem:[%s13919_s1 + $0x4] ss:$8 sps:$4 sm:$0xff] (!%p339_p9)   ;;  %v11044_v2 = vmov (!%p339_p9), 0   ;;  %v10034_v3 = vld [vmem:[%s13919_s1] ss:$8 sps:$4 sm:$0xff] (!%p339_p9)   ;;  %p376_p10 = scmp.lt.s32.totalorder (!%p339_p9), %s11131_s21, 1 }
   0xf   : > { %342 = sbr.rel (%p339_p9) target bundleno = 3566 (0xdee), region = 64  ;;  %v10032_v1 = vld [vmem:[%s13919_s1 + $0x84] ss:$8 sps:$4 sm:$0xff] (!%p339_p9)   ;;  %510 = vmatprep.mubr.bf16.mxu0 (!%p339_p9), %v11044_v2  ;;  %665 = vmatprep.mubr.bf16.mxu1 (!%p339_p9), %v11044_v2  ;;  %v10035_v4 = vld [vmem:[%s13919_s1 + $0x80] ss:$8 sps:$4 sm:$0xff] (!%p339_p9)   ;;  %vm1148_vm3 = vcmask (!%p339_p9), 523264  }
  0x10   : > { %478 = vmatprep.subr.bf16.mxu0 (!%p339_p9), %v10030_v0  ;;  %633 = vmatprep.subr.bf16.mxu1 (!%p339_p9), %v10032_v1  ;;  %v10036_v5 = vld [vmem:[%s13919_s1 + $0x14] ss:$8 sps:$4 sm:$0xff] (!%p339_p9)   ;;  %v10040_v7 = vld [vmem:[%s13919_s1 + $0x10] ss:$8 sps:$4 sm:$0xff] (!%p339_p9)   ;;  %v10042_v9 = vld [vmem:[%s13919_s1 + $0x24] ss:$8 sps:$4 sm:$0xff] (!%p339_p9)  }
  0x11   : > { %479 = vmatpush1.bf16.msra.mxu0 (!%p339_p9), %v10034_v3  ;;  %634 = vmatpush1.bf16.msra.mxu1 (!%p339_p9), %v10035_v4  ;;  %v10038_v6 = vld [vmem:[%s13919_s1 + $0x94] ss:$8 sps:$4 sm:$0xff] (!%p339_p9)   ;;  %v10041_v8 = vld [vmem:[%s13919_s1 + $0x90] ss:$8 sps:$4 sm:$0xff] (!%p339_p9)   ;;  %v10044_v10 = vld [vmem:[%s13919_s1 + $0xa4] ss:$8 sps:$4 sm:$0xff] (!%p339_p9)  }
  0x12   : > { %480 = vmatprep.subr.bf16.mxu0 (!%p339_p9), %v10036_v5  ;;  %635 = vmatprep.subr.bf16.mxu1 (!%p339_p9), %v10038_v6  ;;  %v10046_v11 = vld [vmem:[%s13919_s1 + $0x20] ss:$8 sps:$4 sm:$0xff] (!%p339_p9)   ;;  %v10048_v13 = vld [vmem:[%s13919_s1 + $0x34] ss:$8 sps:$4 sm:$0xff] (!%p339_p9)   ;;  %v10052_v15 = vld [vmem:[%s13919_s1 + $0x30] ss:$8 sps:$4 sm:$0xff] (!%p339_p9)  }
  0x13   : > { %v10047_v12 = vld [vmem:[%s13919_s1 + $0xa0] ss:$8 sps:$4 sm:$0xff] (!%p339_p9)   ;;  %v10050_v14 = vld [vmem:[%s13919_s1 + $0xb4] ss:$8 sps:$4 sm:$0xff] (!%p339_p9)   ;;  %v10053_v16 = vld [vmem:[%s13919_s1 + $0xb0] ss:$8 sps:$4 sm:$0xff] (!%p339_p9)  }
  0x14   : > { %v10054_v17 = vld [vmem:[%s13919_s1 + $0x44] ss:$8 sps:$4 sm:$0xff] (!%p339_p9)   ;;  %v10058_v19 = vld [vmem:[%s13919_s1 + $0x40] ss:$8 sps:$4 sm:$0xff] (!%p339_p9)   ;;  %v10060_v21 = vld [vmem:[%s13919_s1 + $0x54] ss:$8 sps:$4 sm:$0xff] (!%p339_p9)  }
  0x15   : > { %481 = vmatpush1.bf16.msra.mxu0 (!%p339_p9), %v10040_v7  ;;  %636 = vmatpush1.bf16.msra.mxu1 (!%p339_p9), %v10041_v8  ;;  %v10056_v18 = vld [vmem:[%s13919_s1 + $0xc4] ss:$8 sps:$4 sm:$0xff] (!%p339_p9)   ;;  %v10059_v20 = vld [vmem:[%s13919_s1 + $0xc0] ss:$8 sps:$4 sm:$0xff] (!%p339_p9)   ;;  %v10062_v22 = vld [vmem:[%s13919_s1 + $0xd4] ss:$8 sps:$4 sm:$0xff] (!%p339_p9)  }
  0x16   : > { %482 = vmatprep.subr.bf16.mxu0 %v10042_v9  ;;  %637 = vmatprep.subr.bf16.mxu1 %v10044_v10  ;;  %v10064_v23 = vld [vmem:[%s13919_s1 + $0x50] ss:$8 sps:$4 sm:$0xff]   ;;  %v10066_v25 = vld [vmem:[%s13919_s1 + $0x64] ss:$8 sps:$4 sm:$0xff]   ;;  %s377_s12 = scalar_select %p376_p10, %s11131_s21, 1  ;;  %vm1619_vm5 = vcmask 1042432  }
  0x17   : > { %v10065_v24 = vld [vmem:[%s13919_s1 + $0xd0] ss:$8 sps:$4 sm:$0xff]   ;;  %v10068_v26 = vld [vmem:[%s13919_s1 + $0xe4] ss:$8 sps:$4 sm:$0xff]   ;;  %v10070_v27 = vld [vmem:[%s13919_s1 + $0x60] ss:$8 sps:$4 sm:$0xff]  }
  0x18   : > { %v10071_v28 = vld [vmem:[%s13919_s1 + $0xe0] ss:$8 sps:$4 sm:$0xff]   ;;  %v10072_v29 = vld [vmem:[%s13919_s1 + $0x74] ss:$8 sps:$4 sm:$0xff]   ;;  %s378_s26 = scalar_lea.vmem %s13918_s0, %s377_s12  ;;  %v10076_v31 = vld [vmem:[%s13919_s1 + $0x70] ss:$8 sps:$4 sm:$0xff]  }
  0x19   : > { %483 = vmatpush1.bf16.msra.mxu0 %v10046_v11  ;;  %638 = vmatpush1.bf16.msra.mxu1 %v10047_v12  ;;  %v10074_v30 = vld [vmem:[%s13919_s1 + $0xf4] ss:$8 sps:$4 sm:$0xff]   ;;  %v10077_v32 = vld [vmem:[%s13919_s1 + $0xf0] ss:$8 sps:$4 sm:$0xff]   ;;  %v380_v33 = vld [vmem:[%s378_s26] sm:$0x1] }
  0x1a   : > { %484 = vmatprep.subr.bf16.mxu0 %v10048_v13  ;;  %639 = vmatprep.subr.bf16.mxu1 %v10050_v14  ;;  %v10080_v34 = vld [vmem:[%s13919_s1 + $0x104] ss:$8 sps:$4 sm:$0xff]   ;;  %v381_v35 = vpack.c.bf16 %v380_v33, %v380_v33  ;;  %v10078_v36 = vld [vmem:[%s13919_s1 + $0x100] ss:$8 sps:$4 sm:$0xff]   ;;  %v10083_v37 = vld [vmem:[%s13919_s1 + $0x114] ss:$8 sps:$4 sm:$0xff]  }
  0x1b   : > { %v10104_v38 = vld [vmem:[%s13920_s2 + $0x4] ss:$16 sps:$4 sm:$0xff]   ;;  %v10081_v39 = vld [vmem:[%s13919_s1 + $0x110] ss:$8 sps:$4 sm:$0xff]   ;;  %v10084_v42 = vld [vmem:[%s13919_s1 + $0x120] ss:$8 sps:$4 sm:$0xff]  }
  0x1c   : > { %v10102_v40 = vld [vmem:[%s13920_s2] ss:$16 sps:$4 sm:$0xff]   ;;  %v10086_v41 = vld [vmem:[%s13919_s1 + $0x124] ss:$8 sps:$4 sm:$0xff]   ;;  %v10089_v43 = vld [vmem:[%s13919_s1 + $0x134] ss:$8 sps:$4 sm:$0xff]  }
  0x1d   : > { %485 = vmatpush1.bf16.msra.mxu0 %v10052_v15  ;;  %640 = vmatpush1.bf16.msra.mxu1 %v10053_v16  ;;  %v10087_v44 = vld [vmem:[%s13919_s1 + $0x130] ss:$8 sps:$4 sm:$0xff]   ;;  %v10092_v45 = vld [vmem:[%s13919_s1 + $0x144] ss:$8 sps:$4 sm:$0xff]   ;;  %v10090_v46 = vld [vmem:[%s13919_s1 + $0x140] ss:$8 sps:$4 sm:$0xff]  }
  0x1e   : > { %486 = vmatprep.subr.bf16.mxu0 %v10054_v17  ;;  %641 = vmatprep.subr.bf16.mxu1 %v10056_v18  ;;  %v10095_v47 = vld [vmem:[%s13919_s1 + $0x154] ss:$8 sps:$4 sm:$0xff]   ;;  %v10093_v48 = vld [vmem:[%s13919_s1 + $0x150] ss:$8 sps:$4 sm:$0xff]   ;;  %v10098_v49 = vld [vmem:[%s13919_s1 + $0x164] ss:$8 sps:$4 sm:$0xff]  }
  0x1f   : > { %v10096_v50 = vld [vmem:[%s13919_s1 + $0x160] ss:$8 sps:$4 sm:$0xff]   ;;  %v10101_v51 = vld [vmem:[%s13919_s1 + $0x174] ss:$8 sps:$4 sm:$0xff]   ;;  %v10099_v52 = vld [vmem:[%s13919_s1 + $0x170] ss:$8 sps:$4 sm:$0xff]  }
  0x20   : > { %v10107_v53 = vld [vmem:[%s13920_s2 + $0xc] ss:$16 sps:$4 sm:$0xff]   ;;  %v10105_v54 = vld [vmem:[%s13920_s2 + $0x8] ss:$16 sps:$4 sm:$0xff]   ;;  %v10110_v55 = vld [vmem:[%s13920_s2 + $0x24] ss:$16 sps:$4 sm:$0xff]  }
  0x21   : > { %487 = vmatpush1.bf16.msra.mxu0 %v10058_v19  ;;  %642 = vmatpush1.bf16.msra.mxu1 %v10059_v20  ;;  %v10108_v56 = vld [vmem:[%s13920_s2 + $0x20] ss:$16 sps:$4 sm:$0xff]   ;;  %v10111_v57 = vld [vmem:[%s13920_s2 + $0x28] ss:$16 sps:$4 sm:$0xff]   ;;  %v10113_v58 = vld [vmem:[%s13920_s2 + $0x2c] ss:$16 sps:$4 sm:$0xff]  }
  0x22   : > { %488 = vmatprep.subr.bf16.mxu0 %v10060_v21  ;;  %643 = vmatprep.subr.bf16.mxu1 %v10062_v22  ;;  %v10116_v59 = vld [vmem:[%s13920_s2 + $0x44] ss:$16 sps:$4 sm:$0xff]   ;;  %v10119_v60 = vld [vmem:[%s13920_s2 + $0x4c] ss:$16 sps:$4 sm:$0xff]   ;;  %v10114_v61 = vld [vmem:[%s13920_s2 + $0x40] ss:$16 sps:$4 sm:$0xff]  }
  0x23   : > { %v10117_v62 = vld [vmem:[%s13920_s2 + $0x48] ss:$16 sps:$4 sm:$0xff]   ;;  %v10122_v63 = vld [vmem:[%s13920_s2 + $0x64] ss:$16 sps:$4 sm:$0xff]   ;;  %v10120_v0 = vld [vmem:[%s13920_s2 + $0x60] ss:$16 sps:$4 sm:$0xff]  }
  0x24   : > { %v10125_v1 = vld [vmem:[%s13920_s2 + $0x6c] ss:$16 sps:$4 sm:$0xff]   ;;  %v10128_v3 = vld [vmem:[%s13920_s2 + $0x84] ss:$16 sps:$4 sm:$0xff]   ;;  %v10123_v4 = vld [vmem:[%s13920_s2 + $0x68] ss:$16 sps:$4 sm:$0xff]  }
  0x25   : > { %489 = vmatpush1.bf16.msra.mxu0 %v10064_v23  ;;  %644 = vmatpush1.bf16.msra.mxu1 %v10065_v24  ;;  %v10131_v5 = vld [vmem:[%s13920_s2 + $0x8c] ss:$16 sps:$4 sm:$0xff]   ;;  %v10126_v6 = vld [vmem:[%s13920_s2 + $0x80] ss:$16 sps:$4 sm:$0xff]   ;;  %v10134_v7 = vld [vmem:[%s13920_s2 + $0xa4] ss:$16 sps:$4 sm:$0xff]  }
  0x26   : > { %490 = vmatprep.subr.bf16.mxu0 %v10066_v25  ;;  %645 = vmatprep.subr.bf16.mxu1 %v10068_v26  ;;  %v10129_v8 = vld [vmem:[%s13920_s2 + $0x88] ss:$16 sps:$4 sm:$0xff]   ;;  %v10132_v9 = vld [vmem:[%s13920_s2 + $0xa0] ss:$16 sps:$4 sm:$0xff]   ;;  %v10137_v10 = vld [vmem:[%s13920_s2 + $0xac] ss:$16 sps:$4 sm:$0xff]  }
  0x27   : > { %v10140_v11 = vld [vmem:[%s13920_s2 + $0xc4] ss:$16 sps:$4 sm:$0xff]   ;;  %v10135_v12 = vld [vmem:[%s13920_s2 + $0xa8] ss:$16 sps:$4 sm:$0xff]   ;;  %v10143_v13 = vld [vmem:[%s13920_s2 + $0xcc] ss:$16 sps:$4 sm:$0xff]  }
  0x28   : > { %v10138_v14 = vld [vmem:[%s13920_s2 + $0xc0] ss:$16 sps:$4 sm:$0xff]   ;;  %v10146_v15 = vld [vmem:[%s13920_s2 + $0xe4] ss:$16 sps:$4 sm:$0xff]   ;;  %v10141_v16 = vld [vmem:[%s13920_s2 + $0xc8] ss:$16 sps:$4 sm:$0xff]  }
  0x29   : > { %491 = vmatpush1.bf16.msra.mxu0 %v10070_v27  ;;  %646 = vmatpush1.bf16.msra.mxu1 %v10071_v28  ;;  %v10149_v17 = vld [vmem:[%s13920_s2 + $0xec] ss:$16 sps:$4 sm:$0xff]   ;;  %v10144_v18 = vld [vmem:[%s13920_s2 + $0xe0] ss:$16 sps:$4 sm:$0xff]   ;;  %v10152_v19 = vld [vmem:[%s13920_s2 + $0x104] ss:$16 sps:$4 sm:$0xff]  }
  0x2a   : > { %492 = vmatprep.subr.bf16.mxu0 %v10072_v29  ;;  %647 = vmatprep.subr.bf16.mxu1 %v10074_v30  ;;  %v10147_v20 = vld [vmem:[%s13920_s2 + $0xe8] ss:$16 sps:$4 sm:$0xff]   ;;  %v10155_v21 = vld [vmem:[%s13920_s2 + $0x10c] ss:$16 sps:$4 sm:$0xff]   ;;  %v10150_v22 = vld [vmem:[%s13920_s2 + $0x100] ss:$16 sps:$4 sm:$0xff]  }
  0x2b   : > { %v10153_v23 = vld [vmem:[%s13920_s2 + $0x108] ss:$16 sps:$4 sm:$0xff]   ;;  %v10158_v24 = vld [vmem:[%s13920_s2 + $0x124] ss:$16 sps:$4 sm:$0xff]   ;;  %v10161_v25 = vld [vmem:[%s13920_s2 + $0x12c] ss:$16 sps:$4 sm:$0xff]  }
  0x2c   : > { %v10156_v26 = vld [vmem:[%s13920_s2 + $0x120] ss:$16 sps:$4 sm:$0xff]   ;;  %v10159_v27 = vld [vmem:[%s13920_s2 + $0x128] ss:$16 sps:$4 sm:$0xff]   ;;  %v10164_v28 = vld [vmem:[%s13920_s2 + $0x144] ss:$16 sps:$4 sm:$0xff]  }
  0x2d   : > { %493 = vmatpush1.bf16.msra.mxu0 %v10076_v31  ;;  %648 = vmatpush1.bf16.msra.mxu1 %v10077_v32  ;;  %v10162_v29 = vld [vmem:[%s13920_s2 + $0x140] ss:$16 sps:$4 sm:$0xff]   ;;  %v10165_v30 = vld [vmem:[%s13920_s2 + $0x148] ss:$16 sps:$4 sm:$0xff]   ;;  %v10167_v31 = vld [vmem:[%s13920_s2 + $0x14c] ss:$16 sps:$4 sm:$0xff]  }
  0x2e   : > { %786 = vmatprep.subr.bf16.mxu0 %v10080_v34  ;;  %1152 = vmatprep.subr.bf16.mxu1 %v10104_v38  ;;  %v10170_v32 = vld [vmem:[%s13920_s2 + $0x164] ss:$16 sps:$4 sm:$0xff]   ;;  %v10173_v33 = vld [vmem:[%s13920_s2 + $0x16c] ss:$16 sps:$4 sm:$0xff]   ;;  %v10168_v34 = vld [vmem:[%s13920_s2 + $0x160] ss:$16 sps:$4 sm:$0xff]   ;;  %v519_v38 = vlaneseq }
  0x2f   : > { %vm1615_vm6 = vcmask 23552   ;;  %vm3354_vm9 = vcmask 1046528   ;;  %vm3348_vm10 = vcmask 56320   ;;  %vm4422_vm14 = vcmask 916480   ;;  %s373_s12 = sand.u32 1, %s11034_s18   ;;  %s9581_s25 = sshll.u32 %s11131_s21, 10 }
  0x30   : > { %511 = vmatmul.mubr.bf16.vlgmr.msra.gmra.mrb[0].mxu0 %v381_v35  ;;  %666 = vmatmul.mubr.bf16.vlgmr.msra.gmra.mrb[0].mxu1 %v381_v35  ;;  %vm11046_vm15 = vmmov 1   ;;  %s8204_s24 = sshll.u32 %s373_s12, 6  ;;  %s13869_s13 = scalar_lea.hbm %s13929_s11, %s9581_s25 }
  0x31   : > { %787 = vmatpush1.bf16.msra.mxu0 %v10078_v36  ;;  %818 = vmatprep.mubr.bf16.mxu0 %v11044_v2  ;;  %v10176_v36 = vld [vmem:[%s13920_s2 + $0x184] ss:$16 sps:$4 sm:$0xff]   ;;  %s375_s19 = scalar_lea.vmem [#allocation2], %s8204_s24  ;;  %s13877_s21 = scalar_lea.sflag [#allocation3], %s373_s12 }
  0x32   : > { %788 = vmatprep.subr.bf16.mxu0 %v10083_v37  ;;  %1153 = vmatpush1.bf16.msra.mxu1 %v10102_v40  ;;  %v10179_v37 = vld [vmem:[%s13920_s2 + $0x18c] ss:$16 sps:$4 sm:$0xff]   ;;  %s8141_s29 = sshll.u32 %s375_s19, 4  ;;  %s11047_s15 = smov [#allocation2]   ;;  %s13871_s29 = int_to_ptr.vmem [resolvable:$true] %s8141_s29 }
  0x33   : > { %1154 = vmatprep.subr.bf16.mxu1 %v10110_v55  ;;  %s10980_s14 = scalar_lea.vmem %s13871_s29, 1024  ;;  %s10984_s16 = sshll.u32 %s11047_s15, 4  ;;  %s10985_s16 = int_to_ptr.vmem [resolvable:$false] %s10984_s16 }
  0x34   : > { %p10981_p11 = scmp.ne.s32.totalorder %s13871_s29, %s10980_s14  ;;  %s10986_s22 = scalar_lea.vmem %s10985_s16, 2048 }
  0x35   : > { %789 = vmatpush1.bf16.msra.mxu0 %v10081_v39  ;;  %v11461_v39 = vshrl.u32 %v519_v38, 7  ;;  %p10987_p0 = scmp.lt.s32.totalorder %s13871_s29, %s10985_s16  ;;  %p10988_p1 = scmp.lt.s32.totalorder %s10986_s22, %s10980_s14 }
  0x36   : > { %790 = vmatprep.subr.bf16.mxu0 %v10086_v41  ;;  %1155 = vmatpush1.bf16.msra.mxu1 %v10108_v56  ;;  %p10982_p12 = pnand %p10981_p11, %p11148_p5 }
  0x37   : > { %1156 = vmatprep.subr.bf16.mxu1 %v10116_v59  ;;  %vm521_vm0 = vcmp.eq.s32.totalorder %v11461_v39, 0  ;;  %v11465_v40 = vsub.s32 0, %v11461_v39  ;;  %vm674_vm1 = vcmp.eq.s32.totalorder %v11461_v39, 1  ;;  %vm827_vm2 = vcmp.eq.s32.totalorder %v11461_v39, 2  ;;  %p10989_p2 = por %p10988_p1, %p10987_p0 }
  0x38   : > { %p10983_p13 = pneg %p10982_p12 }
  0x39   : > { %791 = vmatpush1.bf16.msra.mxu0 %v10084_v42  ;;  %v11045_v42 = vmov 0.0  }
  0x3a   : > { %792 = vmatprep.subr.bf16.mxu0 %v10089_v43  ;;  %1157 = vmatpush1.bf16.msra.mxu1 %v10114_v61  ;;  %v8221_v43 = vsel %vm521_vm0, 1.0, %v11045_v42  ;;  %vm12829_vm0 = vmpackc.low %vm3354_vm9, %vm11046_vm15  ;;  %p10990_p3 = pnand %p10989_p2, %p10983_p13 }
  0x3b   : > { %1158 = vmatprep.subr.bf16.mxu1 %v10122_v63  ;;  %v842_v63 = vld [vmem:[%s13924_s6] sm:$0x3] }
  0x3d   : > { %793 = vmatpush1.bf16.msra.mxu0 %v10087_v44 }
  0x3e   : > { %794 = vmatprep.subr.bf16.mxu0 %v10092_v45  ;;  %1159 = vmatpush1.bf16.msra.mxu1 %v10120_v0  ;;  %v8254_v45 = vsel %vm674_vm1, 1.0, %v11045_v42  ;;  %vm4973_vm1 = vcmask 121856  }
  0x3f   : > { %1160 = vmatprep.subr.bf16.mxu1 %v10128_v3 }
  0x41   : > { %795 = vmatpush1.bf16.msra.mxu0 %v10090_v46 }
  0x42   : > { %796 = vmatprep.subr.bf16.mxu0 %v10095_v47  ;;  %1161 = vmatpush1.bf16.msra.mxu1 %v10126_v6 }
  0x43   : > { %1162 = vmatprep.subr.bf16.mxu1 %v10134_v7 }
  0x45   : > { %797 = vmatpush1.bf16.msra.mxu0 %v10093_v48 }
  0x46   : > { %798 = vmatprep.subr.bf16.mxu0 %v10098_v49  ;;  %1163 = vmatpush1.bf16.msra.mxu1 %v10132_v9 }
  0x47   : > { %1164 = vmatprep.subr.bf16.mxu1 %v10140_v11 }
  0x49   : > { %799 = vmatpush1.bf16.msra.mxu0 %v10096_v50 }
  0x4a   : > { %800 = vmatprep.subr.bf16.mxu0 %v10101_v51  ;;  %1165 = vmatpush1.bf16.msra.mxu1 %v10138_v14 }
  0x4b   : > { %1166 = vmatprep.subr.bf16.mxu1 %v10146_v15 }
  0x4d   : > { %801 = vmatpush1.bf16.msra.mxu0 %v10099_v52 }
  0x4e   : > { %1193 = vmatprep.subr.bf16.mxu0 %v10107_v53  ;;  %1167 = vmatpush1.bf16.msra.mxu1 %v10144_v18  ;;  %v10174_v18 = vld [vmem:[%s13920_s2 + $0x180] ss:$16 sps:$4 sm:$0xff]  }
  0x4f   : > { %1168 = vmatprep.subr.bf16.mxu1 %v10152_v19  ;;  %v10177_v19 = vld [vmem:[%s13920_s2 + $0x188] ss:$16 sps:$4 sm:$0xff]  }
  0x50   : > { %819 = vmatmul.mubr.bf16.vlgmr.msra.gmra.mrb[4].mxu0 %v381_v35  ;;  %v10171_v35 = vld [vmem:[%s13920_s2 + $0x168] ss:$16 sps:$4 sm:$0xff]  }
  0x51   : > { %1194 = vmatpush1.bf16.msra.mxu0 %v10105_v54 }
  0x52   : > { %1195 = vmatprep.subr.bf16.mxu0 %v10113_v58  ;;  %1169 = vmatpush1.bf16.msra.mxu1 %v10150_v22  ;;  %v10185_v22 = vld [vmem:[%s13920_s2 + $0x1ac] ss:$16 sps:$4 sm:$0xff]  }
  0x53   : > { %1170 = vmatprep.subr.bf16.mxu1 %v10158_v24  ;;  %v10180_v24 = vld [vmem:[%s13920_s2 + $0x1a0] ss:$16 sps:$4 sm:$0xff]  }
  0x55   : > { %1196 = vmatpush1.bf16.msra.mxu0 %v10111_v57 }
  0x56   : > { %1197 = vmatprep.subr.bf16.mxu0 %v10119_v60  ;;  %1171 = vmatpush1.bf16.msra.mxu1 %v10156_v26  ;;  %v10188_v26 = vld [vmem:[%s13920_s2 + $0x1c4] ss:$16 sps:$4 sm:$0xff]  }
  0x57   : > { %1172 = vmatprep.subr.bf16.mxu1 %v10164_v28  ;;  %v10186_v28 = vld [vmem:[%s13920_s2 + $0x1c0] ss:$16 sps:$4 sm:$0xff]  }
  0x59   : > { %1198 = vmatpush1.bf16.msra.mxu0 %v10117_v62  ;;  %v8287_v62 = vsel %vm827_vm2, 1.0, %v11045_v42 }
  0x5a   : > { %1199 = vmatprep.subr.bf16.mxu0 %v10125_v1  ;;  %1173 = vmatpush1.bf16.msra.mxu1 %v10162_v29  ;;  %v11480_v1 = vsub.s32 1, %v11461_v39  ;;  %v10189_v29 = vld [vmem:[%s13920_s2 + $0x1c8] ss:$16 sps:$4 sm:$0xff]  }
  0x5b   : > { %1174 = vmatprep.subr.bf16.mxu1 %v10170_v32  ;;  %v10192_v32 = vld [vmem:[%s13920_s2 + $0x1e0] ss:$16 sps:$4 sm:$0xff]  }
  0x5c   : > { %v851_v11 = vrot.slane %v842_v63, %v11480_v1 }
  0x5d   : > { %1200 = vmatpush1.bf16.msra.mxu0 %v10123_v4 }
  0x5e   : > { %1201 = vmatprep.subr.bf16.mxu0 %v10131_v5  ;;  %1175 = vmatpush1.bf16.msra.mxu1 %v10168_v34  ;;  %v10200_v34 = vld [vmem:[%s13920_s2 + $0x204] ss:$16 sps:$4 sm:$0xff]  }
  0x5f   : > { %1529 = vmatprep.subr.bf16.mxu1 %v10176_v36  ;;  %v10198_v36 = vld [vmem:[%s13920_s2 + $0x200] ss:$16 sps:$4 sm:$0xff]  }
  0x61   : > { %1202 = vmatpush1.bf16.msra.mxu0 %v10129_v8  ;;  %v847_v8 = vrot.slane %v842_v63, %v11465_v40  ;;  %v10239_v63 = vld [vmem:[%s13920_s2 + $0x2cc] ss:$16 sps:$4 sm:$0xff]  }
  0x62   : > { %1203 = vmatprep.subr.bf16.mxu0 %v10137_v10 }
  0x65   : > { %1204 = vmatpush1.bf16.msra.mxu0 %v10135_v12 }
  0x66   : > { %1205 = vmatprep.subr.bf16.mxu0 %v10143_v13 }
  0x69   : > { %1206 = vmatpush1.bf16.msra.mxu0 %v10141_v16 }
  0x6a   : > { %1207 = vmatprep.subr.bf16.mxu0 %v10149_v17 }
  0x6d   : > { %1208 = vmatpush1.bf16.msra.mxu0 %v10147_v20 }
  0x6e   : > { %1209 = vmatprep.subr.bf16.mxu0 %v10155_v21  ;;  %v10182_v21 = vld [vmem:[%s13920_s2 + $0x1a4] ss:$16 sps:$4 sm:$0xff]  }
  0x71   : > { %1210 = vmatpush1.bf16.msra.mxu0 %v10153_v23 }
  0x72   : > { %1211 = vmatprep.subr.bf16.mxu0 %v10161_v25  ;;  %v10183_v25 = vld [vmem:[%s13920_s2 + $0x1a8] ss:$16 sps:$4 sm:$0xff]  }
  0x75   : > { %1212 = vmatpush1.bf16.msra.mxu0 %v10159_v27  ;;  %v10191_v27 = vld [vmem:[%s13920_s2 + $0x1cc] ss:$16 sps:$4 sm:$0xff]  }
  0x76   : > { %1213 = vmatprep.subr.bf16.mxu0 %v10167_v31  ;;  %v10197_v31 = vld [vmem:[%s13920_s2 + $0x1ec] ss:$16 sps:$4 sm:$0xff]  }
  0x79   : > { %1214 = vmatpush1.bf16.msra.mxu0 %v10165_v30  ;;  %v10194_v30 = vld [vmem:[%s13920_s2 + $0x1e4] ss:$16 sps:$4 sm:$0xff]  }
  0x7a   : > { %1215 = vmatprep.subr.bf16.mxu0 %v10173_v33  ;;  %v10195_v33 = vld [vmem:[%s13920_s2 + $0x1e8] ss:$16 sps:$4 sm:$0xff]  }
  0x7d   : > { %1216 = vmatpush1.bf16.msra.mxu0 %v10171_v35  ;;  %v10203_v35 = vld [vmem:[%s13920_s2 + $0x20c] ss:$16 sps:$4 sm:$0xff]  }
  0x7e   : > { %1570 = vmatprep.subr.bf16.mxu0 %v10179_v37  ;;  %v10201_v37 = vld [vmem:[%s13920_s2 + $0x208] ss:$16 sps:$4 sm:$0xff]  }
 0x103   : > { %v512_v41 = vpop.f32.mrb[0].mxu0  ;;  %v667_v44 = vpop.f32.mrb[0].mxu1 }
 0x104   : > { %v527_v46 = vrot.slane %v512_v41, %v11465_v40  ;;  %v680_v47 = vrot.slane %v667_v44, %v11465_v40  ;;  %v514_v48 = vpop.f32.mrb[1].mxu0  ;;  %v669_v49 = vpop.f32.mrb[1].mxu1  ;;  %v10206_v41 = vld [vmem:[%s13920_s2 + $0x224] ss:$16 sps:$4 sm:$0xff]   ;;  %v10204_v44 = vld [vmem:[%s13920_s2 + $0x220] ss:$16 sps:$4 sm:$0xff]  }
 0x105   : > { %v531_v50 = vrot.slane %v514_v48, %v11465_v40  ;;  %v684_v51 = vrot.slane %v669_v49, %v11465_v40  ;;  %v516_v52 = vpop.f32.mrb[2].mxu0  ;;  %v671_v53 = vpop.f32.mrb[2].mxu1  ;;  %v10210_v48 = vld [vmem:[%s13920_s2 + $0x240] ss:$16 sps:$4 sm:$0xff]   ;;  %v10213_v49 = vld [vmem:[%s13920_s2 + $0x248] ss:$16 sps:$4 sm:$0xff]  }
 0x106   : > { %v532_v54 = vmul.f32 %v8221_v43, %v527_v46  ;;  %v685_v55 = vmul.f32 %v8254_v45, %v680_v47  ;;  %v517_v56 = vpop.f32.mrb[3].mxu0  ;;  %v672_v57 = vpop.f32.mrb[3].mxu1  ;;  %v10212_v46 = vld [vmem:[%s13920_s2 + $0x244] ss:$16 sps:$4 sm:$0xff]   ;;  %v10215_v47 = vld [vmem:[%s13920_s2 + $0x24c] ss:$16 sps:$4 sm:$0xff]  }
 0x107   : > { %v533_v58 = vmul.f32 %v8221_v43, %v531_v50  ;;  %v686_v59 = vmul.f32 %v8254_v45, %v684_v51  ;;  %v10209_v43 = vld [vmem:[%s13920_s2 + $0x22c] ss:$16 sps:$4 sm:$0xff]   ;;  %v10207_v45 = vld [vmem:[%s13920_s2 + $0x228] ss:$16 sps:$4 sm:$0xff]   ;;  %v10218_v50 = vld [vmem:[%s13920_s2 + $0x264] ss:$16 sps:$4 sm:$0xff]  }
 0x108   : > { %v687_v60 = vadd.f32 %v685_v55, %v532_v54  ;;  %v10221_v51 = vld [vmem:[%s13920_s2 + $0x26c] ss:$16 sps:$4 sm:$0xff]   ;;  %v10216_v52 = vld [vmem:[%s13920_s2 + $0x260] ss:$16 sps:$4 sm:$0xff]   ;;  %v10219_v53 = vld [vmem:[%s13920_s2 + $0x268] ss:$16 sps:$4 sm:$0xff]  }
 0x109   : > { %v688_v61 = vadd.f32 %v686_v59, %v533_v58  ;;  %v10224_v54 = vld [vmem:[%s13920_s2 + $0x284] ss:$16 sps:$4 sm:$0xff]   ;;  %v10227_v55 = vld [vmem:[%s13920_s2 + $0x28c] ss:$16 sps:$4 sm:$0xff]   ;;  %v10222_v56 = vld [vmem:[%s13920_s2 + $0x280] ss:$16 sps:$4 sm:$0xff]  }
 0x10a   : > { %v10225_v57 = vld [vmem:[%s13920_s2 + $0x288] ss:$16 sps:$4 sm:$0xff]   ;;  %v10230_v58 = vld [vmem:[%s13920_s2 + $0x2a4] ss:$16 sps:$4 sm:$0xff]   ;;  %v10233_v59 = vld [vmem:[%s13920_s2 + $0x2ac] ss:$16 sps:$4 sm:$0xff]  }
 0x123   : > { %v820_v0 = vpop.f32.mrb[4].mxu0 }
 0x124   : > { %v833_v3 = vrot.slane %v820_v0, %v11465_v40  ;;  %v822_v4 = vpop.f32.mrb[5].mxu0  ;;  %v10234_v0 = vld [vmem:[%s13920_s2 + $0x2c0] ss:$16 sps:$4 sm:$0xff]  }
 0x125   : > { %v837_v5 = vrot.slane %v822_v4, %v11465_v40  ;;  %v824_v6 = vpop.f32.mrb[6].mxu0  ;;  %v10242_v4 = vld [vmem:[%s13920_s2 + $0x2e4] ss:$16 sps:$4 sm:$0xff]  }
 0x126   : > { %v838_v7 = vmul.f32 %v8287_v62, %v833_v3  ;;  %v825_v9 = vpop.f32.mrb[7].mxu0  ;;  %v10237_v3 = vld [vmem:[%s13920_s2 + $0x2c8] ss:$16 sps:$4 sm:$0xff]   ;;  %v10240_v6 = vld [vmem:[%s13920_s2 + $0x2e0] ss:$16 sps:$4 sm:$0xff]  }
 0x127   : > { %v839_v10 = vmul.f32 %v8287_v62, %v837_v5  ;;  %v10236_v62 = vld [vmem:[%s13920_s2 + $0x2c4] ss:$16 sps:$4 sm:$0xff]   ;;  %v10245_v5 = vld [vmem:[%s13920_s2 + $0x2ec] ss:$16 sps:$4 sm:$0xff]   ;;  %v10246_v9 = vld [vmem:[%s13920_s2 + $0x308] ss:$16 sps:$4 sm:$0xff]  }
 0x128   : > { %v840_v12 = vadd.f32 %v838_v7, %v687_v60  ;;  %v10228_v60 = vld [vmem:[%s13920_s2 + $0x2a0] ss:$16 sps:$4 sm:$0xff]   ;;  %v10243_v7 = vld [vmem:[%s13920_s2 + $0x2e8] ss:$16 sps:$4 sm:$0xff]  }
 0x129   : > { %v841_v13 = vadd.f32 %v839_v10, %v688_v61  ;;  %v10231_v61 = vld [vmem:[%s13920_s2 + $0x2a8] ss:$16 sps:$4 sm:$0xff]   ;;  %v10251_v10 = vld [vmem:[%s13920_s2 + $0x32c] ss:$16 sps:$4 sm:$0xff]  }
 0x12a   : > { %v854_v14 = vadd.f32 %v847_v8, %v840_v12  ;;  %v10248_v8 = vld [vmem:[%s13920_s2 + $0x30c] ss:$16 sps:$4 sm:$0xff]  }
 0x12b   : > { %v855_v15 = vadd.f32 %v851_v11, %v841_v13  ;;  %v10249_v11 = vld [vmem:[%s13920_s2 + $0x328] ss:$16 sps:$4 sm:$0xff]   ;;  %v10254_v12 = vld [vmem:[%s13920_s2 + $0x34c] ss:$16 sps:$4 sm:$0xff]  }
 0x12c   : > { %v856_v16 = vmax.f32 %v854_v14, 0.0  ;;  %v10252_v13 = vld [vmem:[%s13920_s2 + $0x348] ss:$16 sps:$4 sm:$0xff]   ;;  %v10257_v14 = vld [vmem:[%s13920_s2 + $0x36c] ss:$16 sps:$4 sm:$0xff]  }
 0x12d   : > { %v857_v17 = vmax.f32 %v855_v15, 0.0  ;;  %v10255_v15 = vld [vmem:[%s13920_s2 + $0x368] ss:$16 sps:$4 sm:$0xff]  }
 0x12e   : > { %v11500_v23 = vpack.c.bf16 %v856_v16, %v856_v16  ;;  %v10260_v16 = vld [vmem:[%s13920_s2 + $0x38c] ss:$16 sps:$4 sm:$0xff]  }
 0x12f   : > { %v11492_v20 = vpack.c.bf16 %v857_v17, %v857_v17  ;;  %v10258_v17 = vld [vmem:[%s13920_s2 + $0x388] ss:$16 sps:$4 sm:$0xff]  }
 0x131   : > { %8336 = vmatprep.mubr.msk.bf16.mxu1 %vm1148_vm3, %v11492_v20  ;;  %8337 = vmatprep.mubr.msk.bf16.mxu0 %vm1148_vm3, %v11492_v20 }
 0x132   : > { %1185 = vmatmul.mubr.bf16.vlgmr.msra.gmra.mrb[4].mxu1 %v11500_v23  ;;  %1226 = vmatmul.mubr.bf16.vlgmr.msra.gmra.mrb[8].mxu0 %v11500_v23 }
 0x133   : > { %1530 = vmatpush1.bf16.msra.mxu1 %v10174_v18  ;;  %1571 = vmatpush1.bf16.msra.mxu0 %v10177_v19  ;;  %v10263_v18 = vld [vmem:[%s13920_s2 + $0x3ac] ss:$16 sps:$4 sm:$0xff]   ;;  %v10261_v19 = vld [vmem:[%s13920_s2 + $0x3a8] ss:$16 sps:$4 sm:$0xff]  }
 0x134   : > { %8435 = vmatprep.mubr.msk.bf16.mxu1 %vm1148_vm3, %v11492_v20  ;;  %8436 = vmatprep.mubr.msk.bf16.mxu0 %vm1148_vm3, %v11492_v20 }
 0x135   : > { %1531 = vmatprep.subr.bf16.mxu1 %v10182_v21  ;;  %1572 = vmatprep.subr.bf16.mxu0 %v10185_v22  ;;  %v10266_v21 = vld [vmem:[%s13920_s2 + $0x3cc] ss:$16 sps:$4 sm:$0xff]   ;;  %v10264_v22 = vld [vmem:[%s13920_s2 + $0x3c8] ss:$16 sps:$4 sm:$0xff]  }
 0x137   : > { %1532 = vmatpush1.bf16.msra.mxu1 %v10180_v24  ;;  %1573 = vmatpush1.bf16.msra.mxu0 %v10183_v25  ;;  %v10269_v24 = vld [vmem:[%s13920_s2 + $0x3ec] ss:$16 sps:$4 sm:$0xff]   ;;  %v10267_v25 = vld [vmem:[%s13920_s2 + $0x3e8] ss:$16 sps:$4 sm:$0xff]  }
 0x138   : > { %1533 = vmatprep.subr.bf16.mxu1 %v10188_v26  ;;  %1574 = vmatprep.subr.bf16.mxu0 %v10191_v27  ;;  %v10272_v26 = vld [vmem:[%s13920_s2 + $0x40c] ss:$16 sps:$4 sm:$0xff]   ;;  %v10270_v27 = vld [vmem:[%s13920_s2 + $0x408] ss:$16 sps:$4 sm:$0xff]  }
 0x13b   : > { %1534 = vmatpush1.bf16.msra.mxu1 %v10186_v28  ;;  %1575 = vmatpush1.bf16.msra.mxu0 %v10189_v29  ;;  %v10275_v28 = vld [vmem:[%s13920_s2 + $0x42c] ss:$16 sps:$4 sm:$0xff]   ;;  %v10273_v29 = vld [vmem:[%s13920_s2 + $0x428] ss:$16 sps:$4 sm:$0xff]  }
 0x13c   : > { %1535 = vmatprep.subr.bf16.mxu1 %v10194_v30  ;;  %1576 = vmatprep.subr.bf16.mxu0 %v10197_v31  ;;  %v10278_v30 = vld [vmem:[%s13920_s2 + $0x44c] ss:$16 sps:$4 sm:$0xff]   ;;  %v10276_v31 = vld [vmem:[%s13920_s2 + $0x448] ss:$16 sps:$4 sm:$0xff]  }
 0x13f   : > { %1536 = vmatpush1.bf16.msra.mxu1 %v10192_v32  ;;  %1577 = vmatpush1.bf16.msra.mxu0 %v10195_v33  ;;  %v10281_v32 = vld [vmem:[%s13920_s2 + $0x46c] ss:$16 sps:$4 sm:$0xff]   ;;  %v10279_v33 = vld [vmem:[%s13920_s2 + $0x468] ss:$16 sps:$4 sm:$0xff]  }
 0x140   : > { %1537 = vmatprep.subr.bf16.mxu1 %v10200_v34  ;;  %1578 = vmatprep.subr.bf16.mxu0 %v10203_v35 }
 0x143   : > { %1538 = vmatpush1.bf16.msra.mxu1 %v10198_v36  ;;  %1579 = vmatpush1.bf16.msra.mxu0 %v10201_v37 }
 0x144   : > { %1539 = vmatprep.subr.bf16.mxu1 %v10206_v41  ;;  %1580 = vmatprep.subr.bf16.mxu0 %v10209_v43 }
 0x147   : > { %1540 = vmatpush1.bf16.msra.mxu1 %v10204_v44  ;;  %1581 = vmatpush1.bf16.msra.mxu0 %v10207_v45 }
 0x148   : > { %1541 = vmatprep.subr.bf16.mxu1 %v10212_v46  ;;  %1582 = vmatprep.subr.bf16.mxu0 %v10215_v47  ;;  %v1235_v46 = vand.u32 127, %v519_v38 }
 0x14a   : > { %v11717_v47 = vmul.u32 2, %v1235_v46  ;;  %v10374_v46 = vld [vmem:[%s13921_s3 + $0x94] ss:$8 sps:$4 sm:$0xff]  }
 0x14b   : > { %1542 = vmatpush1.bf16.msra.mxu1 %v10210_v48  ;;  %1583 = vmatpush1.bf16.msra.mxu0 %v10213_v49 }
 0x14c   : > { %1543 = vmatprep.subr.bf16.mxu1 %v10218_v50  ;;  %1584 = vmatprep.subr.bf16.mxu0 %v10221_v51  ;;  %v11720_v48 = vadd.s32 1, %v11717_v47  ;;  %vm1237_vm7 = vcmp.eq.s32.totalorder %v11461_v39, %v11717_v47 }
 0x14e   : > { %vm1612_vm4 = vcmp.eq.s32.totalorder %v11461_v39, %v11720_v48 }
 0x14f   : > { %1544 = vmatpush1.bf16.msra.mxu1 %v10216_v52  ;;  %1585 = vmatpush1.bf16.msra.mxu0 %v10219_v53  ;;  %v11725_v53 = vsel %vm1612_vm4, 1.0, %v11045_v42 }
 0x150   : > { %1545 = vmatprep.subr.bf16.mxu1 %v10224_v54  ;;  %1586 = vmatprep.subr.bf16.mxu0 %v10227_v55 }
 0x153   : > { %1546 = vmatpush1.bf16.msra.mxu1 %v10222_v56  ;;  %1587 = vmatpush1.bf16.msra.mxu0 %v10225_v57  ;;  %v11742_v57 = vsel %vm1237_vm7, 1.0, %v11045_v42 }
 0x154   : > { %1547 = vmatprep.subr.bf16.mxu1 %v10230_v58  ;;  %1588 = vmatprep.subr.bf16.mxu0 %v10233_v59  ;;  %v10284_v58 = vld [vmem:[%s13920_s2 + $0x304] ss:$16 sps:$4 sm:$0xff]   ;;  %v10282_v59 = vld [vmem:[%s13920_s2 + $0x300] ss:$16 sps:$4 sm:$0xff]  }
 0x157   : > { %1548 = vmatpush1.bf16.msra.mxu1 %v10228_v60  ;;  %1589 = vmatpush1.bf16.msra.mxu0 %v10231_v61  ;;  %v10287_v60 = vld [vmem:[%s13920_s2 + $0x324] ss:$16 sps:$4 sm:$0xff]   ;;  %v10285_v61 = vld [vmem:[%s13920_s2 + $0x320] ss:$16 sps:$4 sm:$0xff]  }
 0x158   : > { %1549 = vmatprep.subr.bf16.mxu1 %v10236_v62  ;;  %1590 = vmatprep.subr.bf16.mxu0 %v10239_v63  ;;  %v10290_v62 = vld [vmem:[%s13920_s2 + $0x344] ss:$16 sps:$4 sm:$0xff]   ;;  %v10288_v63 = vld [vmem:[%s13920_s2 + $0x340] ss:$16 sps:$4 sm:$0xff]  }
 0x15b   : > { %1550 = vmatpush1.bf16.msra.mxu1 %v10234_v0  ;;  %1591 = vmatpush1.bf16.msra.mxu0 %v10237_v3  ;;  %v10293_v0 = vld [vmem:[%s13920_s2 + $0x364] ss:$16 sps:$4 sm:$0xff]  }
 0x15c   : > { %1551 = vmatprep.subr.bf16.mxu1 %v10242_v4  ;;  %1592 = vmatprep.subr.bf16.mxu0 %v10245_v5  ;;  %v10296_v3 = vld [vmem:[%s13920_s2 + $0x384] ss:$16 sps:$4 sm:$0xff]   ;;  %v10294_v4 = vld [vmem:[%s13920_s2 + $0x380] ss:$16 sps:$4 sm:$0xff]  }
 0x15d   : > { %v10299_v5 = vld [vmem:[%s13920_s2 + $0x3a4] ss:$16 sps:$4 sm:$0xff]  }
 0x15f   : > { %1552 = vmatpush1.bf16.msra.mxu1 %v10240_v6  ;;  %1593 = vmatpush1.bf16.msra.mxu0 %v10243_v7  ;;  %v10297_v6 = vld [vmem:[%s13920_s2 + $0x3a0] ss:$16 sps:$4 sm:$0xff]   ;;  %v10302_v7 = vld [vmem:[%s13920_s2 + $0x3c4] ss:$16 sps:$4 sm:$0xff]  }
 0x160   : > { %2261 = vmatprep.subr.bf16.mxu0 %v10248_v8  ;;  %v10300_v8 = vld [vmem:[%s13920_s2 + $0x3c0] ss:$16 sps:$4 sm:$0xff]  }
 0x162   : > { %1562 = vmatmul.mubr.bf16.vlgmr.msra.gmra.mrb[8].mxu1 %v11500_v23  ;;  %1603 = vmatmul.mubr.bf16.vlgmr.msra.gmra.mrb[12].mxu0 %v11500_v23 }
 0x163   : > { %2262 = vmatpush1.bf16.msra.mxu0 %v10246_v9  ;;  %8547 = vmatprep.mubr.msk.bf16.mxu0 %vm1148_vm3, %v11492_v20  ;;  %v10305_v9 = vld [vmem:[%s13920_s2 + $0x3e4] ss:$16 sps:$4 sm:$0xff]  }
 0x164   : > { %2263 = vmatprep.subr.bf16.mxu0 %v10251_v10  ;;  %1696 = vmatprep.mubr.f32.mxu1 %v11045_v42  ;;  %v10303_v10 = vld [vmem:[%s13920_s2 + $0x3e0] ss:$16 sps:$4 sm:$0xff]  }
 0x167   : > { %2264 = vmatpush1.bf16.msra.mxu0 %v10249_v11  ;;  %v10308_v11 = vld [vmem:[%s13920_s2 + $0x404] ss:$16 sps:$4 sm:$0xff]  }
 0x168   : > { %2265 = vmatprep.subr.bf16.mxu0 %v10254_v12  ;;  %v10306_v12 = vld [vmem:[%s13920_s2 + $0x400] ss:$16 sps:$4 sm:$0xff]  }
 0x16b   : > { %2266 = vmatpush1.bf16.msra.mxu0 %v10252_v13  ;;  %v10311_v13 = vld [vmem:[%s13920_s2 + $0x424] ss:$16 sps:$4 sm:$0xff]  }
 0x16c   : > { %2267 = vmatprep.subr.bf16.mxu0 %v10257_v14 }
 0x16f   : > { %2268 = vmatpush1.bf16.msra.mxu0 %v10255_v15 }
 0x170   : > { %2269 = vmatprep.subr.bf16.mxu0 %v10260_v16  ;;  %v10309_v16 = vld [vmem:[%s13920_s2 + $0x420] ss:$16 sps:$4 sm:$0xff]  }
 0x173   : > { %2270 = vmatpush1.bf16.msra.mxu0 %v10258_v17 }
 0x174   : > { %2271 = vmatprep.subr.bf16.mxu0 %v10263_v18  ;;  %v10314_v18 = vld [vmem:[%s13920_s2 + $0x444] ss:$16 sps:$4 sm:$0xff]  }
 0x177   : > { %2272 = vmatpush1.bf16.msra.mxu0 %v10261_v19 }
 0x178   : > { %2273 = vmatprep.subr.bf16.mxu0 %v10266_v21  ;;  %v10312_v21 = vld [vmem:[%s13920_s2 + $0x440] ss:$16 sps:$4 sm:$0xff]  }
 0x17b   : > { %2274 = vmatpush1.bf16.msra.mxu0 %v10264_v22  ;;  %v10317_v22 = vld [vmem:[%s13920_s2 + $0x464] ss:$16 sps:$4 sm:$0xff]  }
 0x17c   : > { %2275 = vmatprep.subr.bf16.mxu0 %v10269_v24  ;;  %v10315_v24 = vld [vmem:[%s13920_s2 + $0x460] ss:$16 sps:$4 sm:$0xff]  }
 0x17f   : > { %2276 = vmatpush1.bf16.msra.mxu0 %v10267_v25  ;;  %v10318_v25 = vld [vmem:[%s13921_s3] ss:$8 sps:$4 sm:$0xff]  }
 0x180   : > { %2277 = vmatprep.subr.bf16.mxu0 %v10272_v26  ;;  %v10320_v26 = vld [vmem:[%s13921_s3 + $0x4] ss:$8 sps:$4 sm:$0xff]  }
 0x183   : > { %2278 = vmatpush1.bf16.msra.mxu0 %v10270_v27  ;;  %v10326_v27 = vld [vmem:[%s13921_s3 + $0x14] ss:$8 sps:$4 sm:$0xff]  }
 0x184   : > { %2279 = vmatprep.subr.bf16.mxu0 %v10275_v28  ;;  %v10332_v28 = vld [vmem:[%s13921_s3 + $0x24] ss:$8 sps:$4 sm:$0xff]  }
 0x187   : > { %2280 = vmatpush1.bf16.msra.mxu0 %v10273_v29  ;;  %v10330_v29 = vld [vmem:[%s13921_s3 + $0x20] ss:$8 sps:$4 sm:$0xff]  }
 0x188   : > { %2281 = vmatprep.subr.bf16.mxu0 %v10278_v30  ;;  %v10338_v30 = vld [vmem:[%s13921_s3 + $0x34] ss:$8 sps:$4 sm:$0xff]  }
 0x18b   : > { %2282 = vmatpush1.bf16.msra.mxu0 %v10276_v31  ;;  %v10336_v31 = vld [vmem:[%s13921_s3 + $0x30] ss:$8 sps:$4 sm:$0xff]  }
 0x18c   : > { %2283 = vmatprep.subr.bf16.mxu0 %v10281_v32  ;;  %v10344_v32 = vld [vmem:[%s13921_s3 + $0x44] ss:$8 sps:$4 sm:$0xff]  }
 0x18f   : > { %2284 = vmatpush1.bf16.msra.mxu0 %v10279_v33  ;;  %v10342_v33 = vld [vmem:[%s13921_s3 + $0x40] ss:$8 sps:$4 sm:$0xff]  }
 0x190   : > { %2840 = vmatprep.subr.bf16.mxu0 %v10320_v26  ;;  %v10389_v26 = vld [vmem:[%s13921_s3 + $0x274] ss:$8 sps:$4 sm:$0xff]  }
 0x192   : > { %2294 = vmatmul.mubr.bf16.vlgmr.msra.gmra.mrb[16].mxu0 %v11500_v23 }
 0x193   : > { %2841 = vmatpush1.bf16.msra.mxu0 %v10318_v25  ;;  %v10381_v25 = vld [vmem:[%s13921_s3 + $0x260] ss:$8 sps:$4 sm:$0xff]  }
 0x194   : > { %2842 = vmatprep.subr.bf16.mxu0 %v10326_v27  ;;  %v10387_v27 = vld [vmem:[%s13921_s3 + $0x270] ss:$8 sps:$4 sm:$0xff]  }
 0x205   : > { %v1186_v34 = vpop.f32.mrb[4].mxu1  ;;  %v1227_v35 = vpop.f32.mrb[8].mxu0 }
 0x206   : > { %v1188_v36 = vpop.f32.mrb[5].mxu1  ;;  %v1229_v37 = vpop.f32.mrb[9].mxu0 }
 0x207   : > { %v1190_v41 = vpop.f32.mrb[6].mxu1  ;;  %v1231_v43 = vpop.f32.mrb[10].mxu0 }
 0x208   : > { %v1191_v44 = vpop.f32.mrb[7].mxu1  ;;  %v1232_v45 = vpop.f32.mrb[11].mxu0  ;;  %v10362_v41 = vld [vmem:[%s13921_s3 + $0x74] ss:$8 sps:$4 sm:$0xff]   ;;  %v10360_v43 = vld [vmem:[%s13921_s3 + $0x70] ss:$8 sps:$4 sm:$0xff]  }
 0x209   : > { %v10368_v44 = vld [vmem:[%s13921_s3 + $0x84] ss:$8 sps:$4 sm:$0xff]   ;;  %v10366_v45 = vld [vmem:[%s13921_s3 + $0x80] ss:$8 sps:$4 sm:$0xff]  }
 0x235   : > { %v1563_v49 = vpop.f32.mrb[8].mxu1  ;;  %v1604_v50 = vpop.f32.mrb[12].mxu0 }
 0x236   : > { %v1565_v51 = vpop.f32.mrb[9].mxu1  ;;  %v1606_v52 = vpop.f32.mrb[13].mxu0 }
 0x237   : > { %v1567_v54 = vpop.f32.mrb[10].mxu1  ;;  %v1608_v55 = vpop.f32.mrb[14].mxu0  ;;  %8438 = vmatprep.subr.msk.mxu1 %vm1619_vm5, %v1565_v51  ;;  %v10378_v51 = vld [vmem:[%s13921_s3 + $0xa0] ss:$8 sps:$4 sm:$0xff]  }
 0x238   : > { %v1568_v38 = vpop.f32.mrb[11].mxu1  ;;  %v1609_v56 = vpop.f32.mrb[15].mxu0  ;;  %8439 = vmatpush1.msk.msra.mxu1 %vm1619_vm5, %v1563_v49  ;;  %v10372_v49 = vld [vmem:[%s13921_s3 + $0x90] ss:$8 sps:$4 sm:$0xff]   ;;  %v10392_v55 = vld [vmem:[%s13921_s3 + $0xc4] ss:$8 sps:$4 sm:$0xff]  }
 0x239   : > { %8440 = vmatmul.mubr.msk.f32.vlgmr.msra.gmra.mrb[12].mxu1 %vm1615_vm6, %v11725_v53  ;;  %8441 = vmatprep.subr.msk.mxu1 %vm1619_vm5, %v1606_v52  ;;  %v10386_v52 = vld [vmem:[%s13921_s3 + $0xb4] ss:$8 sps:$4 sm:$0xff]   ;;  %v10384_v54 = vld [vmem:[%s13921_s3 + $0xb0] ss:$8 sps:$4 sm:$0xff]   ;;  %v10390_v38 = vld [vmem:[%s13921_s3 + $0xc0] ss:$8 sps:$4 sm:$0xff]  }
 0x23a   : > { %8442 = vmatpush1.msk.msra.mxu1 %vm1619_vm5, %v1604_v50  ;;  %1767 = vmatprep.mubr.f32.mxu1 %v11045_v42  ;;  %v10380_v50 = vld [vmem:[%s13921_s3 + $0xa4] ss:$8 sps:$4 sm:$0xff]   ;;  %v10398_v56 = vld [vmem:[%s13921_s3 + $0xd4] ss:$8 sps:$4 sm:$0xff]  }
 0x23b   : > { %8444 = vmatprep.subr.msk.mxu1 %vm1619_vm5, %v1188_v36  ;;  %v10356_v36 = vld [vmem:[%s13921_s3 + $0x64] ss:$8 sps:$4 sm:$0xff]  }
 0x23d   : > { %8443 = vmatmul.mubr.msk.f32.vlgmr.msra.gmra.mrb[14].mxu1 %vm1615_vm6, %v11725_v53 }
 0x23e   : > { %8445 = vmatpush1.msk.msra.mxu1 %vm1619_vm5, %v1186_v34  ;;  %1853 = vmatprep.mubr.f32.mxu1 %v11045_v42  ;;  %v10350_v34 = vld [vmem:[%s13921_s3 + $0x54] ss:$8 sps:$4 sm:$0xff]  }
 0x23f   : > { %8447 = vmatprep.subr.msk.mxu1 %vm1619_vm5, %v1229_v37  ;;  %v10354_v37 = vld [vmem:[%s13921_s3 + $0x60] ss:$8 sps:$4 sm:$0xff]  }
 0x241   : > { %8446 = vmatmul.mubr.msk.f32.vlgmr.msra.gmra.mrb[12].mxu1 %vm1615_vm6, %v11742_v57 }
 0x242   : > { %8448 = vmatpush1.msk.msra.mxu1 %vm1619_vm5, %v1227_v35  ;;  %1924 = vmatprep.mubr.f32.mxu1 %v11045_v42  ;;  %v10348_v35 = vld [vmem:[%s13921_s3 + $0x50] ss:$8 sps:$4 sm:$0xff]  }
 0x243   : > { %2220 = vmatprep.subr.bf16.mxu1 %v10284_v58  ;;  %v10396_v58 = vld [vmem:[%s13921_s3 + $0xd0] ss:$8 sps:$4 sm:$0xff]  }
 0x245   : > { %8449 = vmatmul.mubr.msk.f32.vlgmr.msra.gmra.mrb[14].mxu1 %vm1615_vm6, %v11742_v57 }
 0x246   : > { %2221 = vmatpush1.bf16.msra.mxu1 %v10282_v59  ;;  %8546 = vmatprep.mubr.msk.bf16.mxu1 %vm1148_vm3, %v11492_v20  ;;  %v10291_v20 = vld [vmem:[%s13920_s2 + $0x360] ss:$16 sps:$4 sm:$0xff]   ;;  %v11916_v59 = vadd.s32 2, %v11717_v47 }
 0x247   : > { %2222 = vmatprep.subr.bf16.mxu1 %v10287_v60 }
 0x248   : > { %vm2303_vm8 = vcmp.eq.s32.totalorder %v11461_v39, %v11916_v59 }
 0x24a   : > { %2223 = vmatpush1.bf16.msra.mxu1 %v10285_v61 }
 0x24b   : > { %2224 = vmatprep.subr.bf16.mxu1 %v10290_v62  ;;  %v11921_v62 = vsel %vm2303_vm8, 1.0, %v11045_v42 }
 0x24e   : > { %2225 = vmatpush1.bf16.msra.mxu1 %v10288_v63 }
 0x24f   : > { %2226 = vmatprep.subr.bf16.mxu1 %v10293_v0  ;;  %v10323_v0 = vld [vmem:[%s13921_s3 + $0x1c4] ss:$8 sps:$4 sm:$0xff]  }
 0x252   : > { %2227 = vmatpush1.bf16.msra.mxu1 %v10291_v20 }
 0x253   : > { %2228 = vmatprep.subr.bf16.mxu1 %v10296_v3  ;;  %v10321_v3 = vld [vmem:[%s13921_s3 + $0x1c0] ss:$8 sps:$4 sm:$0xff]  }
 0x256   : > { %2229 = vmatpush1.bf16.msra.mxu1 %v10294_v4  ;;  %v10329_v4 = vld [vmem:[%s13921_s3 + $0x1d4] ss:$8 sps:$4 sm:$0xff]  }
 0x257   : > { %2230 = vmatprep.subr.bf16.mxu1 %v10299_v5  ;;  %v10327_v5 = vld [vmem:[%s13921_s3 + $0x1d0] ss:$8 sps:$4 sm:$0xff]  }
 0x25a   : > { %2231 = vmatpush1.bf16.msra.mxu1 %v10297_v6  ;;  %v10335_v6 = vld [vmem:[%s13921_s3 + $0x1e4] ss:$8 sps:$4 sm:$0xff]  }
 0x25b   : > { %2232 = vmatprep.subr.bf16.mxu1 %v10302_v7  ;;  %v10333_v7 = vld [vmem:[%s13921_s3 + $0x1e0] ss:$8 sps:$4 sm:$0xff]  }
 0x25e   : > { %2233 = vmatpush1.bf16.msra.mxu1 %v10300_v8  ;;  %v10341_v8 = vld [vmem:[%s13921_s3 + $0x1f4] ss:$8 sps:$4 sm:$0xff]  }
 0x25f   : > { %2234 = vmatprep.subr.bf16.mxu1 %v10305_v9  ;;  %v10339_v9 = vld [vmem:[%s13921_s3 + $0x1f0] ss:$8 sps:$4 sm:$0xff]  }
 0x262   : > { %2235 = vmatpush1.bf16.msra.mxu1 %v10303_v10  ;;  %v10347_v10 = vld [vmem:[%s13921_s3 + $0x204] ss:$8 sps:$4 sm:$0xff]  }
 0x263   : > { %2236 = vmatprep.subr.bf16.mxu1 %v10308_v11  ;;  %v10345_v11 = vld [vmem:[%s13921_s3 + $0x200] ss:$8 sps:$4 sm:$0xff]  }
 0x265   : > { %v11810_v14 = vpop.f32.mrb[16].mxu0 }
 0x266   : > { %2237 = vmatpush1.bf16.msra.mxu1 %v10306_v12  ;;  %v11812_v15 = vpop.f32.mrb[17].mxu0  ;;  %v10353_v12 = vld [vmem:[%s13921_s3 + $0x214] ss:$8 sps:$4 sm:$0xff]  }
 0x267   : > { %v2299_v17 = vpop.f32.mrb[18].mxu0  ;;  %2238 = vmatprep.subr.bf16.mxu1 %v10311_v13  ;;  %v10351_v13 = vld [vmem:[%s13921_s3 + $0x210] ss:$8 sps:$4 sm:$0xff]  }
 0x268   : > { %v2300_v19 = vpop.f32.mrb[19].mxu0  ;;  %v10363_v17 = vld [vmem:[%s13921_s3 + $0x230] ss:$8 sps:$4 sm:$0xff]  }
 0x269   : > { %v10369_v19 = vld [vmem:[%s13921_s3 + $0x240] ss:$8 sps:$4 sm:$0xff]  }
 0x26a   : > { %2239 = vmatpush1.bf16.msra.mxu1 %v10309_v16  ;;  %v10365_v16 = vld [vmem:[%s13921_s3 + $0x234] ss:$8 sps:$4 sm:$0xff]  }
 0x26b   : > { %2240 = vmatprep.subr.bf16.mxu1 %v10314_v18  ;;  %v10371_v18 = vld [vmem:[%s13921_s3 + $0x244] ss:$8 sps:$4 sm:$0xff]  }
 0x26e   : > { %2241 = vmatpush1.bf16.msra.mxu1 %v10312_v21  ;;  %v10377_v21 = vld [vmem:[%s13921_s3 + $0x254] ss:$8 sps:$4 sm:$0xff]  }
 0x26f   : > { %2242 = vmatprep.subr.bf16.mxu1 %v10317_v22  ;;  %v10375_v22 = vld [vmem:[%s13921_s3 + $0x250] ss:$8 sps:$4 sm:$0xff]  }
 0x272   : > { %2243 = vmatpush1.bf16.msra.mxu1 %v10315_v24  ;;  %v10383_v24 = vld [vmem:[%s13921_s3 + $0x264] ss:$8 sps:$4 sm:$0xff]  }
 0x275   : > { %2253 = vmatmul.mubr.bf16.vlgmr.msra.gmra.mrb[16].mxu1 %v11500_v23  ;;  %v10324_v23 = vld [vmem:[%s13921_s3 + $0x10] ss:$8 sps:$4 sm:$0xff]  }
 0x276   : > { %2385 = vmatprep.mubr.f32.mxu1 %v11045_v42  ;;  %2843 = vmatpush1.bf16.msra.mxu0 %v10324_v23  ;;  %v10395_v23 = vld [vmem:[%s13921_s3 + $0x284] ss:$8 sps:$4 sm:$0xff]  }
 0x277   : > { %2844 = vmatprep.subr.bf16.mxu0 %v10332_v28  ;;  %v10393_v28 = vld [vmem:[%s13921_s3 + $0x280] ss:$8 sps:$4 sm:$0xff]  }
 0x27a   : > { %2845 = vmatpush1.bf16.msra.mxu0 %v10330_v29  ;;  %v10401_v29 = vld [vmem:[%s13921_s3 + $0x294] ss:$8 sps:$4 sm:$0xff]  }
 0x27b   : > { %2846 = vmatprep.subr.bf16.mxu0 %v10338_v30  ;;  %v10399_v30 = vld [vmem:[%s13921_s3 + $0x290] ss:$8 sps:$4 sm:$0xff]  }
 0x27e   : > { %2847 = vmatpush1.bf16.msra.mxu0 %v10336_v31  ;;  %v10404_v31 = vld [vmem:[%s13921_s3 + $0xe4] ss:$8 sps:$4 sm:$0xff]  }
 0x27f   : > { %2848 = vmatprep.subr.bf16.mxu0 %v10344_v32  ;;  %v10407_v32 = vld [vmem:[%s13921_s3 + $0x2a4] ss:$8 sps:$4 sm:$0xff]  }
 0x282   : > { %2849 = vmatpush1.bf16.msra.mxu0 %v10342_v33  ;;  %v10402_v33 = vld [vmem:[%s13921_s3 + $0xe0] ss:$8 sps:$4 sm:$0xff]  }
 0x283   : > { %2850 = vmatprep.subr.bf16.mxu0 %v10350_v34  ;;  %v10405_v34 = vld [vmem:[%s13921_s3 + $0x2a0] ss:$8 sps:$4 sm:$0xff]  }
 0x286   : > { %2851 = vmatpush1.bf16.msra.mxu0 %v10348_v35  ;;  %v10410_v35 = vld [vmem:[%s13921_s3 + $0xf4] ss:$8 sps:$4 sm:$0xff]  }
 0x287   : > { %2852 = vmatprep.subr.bf16.mxu0 %v10356_v36  ;;  %v10413_v36 = vld [vmem:[%s13921_s3 + $0x2b4] ss:$8 sps:$4 sm:$0xff]  }
 0x28a   : > { %2853 = vmatpush1.bf16.msra.mxu0 %v10354_v37  ;;  %v10408_v37 = vld [vmem:[%s13921_s3 + $0xf0] ss:$8 sps:$4 sm:$0xff]  }
 0x28b   : > { %2854 = vmatprep.subr.bf16.mxu0 %v10362_v41  ;;  %v10411_v41 = vld [vmem:[%s13921_s3 + $0x2b0] ss:$8 sps:$4 sm:$0xff]  }
 0x28e   : > { %2855 = vmatpush1.bf16.msra.mxu0 %v10360_v43  ;;  %v10416_v43 = vld [vmem:[%s13921_s3 + $0x104] ss:$8 sps:$4 sm:$0xff]  }
 0x28f   : > { %2856 = vmatprep.subr.bf16.mxu0 %v10368_v44  ;;  %v10419_v44 = vld [vmem:[%s13921_s3 + $0x2c4] ss:$8 sps:$4 sm:$0xff]  }
 0x292   : > { %2857 = vmatpush1.bf16.msra.mxu0 %v10366_v45  ;;  %v12051_v45 = vld [vmem:[%s13925_s7] sm:$0xf] }
 0x293   : > { %2858 = vmatprep.subr.bf16.mxu0 %v10374_v46  ;;  %v2472_v46 = vrot.slane %v12051_v45, %v11465_v40 }
 0x296   : > { %2859 = vmatpush1.bf16.msra.mxu0 %v10372_v49  ;;  %v2476_v49 = vrot.slane %v12051_v45, %v11480_v1 }
 0x297   : > { %2860 = vmatprep.subr.bf16.mxu0 %v10380_v50  ;;  %v2483_v50 = vsub.s32 3, %v11461_v39 }
 0x29a   : > { %2861 = vmatpush1.bf16.msra.mxu0 %v10378_v51 }
 0x29b   : > { %2862 = vmatprep.subr.bf16.mxu0 %v10386_v52 }
 0x29e   : > { %2863 = vmatpush1.bf16.msra.mxu0 %v10384_v54 }
 0x29f   : > { %2864 = vmatprep.subr.bf16.mxu0 %v10392_v55 }
 0x2a2   : > { %2865 = vmatpush1.bf16.msra.mxu0 %v10390_v38  ;;  %v2484_v38 = vrot.slane %v12051_v45, %v2483_v50 }
 0x2a3   : > { %2866 = vmatprep.subr.bf16.mxu0 %v10398_v56 }
 0x2a6   : > { %2867 = vmatpush1.bf16.msra.mxu0 %v10396_v58 }
 0x2a7   : > { %2868 = vmatprep.subr.bf16.mxu0 %v10404_v31  ;;  %v10453_v31 = vld [vmem:[%s13921_s3 + $0x320] ss:$8 sps:$4 sm:$0xff]  }
 0x2aa   : > { %2869 = vmatpush1.bf16.msra.mxu0 %v10402_v33  ;;  %v10461_v33 = vld [vmem:[%s13921_s3 + $0x334] ss:$8 sps:$4 sm:$0xff]  }
 0x2ab   : > { %2870 = vmatprep.subr.bf16.mxu0 %v10410_v35  ;;  %v10459_v35 = vld [vmem:[%s13921_s3 + $0x330] ss:$8 sps:$4 sm:$0xff]  }
 0x2ae   : > { %2871 = vmatpush1.bf16.msra.mxu0 %v10408_v37  ;;  %v10467_v37 = vld [vmem:[%s13921_s3 + $0x344] ss:$8 sps:$4 sm:$0xff]  }
 0x2af   : > { %2881 = vmatprep.subr.bf16.mxu0 %v10416_v43  ;;  %v10465_v43 = vld [vmem:[%s13921_s3 + $0x340] ss:$8 sps:$4 sm:$0xff]  }
 0x348   : > { %v2254_v60 = vpop.f32.mrb[16].mxu1 }
 0x349   : > { %v2256_v61 = vpop.f32.mrb[17].mxu1 }
 0x34a   : > { %v2258_v63 = vpop.f32.mrb[18].mxu1  ;;  %8549 = vmatprep.subr.msk.mxu1 %vm1619_vm5, %v2256_v61 }
 0x34b   : > { %v2259_v20 = vpop.f32.mrb[19].mxu1  ;;  %8550 = vmatpush1.msk.msra.mxu1 %vm1619_vm5, %v2254_v60 }
 0x34c   : > { %8551 = vmatmul.mubr.msk.f32.vlgmr.msra.gmra.mrb[12].mxu1 %vm1615_vm6, %v11921_v62  ;;  %8552 = vmatprep.subr.msk.mxu1 %vm1619_vm5, %v11812_v15  ;;  %v10357_v15 = vld [vmem:[%s13921_s3 + $0x220] ss:$8 sps:$4 sm:$0xff]  }
 0x34d   : > { %8553 = vmatpush1.msk.msra.mxu1 %vm1619_vm5, %v11810_v14  ;;  %2456 = vmatprep.mubr.f32.mxu1 %v11045_v42  ;;  %v10359_v14 = vld [vmem:[%s13921_s3 + $0x224] ss:$8 sps:$4 sm:$0xff]   ;;  %v10414_v20 = vld [vmem:[%s13921_s3 + $0x100] ss:$8 sps:$4 sm:$0xff]  }
 0x34e   : > { %3263 = vmatprep.subr.bf16.mxu1 %v10323_v0 }
 0x350   : > { %8554 = vmatmul.mubr.msk.f32.vlgmr.msra.gmra.mrb[14].mxu1 %vm1615_vm6, %v11921_v62 }
 0x351   : > { %3264 = vmatpush1.bf16.msra.mxu1 %v10321_v3  ;;  %v10417_v3 = vld [vmem:[%s13921_s3 + $0x2c0] ss:$8 sps:$4 sm:$0xff]  }
 0x352   : > { %3265 = vmatprep.subr.bf16.mxu1 %v10329_v4 }
 0x355   : > { %3266 = vmatpush1.bf16.msra.mxu1 %v10327_v5  ;;  %v10422_v5 = vld [vmem:[%s13921_s3 + $0x114] ss:$8 sps:$4 sm:$0xff]  }
 0x356   : > { %3267 = vmatprep.subr.bf16.mxu1 %v10335_v6  ;;  %v10425_v6 = vld [vmem:[%s13921_s3 + $0x2d4] ss:$8 sps:$4 sm:$0xff]  }
 0x359   : > { %3268 = vmatpush1.bf16.msra.mxu1 %v10333_v7 }
 0x35a   : > { %3269 = vmatprep.subr.bf16.mxu1 %v10341_v8 }
 0x35d   : > { %3270 = vmatpush1.bf16.msra.mxu1 %v10339_v9  ;;  %v10420_v9 = vld [vmem:[%s13921_s3 + $0x110] ss:$8 sps:$4 sm:$0xff]  }
 0x35e   : > { %3271 = vmatprep.subr.bf16.mxu1 %v10347_v10  ;;  %v10423_v10 = vld [vmem:[%s13921_s3 + $0x2d0] ss:$8 sps:$4 sm:$0xff]  }
 0x361   : > { %3272 = vmatpush1.bf16.msra.mxu1 %v10345_v11  ;;  %v10428_v11 = vld [vmem:[%s13921_s3 + $0x124] ss:$8 sps:$4 sm:$0xff]  }
 0x362   : > { %3273 = vmatprep.subr.bf16.mxu1 %v10353_v12  ;;  %v10431_v12 = vld [vmem:[%s13921_s3 + $0x2e4] ss:$8 sps:$4 sm:$0xff]  }
 0x365   : > { %3274 = vmatpush1.bf16.msra.mxu1 %v10351_v13  ;;  %v10426_v13 = vld [vmem:[%s13921_s3 + $0x120] ss:$8 sps:$4 sm:$0xff]  }
 0x366   : > { %3275 = vmatprep.subr.bf16.mxu1 %v10359_v14  ;;  %v10429_v14 = vld [vmem:[%s13921_s3 + $0x2e0] ss:$8 sps:$4 sm:$0xff]  }
 0x369   : > { %3276 = vmatpush1.bf16.msra.mxu1 %v10357_v15  ;;  %v10434_v15 = vld [vmem:[%s13921_s3 + $0x134] ss:$8 sps:$4 sm:$0xff]  }
 0x36a   : > { %3277 = vmatprep.subr.bf16.mxu1 %v10365_v16  ;;  %v10437_v16 = vld [vmem:[%s13921_s3 + $0x2f4] ss:$8 sps:$4 sm:$0xff]  }
 0x36d   : > { %3278 = vmatpush1.bf16.msra.mxu1 %v10363_v17  ;;  %v10432_v17 = vld [vmem:[%s13921_s3 + $0x130] ss:$8 sps:$4 sm:$0xff]  }
 0x36e   : > { %3279 = vmatprep.subr.bf16.mxu1 %v10371_v18  ;;  %v10435_v18 = vld [vmem:[%s13921_s3 + $0x2f0] ss:$8 sps:$4 sm:$0xff]  }
 0x371   : > { %3280 = vmatpush1.bf16.msra.mxu1 %v10369_v19  ;;  %v10440_v19 = vld [vmem:[%s13921_s3 + $0x144] ss:$8 sps:$4 sm:$0xff]  }
 0x372   : > { %3281 = vmatprep.subr.bf16.mxu1 %v10377_v21  ;;  %v10443_v21 = vld [vmem:[%s13921_s3 + $0x304] ss:$8 sps:$4 sm:$0xff]  }
 0x375   : > { %3282 = vmatpush1.bf16.msra.mxu1 %v10375_v22  ;;  %v10438_v22 = vld [vmem:[%s13921_s3 + $0x140] ss:$8 sps:$4 sm:$0xff]  }
 0x376   : > { %3283 = vmatprep.subr.bf16.mxu1 %v10383_v24  ;;  %v10441_v24 = vld [vmem:[%s13921_s3 + $0x300] ss:$8 sps:$4 sm:$0xff]  }
 0x379   : > { %3284 = vmatpush1.bf16.msra.mxu1 %v10381_v25  ;;  %v10446_v25 = vld [vmem:[%s13921_s3 + $0x154] ss:$8 sps:$4 sm:$0xff]  }
 0x37a   : > { %3285 = vmatprep.subr.bf16.mxu1 %v10389_v26  ;;  %v10449_v26 = vld [vmem:[%s13921_s3 + $0x314] ss:$8 sps:$4 sm:$0xff]  }
 0x37d   : > { %3286 = vmatpush1.bf16.msra.mxu1 %v10387_v27  ;;  %v10444_v27 = vld [vmem:[%s13921_s3 + $0x150] ss:$8 sps:$4 sm:$0xff]  }
 0x37e   : > { %3287 = vmatprep.subr.bf16.mxu1 %v10395_v23  ;;  %v10447_v23 = vld [vmem:[%s13921_s3 + $0x310] ss:$8 sps:$4 sm:$0xff]  }
 0x381   : > { %3288 = vmatpush1.bf16.msra.mxu1 %v10393_v28  ;;  %v10452_v28 = vld [vmem:[%s13921_s3 + $0x164] ss:$8 sps:$4 sm:$0xff]  }
 0x382   : > { %3289 = vmatprep.subr.bf16.mxu1 %v10401_v29  ;;  %v10455_v29 = vld [vmem:[%s13921_s3 + $0x324] ss:$8 sps:$4 sm:$0xff]  }
 0x385   : > { %3290 = vmatpush1.bf16.msra.mxu1 %v10399_v30  ;;  %v10450_v30 = vld [vmem:[%s13921_s3 + $0x160] ss:$8 sps:$4 sm:$0xff]  }
 0x386   : > { %3291 = vmatprep.subr.bf16.mxu1 %v10407_v32  ;;  %v10458_v32 = vld [vmem:[%s13921_s3 + $0x174] ss:$8 sps:$4 sm:$0xff]  }
 0x389   : > { %3292 = vmatpush1.bf16.msra.mxu1 %v10405_v34  ;;  %v10456_v34 = vld [vmem:[%s13921_s3 + $0x170] ss:$8 sps:$4 sm:$0xff]  }
 0x38a   : > { %3293 = vmatprep.subr.bf16.mxu1 %v10413_v36  ;;  %v10464_v36 = vld [vmem:[%s13921_s3 + $0x184] ss:$8 sps:$4 sm:$0xff]  }
 0x38d   : > { %3294 = vmatpush1.bf16.msra.mxu1 %v10411_v41  ;;  %v10462_v41 = vld [vmem:[%s13921_s3 + $0x180] ss:$8 sps:$4 sm:$0xff]  }
 0x38e   : > { %3304 = vmatprep.subr.bf16.mxu1 %v10419_v44  ;;  %v2479_v44 = vsub.s32 2, %v11461_v39 }
 0x41f   : > { %v2387_v51 = vpop.f32.mrb[12].mxu1 }
 0x420   : > { %v2489_v52 = vadd.f32 %v2472_v46, %v2387_v51  ;;  %v2389_v54 = vpop.f32.mrb[13].mxu1  ;;  %v10470_v46 = vld [vmem:[%s13921_s3 + $0x194] ss:$8 sps:$4 sm:$0xff]   ;;  %v10468_v51 = vld [vmem:[%s13921_s3 + $0x190] ss:$8 sps:$4 sm:$0xff]  }
 0x421   : > { %v2490_v55 = vadd.f32 %v2476_v49, %v2389_v54  ;;  %v10473_v49 = vld [vmem:[%s13921_s3 + $0x354] ss:$8 sps:$4 sm:$0xff]   ;;  %v2480_v54 = vrot.slane %v12051_v45, %v2479_v44  ;;  %v10477_v45 = vld [vmem:[%s13921_s3 + $0x360] ss:$8 sps:$4 sm:$0xff]  }
 0x422   : > { %v2493_v56 = vmax.f32 %v2489_v52, 0.0  ;;  %v10471_v52 = vld [vmem:[%s13921_s3 + $0x350] ss:$8 sps:$4 sm:$0xff]  }
 0x423   : > { %v2494_v58 = vmax.f32 %v2490_v55, 0.0  ;;  %v12061_v60 = vpop.f32.mrb[14].mxu1  ;;  %v10476_v55 = vld [vmem:[%s13921_s3 + $0x1a4] ss:$8 sps:$4 sm:$0xff]  }
 0x424   : > { %v2460_v61 = vpop.f32.mrb[15].mxu1  ;;  %v12071_v4 = vpack.c.bf16 %v2493_v56, %v2493_v56  ;;  %v10474_v56 = vld [vmem:[%s13921_s3 + $0x1a0] ss:$8 sps:$4 sm:$0xff]  }
 0x425   : > { %v12063_v63 = vpack.c.bf16 %v2494_v58, %v2494_v58  ;;  %v2492_v0 = vadd.f32 %v2484_v38, %v2460_v61  ;;  %v10479_v38 = vld [vmem:[%s13921_s3 + $0x364] ss:$8 sps:$4 sm:$0xff]   ;;  %v2491_v58 = vadd.f32 %v2480_v54, %v12061_v60  ;;  %v10482_v61 = vld [vmem:[%s13921_s3 + $0x1b4] ss:$8 sps:$4 sm:$0xff]   ;;  %v10483_v60 = vld [vmem:[%s13921_s3 + $0x370] ss:$8 sps:$4 sm:$0xff]  }
 0x426   : > { %v10540_v54 = vld [vmem:[%s13921_s3 + $0x4a0] ss:$8 sps:$4 sm:$0xff]  }
 0x427   : > { %v2496_v7 = vmax.f32 %v2492_v0, 0.0  ;;  %2872 = vmatprep.mubr.bf16.mxu0 %v12063_v63  ;;  %3295 = vmatprep.mubr.bf16.mxu1 %v12063_v63  ;;  %v10485_v0 = vld [vmem:[%s13921_s3 + $0x374] ss:$8 sps:$4 sm:$0xff]  }
 0x428   : > { %2873 = vmatmul.mubr.bf16.vlgmr.msra.gmra.mrb[20].mxu0 %v12071_v4  ;;  %3296 = vmatmul.mubr.bf16.vlgmr.msra.gmra.mrb[20].mxu1 %v12071_v4 }
 0x429   : > { %v12083_v8 = vpack.c.bf16 %v2496_v7, %v2496_v7  ;;  %2882 = vmatpush1.bf16.msra.mxu0 %v10414_v20  ;;  %3305 = vmatpush1.bf16.msra.mxu1 %v10417_v3  ;;  %v10480_v20 = vld [vmem:[%s13921_s3 + $0x1b0] ss:$8 sps:$4 sm:$0xff]   ;;  %v2495_v3 = vmax.f32 %v2491_v58, 0.0  ;;  %v10554_v58 = vld [vmem:[%s13921_s3 + $0x4e4] ss:$8 sps:$4 sm:$0xff]  }
 0x42a   : > { %2883 = vmatprep.subr.bf16.mxu0 %v10422_v5  ;;  %3306 = vmatprep.subr.bf16.mxu1 %v10425_v6  ;;  %v10488_v5 = vld [vmem:[%s13921_s3 + $0x384] ss:$8 sps:$4 sm:$0xff]   ;;  %v10486_v6 = vld [vmem:[%s13921_s3 + $0x380] ss:$8 sps:$4 sm:$0xff]  }
 0x42b   : > { %8611 = vmatprep.mubr.msk.bf16.mxu0 %vm1148_vm3, %v12083_v8  ;;  %8725 = vmatprep.mubr.msk.bf16.mxu1 %vm1148_vm3, %v12083_v8  ;;  %v12226_v7 = vpack.c.bf16 %v2495_v3, %v2495_v3  ;;  %v10558_v3 = vld [vmem:[%s13921_s3 + $0x500] ss:$8 sps:$4 sm:$0xff]  }
 0x42d   : > { %2884 = vmatpush1.bf16.msra.mxu0 %v10420_v9  ;;  %3307 = vmatpush1.bf16.msra.mxu1 %v10423_v10  ;;  %v10491_v9 = vld [vmem:[%s13921_s3 + $0x394] ss:$8 sps:$4 sm:$0xff]   ;;  %v10489_v10 = vld [vmem:[%s13921_s3 + $0x390] ss:$8 sps:$4 sm:$0xff]  }
 0x42e   : > { %2885 = vmatprep.subr.bf16.mxu0 %v10428_v11  ;;  %3308 = vmatprep.subr.bf16.mxu1 %v10431_v12  ;;  %v10494_v11 = vld [vmem:[%s13921_s3 + $0x3a4] ss:$8 sps:$4 sm:$0xff]   ;;  %v10492_v12 = vld [vmem:[%s13921_s3 + $0x3a0] ss:$8 sps:$4 sm:$0xff]  }
 0x431   : > { %2886 = vmatpush1.bf16.msra.mxu0 %v10426_v13  ;;  %3309 = vmatpush1.bf16.msra.mxu1 %v10429_v14  ;;  %v10495_v13 = vld [vmem:[%s13921_s3 + $0x3b0] ss:$8 sps:$4 sm:$0xff]   ;;  %v10500_v14 = vld [vmem:[%s13921_s3 + $0x3c4] ss:$8 sps:$4 sm:$0xff]  }
 0x432   : > { %2887 = vmatprep.subr.bf16.mxu0 %v10434_v15  ;;  %3310 = vmatprep.subr.bf16.mxu1 %v10437_v16  ;;  %v10498_v15 = vld [vmem:[%s13921_s3 + $0x3c0] ss:$8 sps:$4 sm:$0xff]   ;;  %v10503_v16 = vld [vmem:[%s13921_s3 + $0x3d4] ss:$8 sps:$4 sm:$0xff]  }
 0x435   : > { %2888 = vmatpush1.bf16.msra.mxu0 %v10432_v17  ;;  %3311 = vmatpush1.bf16.msra.mxu1 %v10435_v18  ;;  %v10501_v17 = vld [vmem:[%s13921_s3 + $0x3d0] ss:$8 sps:$4 sm:$0xff]   ;;  %v10506_v18 = vld [vmem:[%s13921_s3 + $0x3e4] ss:$8 sps:$4 sm:$0xff]  }
 0x436   : > { %2889 = vmatprep.subr.bf16.mxu0 %v10440_v19  ;;  %3312 = vmatprep.subr.bf16.mxu1 %v10443_v21  ;;  %v10504_v19 = vld [vmem:[%s13921_s3 + $0x3e0] ss:$8 sps:$4 sm:$0xff]   ;;  %v10509_v21 = vld [vmem:[%s13921_s3 + $0x3f4] ss:$8 sps:$4 sm:$0xff]  }
 0x439   : > { %2890 = vmatpush1.bf16.msra.mxu0 %v10438_v22  ;;  %3313 = vmatpush1.bf16.msra.mxu1 %v10441_v24  ;;  %v10507_v22 = vld [vmem:[%s13921_s3 + $0x3f0] ss:$8 sps:$4 sm:$0xff]   ;;  %v10512_v24 = vld [vmem:[%s13921_s3 + $0x404] ss:$8 sps:$4 sm:$0xff]  }
 0x43a   : > { %2891 = vmatprep.subr.bf16.mxu0 %v10446_v25  ;;  %3314 = vmatprep.subr.bf16.mxu1 %v10449_v26  ;;  %v10510_v25 = vld [vmem:[%s13921_s3 + $0x400] ss:$8 sps:$4 sm:$0xff]   ;;  %v10515_v26 = vld [vmem:[%s13921_s3 + $0x414] ss:$8 sps:$4 sm:$0xff]  }
 0x43d   : > { %2892 = vmatpush1.bf16.msra.mxu0 %v10444_v27  ;;  %3315 = vmatpush1.bf16.msra.mxu1 %v10447_v23  ;;  %v10513_v27 = vld [vmem:[%s13921_s3 + $0x410] ss:$8 sps:$4 sm:$0xff]   ;;  %v10518_v23 = vld [vmem:[%s13921_s3 + $0x424] ss:$8 sps:$4 sm:$0xff]  }
 0x43e   : > { %2893 = vmatprep.subr.bf16.mxu0 %v10452_v28  ;;  %3316 = vmatprep.subr.bf16.mxu1 %v10455_v29  ;;  %v10516_v28 = vld [vmem:[%s13921_s3 + $0x420] ss:$8 sps:$4 sm:$0xff]   ;;  %v10521_v29 = vld [vmem:[%s13921_s3 + $0x434] ss:$8 sps:$4 sm:$0xff]  }
 0x441   : > { %2894 = vmatpush1.bf16.msra.mxu0 %v10450_v30  ;;  %3317 = vmatpush1.bf16.msra.mxu1 %v10453_v31  ;;  %v10519_v30 = vld [vmem:[%s13921_s3 + $0x430] ss:$8 sps:$4 sm:$0xff]   ;;  %v10524_v31 = vld [vmem:[%s13921_s3 + $0x444] ss:$8 sps:$4 sm:$0xff]  }
 0x442   : > { %2895 = vmatprep.subr.bf16.mxu0 %v10458_v32  ;;  %3318 = vmatprep.subr.bf16.mxu1 %v10461_v33  ;;  %v10522_v32 = vld [vmem:[%s13921_s3 + $0x440] ss:$8 sps:$4 sm:$0xff]   ;;  %v10527_v33 = vld [vmem:[%s13921_s3 + $0x454] ss:$8 sps:$4 sm:$0xff]  }
 0x445   : > { %2896 = vmatpush1.bf16.msra.mxu0 %v10456_v34  ;;  %3319 = vmatpush1.bf16.msra.mxu1 %v10459_v35  ;;  %v10525_v34 = vld [vmem:[%s13921_s3 + $0x450] ss:$8 sps:$4 sm:$0xff]   ;;  %v10530_v35 = vld [vmem:[%s13921_s3 + $0x464] ss:$8 sps:$4 sm:$0xff]  }
 0x446   : > { %2897 = vmatprep.subr.bf16.mxu0 %v10464_v36  ;;  %3320 = vmatprep.subr.bf16.mxu1 %v10467_v37  ;;  %v10528_v36 = vld [vmem:[%s13921_s3 + $0x460] ss:$8 sps:$4 sm:$0xff]   ;;  %v10533_v37 = vld [vmem:[%s13921_s3 + $0x474] ss:$8 sps:$4 sm:$0xff]  }
 0x449   : > { %2898 = vmatpush1.bf16.msra.mxu0 %v10462_v41  ;;  %3321 = vmatpush1.bf16.msra.mxu1 %v10465_v43  ;;  %v10531_v41 = vld [vmem:[%s13921_s3 + $0x470] ss:$8 sps:$4 sm:$0xff]   ;;  %v10536_v43 = vld [vmem:[%s13921_s3 + $0x484] ss:$8 sps:$4 sm:$0xff]  }
 0x44a   : > { %2899 = vmatprep.subr.bf16.mxu0 %v10470_v46  ;;  %3322 = vmatprep.subr.bf16.mxu1 %v10473_v49  ;;  %v10534_v46 = vld [vmem:[%s13921_s3 + $0x480] ss:$8 sps:$4 sm:$0xff]   ;;  %v10539_v49 = vld [vmem:[%s13921_s3 + $0x494] ss:$8 sps:$4 sm:$0xff]  }
 0x44d   : > { %2900 = vmatpush1.bf16.msra.mxu0 %v10468_v51  ;;  %3323 = vmatpush1.bf16.msra.mxu1 %v10471_v52  ;;  %v10537_v51 = vld [vmem:[%s13921_s3 + $0x490] ss:$8 sps:$4 sm:$0xff]   ;;  %v10542_v52 = vld [vmem:[%s13921_s3 + $0x4a4] ss:$8 sps:$4 sm:$0xff]  }
 0x44e   : > { %2901 = vmatprep.subr.bf16.mxu0 %v10476_v55  ;;  %3324 = vmatprep.subr.bf16.mxu1 %v10479_v38  ;;  %v10548_v55 = vld [vmem:[%s13921_s3 + $0x4c4] ss:$8 sps:$4 sm:$0xff]   ;;  %v10546_v38 = vld [vmem:[%s13921_s3 + $0x4c0] ss:$8 sps:$4 sm:$0xff]  }
 0x451   : > { %2902 = vmatpush1.bf16.msra.mxu0 %v10474_v56  ;;  %3325 = vmatpush1.bf16.msra.mxu1 %v10477_v45  ;;  %v10551_v56 = vld [vmem:[%s13921_s3 + $0x4d4] ss:$8 sps:$4 sm:$0xff]   ;;  %v10549_v45 = vld [vmem:[%s13921_s3 + $0x4d0] ss:$8 sps:$4 sm:$0xff]  }
 0x452   : > { %2903 = vmatprep.subr.bf16.mxu0 %v10482_v61  ;;  %3326 = vmatprep.subr.bf16.mxu1 %v10485_v0  ;;  %v10552_v61 = vld [vmem:[%s13921_s3 + $0x4e0] ss:$8 sps:$4 sm:$0xff]   ;;  %v10557_v0 = vld [vmem:[%s13921_s3 + $0x4f4] ss:$8 sps:$4 sm:$0xff]  }
 0x455   : > { %2904 = vmatpush1.bf16.msra.mxu0 %v10480_v20  ;;  %3327 = vmatpush1.bf16.msra.mxu1 %v10483_v60  ;;  %v10555_v20 = vld [vmem:[%s13921_s3 + $0x4f0] ss:$8 sps:$4 sm:$0xff]   ;;  %v10560_v60 = vld [vmem:[%s13921_s3 + $0x504] ss:$8 sps:$4 sm:$0xff]  }
 0x456   : > { %3863 = vmatprep.subr.bf16.mxu1 %v10488_v5  ;;  %v10563_v5 = vld [vmem:[%s13921_s3 + $0x514] ss:$8 sps:$4 sm:$0xff]  }
 0x458   : > { %2914 = vmatmul.mubr.bf16.vlgmr.msra.gmra.mrb[20].mxu0 %v12226_v7  ;;  %3337 = vmatmul.mubr.bf16.vlgmr.msra.gmra.mrb[20].mxu1 %v12226_v7 }
 0x459   : > { %3864 = vmatpush1.bf16.msra.mxu1 %v10486_v6  ;;  %3895 = vmatprep.mubr.bf16.mxu1 %v12063_v63  ;;  %v10497_v63 = vld [vmem:[%s13921_s3 + $0x3b4] ss:$8 sps:$4 sm:$0xff]   ;;  %v10561_v6 = vld [vmem:[%s13921_s3 + $0x510] ss:$8 sps:$4 sm:$0xff]  }
 0x45a   : > { %3865 = vmatprep.subr.bf16.mxu1 %v10491_v9  ;;  %3425 = vmatprep.mubr.f32.mxu0 %v11045_v42  ;;  %v10566_v9 = vld [vmem:[%s13921_s3 + $0x524] ss:$8 sps:$4 sm:$0xff]  }
 0x45d   : > { %3866 = vmatpush1.bf16.msra.mxu1 %v10489_v10  ;;  %v10564_v10 = vld [vmem:[%s13921_s3 + $0x520] ss:$8 sps:$4 sm:$0xff]  }
 0x45e   : > { %3867 = vmatprep.subr.bf16.mxu1 %v10494_v11  ;;  %v10569_v11 = vld [vmem:[%s13921_s3 + $0x534] ss:$8 sps:$4 sm:$0xff]  }
 0x461   : > { %3868 = vmatpush1.bf16.msra.mxu1 %v10492_v12  ;;  %v10567_v12 = vld [vmem:[%s13921_s3 + $0x530] ss:$8 sps:$4 sm:$0xff]  }
 0x462   : > { %3869 = vmatprep.subr.bf16.mxu1 %v10497_v63  ;;  %v10573_v63 = vld [vmem:[%s13922_s4 + $0x1e0] ss:$16 sps:$4 sm:$0xff]  }
 0x465   : > { %3870 = vmatpush1.bf16.msra.mxu1 %v10495_v13  ;;  %v10575_v13 = vld [vmem:[%s13922_s4 + $0x1e4] ss:$16 sps:$4 sm:$0xff]  }
 0x466   : > { %3871 = vmatprep.subr.bf16.mxu1 %v10500_v14  ;;  %v10581_v14 = vld [vmem:[%s13922_s4 + $0x204] ss:$16 sps:$4 sm:$0xff]  }
 0x469   : > { %3872 = vmatpush1.bf16.msra.mxu1 %v10498_v15  ;;  %v10579_v15 = vld [vmem:[%s13922_s4 + $0x200] ss:$16 sps:$4 sm:$0xff]  }
 0x46a   : > { %3873 = vmatprep.subr.bf16.mxu1 %v10503_v16  ;;  %v12414_v16 = vadd.s32 8, %v11461_v39 }
 0x46c   : > { %vm3345_vm11 = vcmp.eq.s32.totalorder %v12414_v16, %v11720_v48  ;;  %vm2923_vm12 = vcmp.eq.s32.totalorder %v12414_v16, %v11717_v47  ;;  %vm3945_vm13 = vcmp.eq.s32.totalorder %v12414_v16, %v11916_v59 }
 0x46d   : > { %3874 = vmatpush1.bf16.msra.mxu1 %v10501_v17 }
 0x46e   : > { %3875 = vmatprep.subr.bf16.mxu1 %v10506_v18 }
 0x471   : > { %3876 = vmatpush1.bf16.msra.mxu1 %v10504_v19 }
 0x472   : > { %3877 = vmatprep.subr.bf16.mxu1 %v10509_v21 }
 0x475   : > { %3878 = vmatpush1.bf16.msra.mxu1 %v10507_v22 }
 0x476   : > { %3879 = vmatprep.subr.bf16.mxu1 %v10512_v24 }
 0x479   : > { %3880 = vmatpush1.bf16.msra.mxu1 %v10510_v25  ;;  %v10585_v25 = vld [vmem:[%s13922_s4 + $0x220] ss:$16 sps:$4 sm:$0xff]  }
 0x47a   : > { %3881 = vmatprep.subr.bf16.mxu1 %v10515_v26 }
 0x47d   : > { %3882 = vmatpush1.bf16.msra.mxu1 %v10513_v27 }
 0x47e   : > { %3883 = vmatprep.subr.bf16.mxu1 %v10518_v23  ;;  %v10593_v23 = vld [vmem:[%s13922_s4 + $0x244] ss:$16 sps:$4 sm:$0xff]  }
 0x481   : > { %3884 = vmatpush1.bf16.msra.mxu1 %v10516_v28  ;;  %v12432_v28 = vsel %vm3345_vm11, 1.0, %v11045_v42 }
 0x482   : > { %3885 = vmatprep.subr.bf16.mxu1 %v10521_v29  ;;  %v10591_v29 = vld [vmem:[%s13922_s4 + $0x240] ss:$16 sps:$4 sm:$0xff]  }
 0x485   : > { %3886 = vmatpush1.bf16.msra.mxu1 %v10519_v30  ;;  %v10599_v30 = vld [vmem:[%s13922_s4 + $0x264] ss:$16 sps:$4 sm:$0xff]  }
 0x486   : > { %3887 = vmatprep.subr.bf16.mxu1 %v10524_v31  ;;  %v10597_v31 = vld [vmem:[%s13922_s4 + $0x260] ss:$16 sps:$4 sm:$0xff]  }
 0x489   : > { %3888 = vmatpush1.bf16.msra.mxu1 %v10522_v32  ;;  %v10605_v32 = vld [vmem:[%s13922_s4 + $0x284] ss:$16 sps:$4 sm:$0xff]  }
 0x48a   : > { %3889 = vmatprep.subr.bf16.mxu1 %v10527_v33  ;;  %v12455_v33 = vsel %vm2923_vm12, 1.0, %v11045_v42 }
 0x48d   : > { %3890 = vmatpush1.bf16.msra.mxu1 %v10525_v34  ;;  %v10603_v34 = vld [vmem:[%s13922_s4 + $0x280] ss:$16 sps:$4 sm:$0xff]  }
 0x48e   : > { %3891 = vmatprep.subr.bf16.mxu1 %v10530_v35  ;;  %v10611_v35 = vld [vmem:[%s13922_s4 + $0x2a4] ss:$16 sps:$4 sm:$0xff]  }
 0x491   : > { %3892 = vmatpush1.bf16.msra.mxu1 %v10528_v36  ;;  %v10609_v36 = vld [vmem:[%s13922_s4 + $0x2a0] ss:$16 sps:$4 sm:$0xff]  }
 0x492   : > { %3893 = vmatprep.subr.bf16.mxu1 %v10533_v37  ;;  %v10617_v37 = vld [vmem:[%s13922_s4 + $0x2c4] ss:$16 sps:$4 sm:$0xff]  }
 0x495   : > { %3894 = vmatpush1.bf16.msra.mxu1 %v10531_v41  ;;  %v10615_v41 = vld [vmem:[%s13922_s4 + $0x2c0] ss:$16 sps:$4 sm:$0xff]  }
 0x496   : > { %3904 = vmatprep.subr.bf16.mxu1 %v10536_v43  ;;  %v10623_v43 = vld [vmem:[%s13922_s4 + $0x2e4] ss:$16 sps:$4 sm:$0xff]  }
 0x498   : > { %3896 = vmatmul.mubr.bf16.vlgmr.msra.gmra.mrb[24].mxu1 %v12071_v4  ;;  %v10545_v4 = vld [vmem:[%s13921_s3 + $0x4b4] ss:$8 sps:$4 sm:$0xff]  }
 0x499   : > { %3905 = vmatpush1.bf16.msra.mxu1 %v10534_v46  ;;  %8847 = vmatprep.mubr.msk.bf16.mxu1 %vm1148_vm3, %v12083_v8  ;;  %v10543_v8 = vld [vmem:[%s13921_s3 + $0x4b0] ss:$8 sps:$4 sm:$0xff]  }
 0x49a   : > { %3906 = vmatprep.subr.bf16.mxu1 %v10539_v49  ;;  %v10621_v46 = vld [vmem:[%s13922_s4 + $0x2e0] ss:$16 sps:$4 sm:$0xff]   ;;  %v10629_v49 = vld [vmem:[%s13922_s4 + $0x304] ss:$16 sps:$4 sm:$0xff]  }
 0x49d   : > { %3907 = vmatpush1.bf16.msra.mxu1 %v10537_v51  ;;  %v10627_v51 = vld [vmem:[%s13922_s4 + $0x300] ss:$16 sps:$4 sm:$0xff]  }
 0x49e   : > { %3908 = vmatprep.subr.bf16.mxu1 %v10542_v52  ;;  %v10635_v52 = vld [vmem:[%s13922_s4 + $0x324] ss:$16 sps:$4 sm:$0xff]  }
 0x4a1   : > { %3909 = vmatpush1.bf16.msra.mxu1 %v10540_v54  ;;  %v10633_v54 = vld [vmem:[%s13922_s4 + $0x320] ss:$16 sps:$4 sm:$0xff]  }
 0x4a2   : > { %3910 = vmatprep.subr.bf16.mxu1 %v10545_v4  ;;  %v10641_v4 = vld [vmem:[%s13922_s4 + $0x344] ss:$16 sps:$4 sm:$0xff]  }
 0x4a5   : > { %3911 = vmatpush1.bf16.msra.mxu1 %v10543_v8  ;;  %v10639_v8 = vld [vmem:[%s13922_s4 + $0x340] ss:$16 sps:$4 sm:$0xff]  }
 0x4a6   : > { %3912 = vmatprep.subr.bf16.mxu1 %v10548_v55 }
 0x4a9   : > { %3913 = vmatpush1.bf16.msra.mxu1 %v10546_v38  ;;  %v10572_v38 = vld [vmem:[%s13922_s4 + $0x4] ss:$16 sps:$4 sm:$0xff]  }
 0x4aa   : > { %3914 = vmatprep.subr.bf16.mxu1 %v10551_v56 }
 0x4ad   : > { %3915 = vmatpush1.bf16.msra.mxu1 %v10549_v45  ;;  %v10570_v45 = vld [vmem:[%s13922_s4] ss:$16 sps:$4 sm:$0xff]  }
 0x4ae   : > { %3916 = vmatprep.subr.bf16.mxu1 %v10554_v58 }
 0x4b1   : > { %3917 = vmatpush1.bf16.msra.mxu1 %v10552_v61  ;;  %v10578_v61 = vld [vmem:[%s13922_s4 + $0x24] ss:$16 sps:$4 sm:$0xff]  }
 0x4b2   : > { %3918 = vmatprep.subr.bf16.mxu1 %v10557_v0 }
 0x4b5   : > { %3919 = vmatpush1.bf16.msra.mxu1 %v10555_v20  ;;  %v12516_v20 = vsel %vm3945_vm13, 1.0, %v11045_v42 }
 0x4b6   : > { %3920 = vmatprep.subr.bf16.mxu1 %v10560_v60  ;;  %v10576_v60 = vld [vmem:[%s13922_s4 + $0x20] ss:$16 sps:$4 sm:$0xff]  }
 0x4b9   : > { %3921 = vmatpush1.bf16.msra.mxu1 %v10558_v3  ;;  %v10584_v3 = vld [vmem:[%s13922_s4 + $0x44] ss:$16 sps:$4 sm:$0xff]  }
 0x4ba   : > { %3922 = vmatprep.subr.bf16.mxu1 %v10563_v5  ;;  %v10582_v5 = vld [vmem:[%s13922_s4 + $0x40] ss:$16 sps:$4 sm:$0xff]  }
 0x4bd   : > { %3923 = vmatpush1.bf16.msra.mxu1 %v10561_v6  ;;  %v10590_v6 = vld [vmem:[%s13922_s4 + $0x64] ss:$16 sps:$4 sm:$0xff]  }
 0x4be   : > { %3924 = vmatprep.subr.bf16.mxu1 %v10566_v9  ;;  %v10588_v9 = vld [vmem:[%s13922_s4 + $0x60] ss:$16 sps:$4 sm:$0xff]  }
 0x4c1   : > { %3925 = vmatpush1.bf16.msra.mxu1 %v10564_v10  ;;  %v10596_v10 = vld [vmem:[%s13922_s4 + $0x84] ss:$16 sps:$4 sm:$0xff]  }
 0x4c2   : > { %3926 = vmatprep.subr.bf16.mxu1 %v10569_v11  ;;  %v10594_v11 = vld [vmem:[%s13922_s4 + $0x80] ss:$16 sps:$4 sm:$0xff]  }
 0x4c5   : > { %3927 = vmatpush1.bf16.msra.mxu1 %v10567_v12  ;;  %v10602_v12 = vld [vmem:[%s13922_s4 + $0xa4] ss:$16 sps:$4 sm:$0xff]  }
 0x4c6   : > { %4881 = vmatprep.subr.bf16.mxu1 %v10575_v13  ;;  %v10608_v13 = vld [vmem:[%s13922_s4 + $0xc4] ss:$16 sps:$4 sm:$0xff]  }
 0x4c8   : > { %3937 = vmatmul.mubr.bf16.vlgmr.msra.gmra.mrb[24].mxu1 %v12226_v7  ;;  %v10587_v7 = vld [vmem:[%s13922_s4 + $0x224] ss:$16 sps:$4 sm:$0xff]  }
 0x4c9   : > { %4882 = vmatpush1.bf16.msra.mxu1 %v10573_v63  ;;  %v10600_v63 = vld [vmem:[%s13922_s4 + $0xa0] ss:$16 sps:$4 sm:$0xff]  }
 0x4ca   : > { %4883 = vmatprep.subr.bf16.mxu1 %v10581_v14  ;;  %v10606_v14 = vld [vmem:[%s13922_s4 + $0xc0] ss:$16 sps:$4 sm:$0xff]  }
 0x4cd   : > { %4884 = vmatpush1.bf16.msra.mxu1 %v10579_v15  ;;  %v10614_v15 = vld [vmem:[%s13922_s4 + $0xe4] ss:$16 sps:$4 sm:$0xff]  }
 0x4ce   : > { %4885 = vmatprep.subr.bf16.mxu1 %v10587_v7  ;;  %v10612_v7 = vld [vmem:[%s13922_s4 + $0xe0] ss:$16 sps:$4 sm:$0xff]  }
 0x4d1   : > { %4886 = vmatpush1.bf16.msra.mxu1 %v10585_v25  ;;  %v10638_v25 = vld [vmem:[%s13922_s4 + $0x164] ss:$16 sps:$4 sm:$0xff]  }
 0x4d2   : > { %4887 = vmatprep.subr.bf16.mxu1 %v10593_v23  ;;  %v10642_v23 = vld [vmem:[%s13922_s4 + $0x180] ss:$16 sps:$4 sm:$0xff]  }
 0x4d5   : > { %4888 = vmatpush1.bf16.msra.mxu1 %v10591_v29  ;;  %v10647_v29 = vld [vmem:[%s13922_s4 + $0x364] ss:$16 sps:$4 sm:$0xff]  }
 0x4d6   : > { %4889 = vmatprep.subr.bf16.mxu1 %v10599_v30  ;;  %v10645_v30 = vld [vmem:[%s13922_s4 + $0x360] ss:$16 sps:$4 sm:$0xff]  }
 0x4d9   : > { %4890 = vmatpush1.bf16.msra.mxu1 %v10597_v31  ;;  %v10650_v31 = vld [vmem:[%s13922_s4 + $0x1a4] ss:$16 sps:$4 sm:$0xff]  }
 0x4da   : > { %4891 = vmatprep.subr.bf16.mxu1 %v10605_v32  ;;  %v10648_v32 = vld [vmem:[%s13922_s4 + $0x1a0] ss:$16 sps:$4 sm:$0xff]  }
 0x4dd   : > { %4892 = vmatpush1.bf16.msra.mxu1 %v10603_v34  ;;  %v10653_v34 = vld [vmem:[%s13922_s4 + $0x384] ss:$16 sps:$4 sm:$0xff]  }
 0x4de   : > { %4893 = vmatprep.subr.bf16.mxu1 %v10611_v35  ;;  %v10651_v35 = vld [vmem:[%s13922_s4 + $0x380] ss:$16 sps:$4 sm:$0xff]  }
 0x4e1   : > { %4894 = vmatpush1.bf16.msra.mxu1 %v10609_v36  ;;  %v10656_v36 = vld [vmem:[%s13922_s4 + $0x1c4] ss:$16 sps:$4 sm:$0xff]  }
 0x4e2   : > { %4895 = vmatprep.subr.bf16.mxu1 %v10617_v37  ;;  %v10654_v37 = vld [vmem:[%s13922_s4 + $0x1c0] ss:$16 sps:$4 sm:$0xff]  }
 0x4e5   : > { %4896 = vmatpush1.bf16.msra.mxu1 %v10615_v41  ;;  %v10659_v41 = vld [vmem:[%s13922_s4 + $0x3a4] ss:$16 sps:$4 sm:$0xff]  }
 0x4e6   : > { %4897 = vmatprep.subr.bf16.mxu1 %v10623_v43  ;;  %v10657_v43 = vld [vmem:[%s13922_s4 + $0x3a0] ss:$16 sps:$4 sm:$0xff]  }
 0x4e9   : > { %4898 = vmatpush1.bf16.msra.mxu1 %v10621_v46  ;;  %v10662_v46 = vld [vmem:[%s13922_s4 + $0xc] ss:$16 sps:$4 sm:$0xff]  }
 0x4ea   : > { %4899 = vmatprep.subr.bf16.mxu1 %v10629_v49  ;;  %v4040_v49 = vld [vmem:[%s13926_s8] sm:$0x3] }
 0x4ed   : > { %4900 = vmatpush1.bf16.msra.mxu1 %v10627_v51  ;;  %v4045_v51 = vrot.slane %v4040_v49, %v11465_v40 }
 0x4ee   : > { %4901 = vmatprep.subr.bf16.mxu1 %v10635_v52 }
 0x4f1   : > { %4902 = vmatpush1.bf16.msra.mxu1 %v10633_v54  ;;  %v4049_v54 = vrot.slane %v4040_v49, %v11480_v1  ;;  %v10705_v49 = vld [vmem:[%s13922_s4 + $0x1e8] ss:$16 sps:$4 sm:$0xff]  }
 0x4f2   : > { %4903 = vmatprep.subr.bf16.mxu1 %v10641_v4 }
 0x4f5   : > { %4904 = vmatpush1.bf16.msra.mxu1 %v10639_v8 }
 0x4f6   : > { %4905 = vmatprep.subr.bf16.mxu1 %v10647_v29  ;;  %v10692_v29 = vld [vmem:[%s13922_s4 + $0x14c] ss:$16 sps:$4 sm:$0xff]  }
 0x4f9   : > { %4906 = vmatpush1.bf16.msra.mxu1 %v10645_v30  ;;  %v10690_v30 = vld [vmem:[%s13922_s4 + $0x148] ss:$16 sps:$4 sm:$0xff]  }
 0x4fa   : > { %4907 = vmatprep.subr.bf16.mxu1 %v10653_v34  ;;  %v10698_v34 = vld [vmem:[%s13922_s4 + $0x18c] ss:$16 sps:$4 sm:$0xff]  }
 0x4fd   : > { %4908 = vmatpush1.bf16.msra.mxu1 %v10651_v35  ;;  %v10696_v35 = vld [vmem:[%s13922_s4 + $0x188] ss:$16 sps:$4 sm:$0xff]  }
 0x4fe   : > { %4909 = vmatprep.subr.bf16.mxu1 %v10659_v41  ;;  %v10704_v41 = vld [vmem:[%s13922_s4 + $0x1cc] ss:$16 sps:$4 sm:$0xff]  }
 0x501   : > { %4910 = vmatpush1.bf16.msra.mxu1 %v10657_v43  ;;  %v10702_v43 = vld [vmem:[%s13922_s4 + $0x1c8] ss:$16 sps:$4 sm:$0xff]  }
 0x52b   : > { %v2915_v17 = vpop.f32.mrb[20].mxu0  ;;  %v3338_v18 = vpop.f32.mrb[20].mxu1 }
 0x52c   : > { %v2917_v19 = vpop.f32.mrb[21].mxu0  ;;  %v3340_v21 = vpop.f32.mrb[21].mxu1 }
 0x52d   : > { %v2919_v22 = vpop.f32.mrb[22].mxu0  ;;  %v3342_v24 = vpop.f32.mrb[22].mxu1  ;;  %8727 = vmatprep.subr.msk.mxu0 %vm3354_vm9, %v3340_v21  ;;  %v10624_v21 = vld [vmem:[%s13922_s4 + $0x120] ss:$16 sps:$4 sm:$0xff]  }
 0x52e   : > { %v2920_v26 = vpop.f32.mrb[23].mxu0  ;;  %v3343_v27 = vpop.f32.mrb[23].mxu1  ;;  %8728 = vmatpush1.msk.msra.mxu0 %vm3354_vm9, %v3338_v18  ;;  %v10618_v18 = vld [vmem:[%s13922_s4 + $0x100] ss:$16 sps:$4 sm:$0xff]   ;;  %v10632_v22 = vld [vmem:[%s13922_s4 + $0x144] ss:$16 sps:$4 sm:$0xff]  }
 0x52f   : > { %8731 = vmatprep.subr.msk.mxu0 %vm3354_vm9, %v2917_v19  ;;  %8729 = vmatmul.mubr.msk.f32.vlgmr.msra.gmra.mrb[24].mxu0 %vm3348_vm10, %v11725_v53  ;;  %v10626_v19 = vld [vmem:[%s13922_s4 + $0x124] ss:$16 sps:$4 sm:$0xff]   ;;  %v10630_v24 = vld [vmem:[%s13922_s4 + $0x140] ss:$16 sps:$4 sm:$0xff]  }
 0x530   : > { %8732 = vmatpush1.msk.msra.mxu0 %vm3354_vm9, %v2915_v17  ;;  %3431 = vmatprep.mubr.f32.mxu0 %v11045_v42  ;;  %v10620_v17 = vld [vmem:[%s13922_s4 + $0x104] ss:$16 sps:$4 sm:$0xff]   ;;  %v10636_v26 = vld [vmem:[%s13922_s4 + $0x160] ss:$16 sps:$4 sm:$0xff]  }
 0x531   : > { %v10644_v27 = vld [vmem:[%s13922_s4 + $0x184] ss:$16 sps:$4 sm:$0xff]  }
 0x533   : > { %8730 = vmatmul.mubr.msk.f32.gmra.mrb[26].mxu0 %vm3348_vm10, %v12432_v28 }
 0x534   : > { %3513 = vmatprep.mubr.f32.mxu0 %v11045_v42 }
 0x537   : > { %8733 = vmatmul.mubr.msk.f32.vlgmr.msra.gmra.mrb[24].mxu0 %vm3348_vm10, %v11742_v57 }
 0x538   : > { %3519 = vmatprep.mubr.f32.mxu0 %v11045_v42 }
 0x53b   : > { %8734 = vmatmul.mubr.msk.f32.gmra.mrb[26].mxu0 %vm3348_vm10, %v12455_v33 }
 0x53c   : > { %4023 = vmatprep.mubr.f32.mxu0 %v11045_v42 }
 0x59b   : > { %v3938_v55 = vpop.f32.mrb[24].mxu1 }
 0x59c   : > { %v3940_v56 = vpop.f32.mrb[25].mxu1 }
 0x59d   : > { %v3942_v58 = vpop.f32.mrb[26].mxu1  ;;  %8849 = vmatprep.subr.msk.mxu0 %vm3354_vm9, %v3940_v56 }
 0x59e   : > { %v3943_v0 = vpop.f32.mrb[27].mxu1  ;;  %8850 = vmatpush1.msk.msra.mxu0 %vm3354_vm9, %v3938_v55  ;;  %vm6832_vm9 = vcmask 252928  }
 0x59f   : > { %8851 = vmatmul.mubr.msk.f32.vlgmr.msra.gmra.mrb[24].mxu0 %vm3348_vm10, %v11921_v62  ;;  %4426 = vmatprep.subr.bf16.mxu0 %v10572_v38 }
 0x5a0   : > { %4029 = vmatprep.mubr.f32.mxu0 %v11045_v42  ;;  %4427 = vmatpush1.bf16.msra.mxu0 %v10570_v45 }
 0x5a1   : > { %4428 = vmatprep.subr.bf16.mxu0 %v10578_v61 }
 0x5a3   : > { %8852 = vmatmul.mubr.msk.f32.gmra.mrb[26].mxu0 %vm3348_vm10, %v12516_v20 }
 0x5a4   : > { %4429 = vmatpush1.bf16.msra.mxu0 %v10576_v60 }
 0x5a5   : > { %4430 = vmatprep.subr.bf16.mxu0 %v10584_v3 }
 0x5a8   : > { %4431 = vmatpush1.bf16.msra.mxu0 %v10582_v5 }
 0x5a9   : > { %4432 = vmatprep.subr.bf16.mxu0 %v10590_v6 }
 0x5ac   : > { %4433 = vmatpush1.bf16.msra.mxu0 %v10588_v9  ;;  %v10660_v9 = vld [vmem:[%s13922_s4 + $0x8] ss:$16 sps:$4 sm:$0xff]  }
 0x5ad   : > { %4434 = vmatprep.subr.bf16.mxu0 %v10596_v10  ;;  %v10665_v10 = vld [vmem:[%s13922_s4 + $0x2c] ss:$16 sps:$4 sm:$0xff]  }
 0x5b0   : > { %4435 = vmatpush1.bf16.msra.mxu0 %v10594_v11  ;;  %v10663_v11 = vld [vmem:[%s13922_s4 + $0x28] ss:$16 sps:$4 sm:$0xff]  }
 0x5b1   : > { %4436 = vmatprep.subr.bf16.mxu0 %v10602_v12  ;;  %v10668_v12 = vld [vmem:[%s13922_s4 + $0x4c] ss:$16 sps:$4 sm:$0xff]  }
 0x5b4   : > { %4437 = vmatpush1.bf16.msra.mxu0 %v10600_v63  ;;  %v10666_v63 = vld [vmem:[%s13922_s4 + $0x48] ss:$16 sps:$4 sm:$0xff]  }
 0x5b5   : > { %4438 = vmatprep.subr.bf16.mxu0 %v10608_v13  ;;  %v10671_v13 = vld [vmem:[%s13922_s4 + $0x6c] ss:$16 sps:$4 sm:$0xff]  }
 0x5b8   : > { %4439 = vmatpush1.bf16.msra.mxu0 %v10606_v14  ;;  %v10669_v14 = vld [vmem:[%s13922_s4 + $0x68] ss:$16 sps:$4 sm:$0xff]  }
 0x5b9   : > { %4440 = vmatprep.subr.bf16.mxu0 %v10614_v15  ;;  %v10674_v15 = vld [vmem:[%s13922_s4 + $0x8c] ss:$16 sps:$4 sm:$0xff]  }
 0x5bc   : > { %4441 = vmatpush1.bf16.msra.mxu0 %v10612_v7  ;;  %v10672_v7 = vld [vmem:[%s13922_s4 + $0x88] ss:$16 sps:$4 sm:$0xff]  }
 0x5bd   : > { %4442 = vmatprep.subr.bf16.mxu0 %v10620_v17  ;;  %v10677_v17 = vld [vmem:[%s13922_s4 + $0xac] ss:$16 sps:$4 sm:$0xff]  }
 0x5c0   : > { %4443 = vmatpush1.bf16.msra.mxu0 %v10618_v18  ;;  %v10675_v18 = vld [vmem:[%s13922_s4 + $0xa8] ss:$16 sps:$4 sm:$0xff]  }
 0x5c1   : > { %4444 = vmatprep.subr.bf16.mxu0 %v10626_v19  ;;  %v10680_v19 = vld [vmem:[%s13922_s4 + $0xcc] ss:$16 sps:$4 sm:$0xff]  }
 0x5c4   : > { %4445 = vmatpush1.bf16.msra.mxu0 %v10624_v21  ;;  %v10678_v21 = vld [vmem:[%s13922_s4 + $0xc8] ss:$16 sps:$4 sm:$0xff]  }
 0x5c5   : > { %4446 = vmatprep.subr.bf16.mxu0 %v10632_v22  ;;  %v10683_v22 = vld [vmem:[%s13922_s4 + $0xec] ss:$16 sps:$4 sm:$0xff]  }
 0x5c8   : > { %4447 = vmatpush1.bf16.msra.mxu0 %v10630_v24  ;;  %v10681_v24 = vld [vmem:[%s13922_s4 + $0xe8] ss:$16 sps:$4 sm:$0xff]  }
 0x5c9   : > { %4448 = vmatprep.subr.bf16.mxu0 %v10638_v25  ;;  %v10686_v25 = vld [vmem:[%s13922_s4 + $0x10c] ss:$16 sps:$4 sm:$0xff]  }
 0x5cc   : > { %4449 = vmatpush1.bf16.msra.mxu0 %v10636_v26  ;;  %v10684_v26 = vld [vmem:[%s13922_s4 + $0x108] ss:$16 sps:$4 sm:$0xff]  }
 0x5cd   : > { %4450 = vmatprep.subr.bf16.mxu0 %v10644_v27  ;;  %v10689_v27 = vld [vmem:[%s13922_s4 + $0x12c] ss:$16 sps:$4 sm:$0xff]  }
 0x5d0   : > { %4451 = vmatpush1.bf16.msra.mxu0 %v10642_v23  ;;  %v10687_v23 = vld [vmem:[%s13922_s4 + $0x128] ss:$16 sps:$4 sm:$0xff]  }
 0x5d1   : > { %4452 = vmatprep.subr.bf16.mxu0 %v10650_v31  ;;  %v10695_v31 = vld [vmem:[%s13922_s4 + $0x16c] ss:$16 sps:$4 sm:$0xff]  }
 0x5d4   : > { %4453 = vmatpush1.bf16.msra.mxu0 %v10648_v32  ;;  %v10693_v32 = vld [vmem:[%s13922_s4 + $0x168] ss:$16 sps:$4 sm:$0xff]  }
 0x5d5   : > { %4454 = vmatprep.subr.bf16.mxu0 %v10656_v36  ;;  %v10701_v36 = vld [vmem:[%s13922_s4 + $0x1ac] ss:$16 sps:$4 sm:$0xff]  }
 0x5d8   : > { %4455 = vmatpush1.bf16.msra.mxu0 %v10654_v37  ;;  %v10699_v37 = vld [vmem:[%s13922_s4 + $0x1a8] ss:$16 sps:$4 sm:$0xff]  }
 0x5d9   : > { %4469 = vmatprep.subr.bf16.mxu0 %v10662_v46  ;;  %v10707_v46 = vld [vmem:[%s13922_s4 + $0x1ec] ss:$16 sps:$4 sm:$0xff]  }
 0x672   : > { %v4025_v52 = vpop.f32.mrb[24].mxu0 }
 0x673   : > { %v4027_v4 = vpop.f32.mrb[25].mxu0  ;;  %v4052_v8 = vadd.f32 %v4045_v51, %v4025_v52  ;;  %v10708_v52 = vld [vmem:[%s13922_s4 + $0x208] ss:$16 sps:$4 sm:$0xff]  }
 0x674   : > { %v4053_v55 = vadd.f32 %v4049_v54, %v4027_v4  ;;  %v10711_v4 = vld [vmem:[%s13922_s4 + $0x228] ss:$16 sps:$4 sm:$0xff]  }
 0x675   : > { %v4056_v61 = vmax.f32 %v4052_v8, 0.0  ;;  %v10716_v8 = vld [vmem:[%s13922_s4 + $0x24c] ss:$16 sps:$4 sm:$0xff]  }
 0x676   : > { %v4031_v38 = vpop.f32.mrb[26].mxu0  ;;  %v4057_v60 = vmax.f32 %v4053_v55, 0.0  ;;  %v10714_v55 = vld [vmem:[%s13922_s4 + $0x248] ss:$16 sps:$4 sm:$0xff]  }
 0x677   : > { %v4054_v56 = vadd.f32 %v4045_v51, %v4031_v38  ;;  %v4033_v45 = vpop.f32.mrb[27].mxu0  ;;  %v10710_v51 = vld [vmem:[%s13922_s4 + $0x20c] ss:$16 sps:$4 sm:$0xff]  }
 0x678   : > { %v4055_v58 = vadd.f32 %v4049_v54, %v4033_v45  ;;  %v10713_v54 = vld [vmem:[%s13922_s4 + $0x22c] ss:$16 sps:$4 sm:$0xff]  }
 0x679   : > { %v4058_v0 = vmax.f32 %v4054_v56, 0.0  ;;  %v10719_v38 = vld [vmem:[%s13922_s4 + $0x26c] ss:$16 sps:$4 sm:$0xff]   ;;  %v10717_v56 = vld [vmem:[%s13922_s4 + $0x268] ss:$16 sps:$4 sm:$0xff]  }
 0x67a   : > { %v4059_v3 = vmax.f32 %v4055_v58, 0.0  ;;  %v10722_v45 = vld [vmem:[%s13922_s4 + $0x28c] ss:$16 sps:$4 sm:$0xff]   ;;  %v10720_v58 = vld [vmem:[%s13922_s4 + $0x288] ss:$16 sps:$4 sm:$0xff]  }
 0x67b   : > { %v12627_v5 = vpack.c.bf16 %v4058_v0, %v4056_v61  ;;  %v10725_v61 = vld [vmem:[%s13922_s4 + $0x2ac] ss:$16 sps:$4 sm:$0xff]   ;;  %v10723_v0 = vld [vmem:[%s13922_s4 + $0x2a8] ss:$16 sps:$4 sm:$0xff]  }
 0x67c   : > { %v12629_v6 = vpack.c.bf16 %v4059_v3, %v4057_v60  ;;  %v10728_v60 = vld [vmem:[%s13922_s4 + $0x2cc] ss:$16 sps:$4 sm:$0xff]   ;;  %v10726_v3 = vld [vmem:[%s13922_s4 + $0x2c8] ss:$16 sps:$4 sm:$0xff]  }
 0x67e   : > { %8913 = vmatprep.mubr.msk.bf16.mxu0 %vm4422_vm14, %v12629_v6  ;;  %9037 = vmatprep.mubr.msk.bf16.mxu1 %vm4422_vm14, %v12629_v6 }
 0x67f   : > { %4459 = vmatmul.mubr.bf16.vlgmr.msra.gmra.mrb[28].mxu0 %v12627_v5  ;;  %4914 = vmatmul.mubr.bf16.vlgmr.msra.gmra.mrb[28].mxu1 %v12627_v5 }
 0x680   : > { %4470 = vmatpush1.bf16.msra.mxu0 %v10660_v9  ;;  %8914 = vmatprep.mubr.msk.bf16.mxu0 %vm4422_vm14, %v12629_v6  ;;  %v10731_v9 = vld [vmem:[%s13922_s4 + $0x2ec] ss:$16 sps:$4 sm:$0xff]  }
 0x681   : > { %4471 = vmatprep.subr.bf16.mxu0 %v10665_v10  ;;  %5149 = vmatprep.mubr.f32.mxu1 %v11045_v42  ;;  %v10729_v10 = vld [vmem:[%s13922_s4 + $0x2e8] ss:$16 sps:$4 sm:$0xff]  }
 0x684   : > { %4472 = vmatpush1.bf16.msra.mxu0 %v10663_v11  ;;  %v10734_v11 = vld [vmem:[%s13922_s4 + $0x30c] ss:$16 sps:$4 sm:$0xff]  }
 0x685   : > { %4473 = vmatprep.subr.bf16.mxu0 %v10668_v12  ;;  %v10732_v12 = vld [vmem:[%s13922_s4 + $0x308] ss:$16 sps:$4 sm:$0xff]  }
 0x688   : > { %4474 = vmatpush1.bf16.msra.mxu0 %v10666_v63  ;;  %v10737_v63 = vld [vmem:[%s13922_s4 + $0x32c] ss:$16 sps:$4 sm:$0xff]  }
 0x689   : > { %4475 = vmatprep.subr.bf16.mxu0 %v10671_v13  ;;  %v10735_v13 = vld [vmem:[%s13922_s4 + $0x328] ss:$16 sps:$4 sm:$0xff]  }
 0x68c   : > { %4476 = vmatpush1.bf16.msra.mxu0 %v10669_v14  ;;  %v10740_v14 = vld [vmem:[%s13922_s4 + $0x34c] ss:$16 sps:$4 sm:$0xff]  }
 0x68d   : > { %4477 = vmatprep.subr.bf16.mxu0 %v10674_v15  ;;  %v10738_v15 = vld [vmem:[%s13922_s4 + $0x348] ss:$16 sps:$4 sm:$0xff]  }
 0x690   : > { %4478 = vmatpush1.bf16.msra.mxu0 %v10672_v7  ;;  %v10743_v7 = vld [vmem:[%s13922_s4 + $0x36c] ss:$16 sps:$4 sm:$0xff]  }
 0x691   : > { %4479 = vmatprep.subr.bf16.mxu0 %v10677_v17  ;;  %v10741_v17 = vld [vmem:[%s13922_s4 + $0x368] ss:$16 sps:$4 sm:$0xff]  }
 0x694   : > { %4480 = vmatpush1.bf16.msra.mxu0 %v10675_v18  ;;  %v10746_v18 = vld [vmem:[%s13922_s4 + $0x38c] ss:$16 sps:$4 sm:$0xff]  }
 0x695   : > { %4481 = vmatprep.subr.bf16.mxu0 %v10680_v19  ;;  %v10744_v19 = vld [vmem:[%s13922_s4 + $0x388] ss:$16 sps:$4 sm:$0xff]  }
 0x698   : > { %4482 = vmatpush1.bf16.msra.mxu0 %v10678_v21  ;;  %v10749_v21 = vld [vmem:[%s13922_s4 + $0x3ac] ss:$16 sps:$4 sm:$0xff]  }
 0x699   : > { %4483 = vmatprep.subr.bf16.mxu0 %v10683_v22  ;;  %v10747_v22 = vld [vmem:[%s13922_s4 + $0x3a8] ss:$16 sps:$4 sm:$0xff]  }
 0x69c   : > { %4484 = vmatpush1.bf16.msra.mxu0 %v10681_v24 }
 0x69d   : > { %4485 = vmatprep.subr.bf16.mxu0 %v10686_v25 }
 0x6a0   : > { %4486 = vmatpush1.bf16.msra.mxu0 %v10684_v26 }
 0x6a1   : > { %4487 = vmatprep.subr.bf16.mxu0 %v10689_v27 }
 0x6a4   : > { %4488 = vmatpush1.bf16.msra.mxu0 %v10687_v23 }
 0x6a5   : > { %4489 = vmatprep.subr.bf16.mxu0 %v10692_v29 }
 0x6a8   : > { %4490 = vmatpush1.bf16.msra.mxu0 %v10690_v30 }
 0x6a9   : > { %4491 = vmatprep.subr.bf16.mxu0 %v10695_v31 }
 0x6ac   : > { %4492 = vmatpush1.bf16.msra.mxu0 %v10693_v32 }
 0x6ad   : > { %4493 = vmatprep.subr.bf16.mxu0 %v10698_v34 }
 0x6b0   : > { %4494 = vmatpush1.bf16.msra.mxu0 %v10696_v35 }
 0x6b1   : > { %4495 = vmatprep.subr.bf16.mxu0 %v10701_v36 }
 0x6b4   : > { %4496 = vmatpush1.bf16.msra.mxu0 %v10699_v37 }
 0x6b5   : > { %4497 = vmatprep.subr.bf16.mxu0 %v10704_v41  ;;  %v10752_v41 = vld [vmem:[%s13922_s4 + $0x3c4] ss:$16 sps:$4 sm:$0xff]  }
 0x6b8   : > { %4498 = vmatpush1.bf16.msra.mxu0 %v10702_v43  ;;  %v10750_v43 = vld [vmem:[%s13922_s4 + $0x3c0] ss:$16 sps:$4 sm:$0xff]  }
 0x6b9   : > { %4924 = vmatprep.subr.bf16.mxu0 %v10707_v46  ;;  %v10755_v46 = vld [vmem:[%s13922_s4 + $0x3e4] ss:$16 sps:$4 sm:$0xff]  }
 0x6bb   : > { %4502 = vmatmul.mubr.bf16.vlgmr.msra.gmra.mrb[32].mxu0 %v12627_v5 }
 0x6bc   : > { %4925 = vmatpush1.bf16.msra.mxu0 %v10705_v49  ;;  %9038 = vmatprep.mubr.msk.bf16.mxu0 %vm4422_vm14, %v12629_v6  ;;  %v12853_v49 = vadd.s32 16, %v11461_v39 }
 0x6bd   : > { %4926 = vmatprep.subr.bf16.mxu0 %v10710_v51  ;;  %v10753_v51 = vld [vmem:[%s13922_s4 + $0x3e0] ss:$16 sps:$4 sm:$0xff]  }
 0x6be   : > { %vm4967_vm2 = vcmp.eq.s32.totalorder %v12853_v49, %v11720_v48  ;;  %vm4514_vm5 = vcmp.eq.s32.totalorder %v12853_v49, %v11717_v47  ;;  %vm5821_vm7 = vcmp.eq.s32.totalorder %v12853_v49, %v11916_v59 }
 0x6c0   : > { %4927 = vmatpush1.bf16.msra.mxu0 %v10708_v52  ;;  %v10758_v52 = vld [vmem:[%s13922_s4 + $0x404] ss:$16 sps:$4 sm:$0xff]  }
 0x6c1   : > { %4928 = vmatprep.subr.bf16.mxu0 %v10713_v54  ;;  %v12867_v54 = vadd.s32 24, %v11461_v39 }
 0x6c3   : > { %vm4968_vm4 = vcmp.eq.s32.totalorder %v12867_v54, %v11720_v48  ;;  %vm4515_vm6 = vcmp.eq.s32.totalorder %v12867_v54, %v11717_v47  ;;  %vm5822_vm8 = vcmp.eq.s32.totalorder %v12867_v54, %v11916_v59 }
 0x6c4   : > { %4929 = vmatpush1.bf16.msra.mxu0 %v10711_v4  ;;  %v12873_v4 = vsel %vm4967_vm2, 1.0, %v11045_v42 }
 0x6c5   : > { %4930 = vmatprep.subr.bf16.mxu0 %v10716_v8  ;;  %v10756_v8 = vld [vmem:[%s13922_s4 + $0x400] ss:$16 sps:$4 sm:$0xff]  }
 0x6c8   : > { %4931 = vmatpush1.bf16.msra.mxu0 %v10714_v55  ;;  %v10761_v55 = vld [vmem:[%s13922_s4 + $0x424] ss:$16 sps:$4 sm:$0xff]  }
 0x6c9   : > { %4932 = vmatprep.subr.bf16.mxu0 %v10719_v38  ;;  %v12887_v38 = vsel %vm4968_vm4, 1.0, %v11045_v42 }
 0x6cc   : > { %4933 = vmatpush1.bf16.msra.mxu0 %v10717_v56  ;;  %v10759_v56 = vld [vmem:[%s13922_s4 + $0x420] ss:$16 sps:$4 sm:$0xff]  }
 0x6cd   : > { %4934 = vmatprep.subr.bf16.mxu0 %v10722_v45  ;;  %v10764_v45 = vld [vmem:[%s13922_s4 + $0x444] ss:$16 sps:$4 sm:$0xff]  }
 0x6d0   : > { %4935 = vmatpush1.bf16.msra.mxu0 %v10720_v58  ;;  %v10762_v58 = vld [vmem:[%s13922_s4 + $0x440] ss:$16 sps:$4 sm:$0xff]  }
 0x6d1   : > { %4936 = vmatprep.subr.bf16.mxu0 %v10725_v61  ;;  %v10767_v61 = vld [vmem:[%s13922_s4 + $0x464] ss:$16 sps:$4 sm:$0xff]  }
 0x6d4   : > { %4937 = vmatpush1.bf16.msra.mxu0 %v10723_v0  ;;  %v10765_v0 = vld [vmem:[%s13922_s4 + $0x460] ss:$16 sps:$4 sm:$0xff]  }
 0x6d5   : > { %4938 = vmatprep.subr.bf16.mxu0 %v10728_v60  ;;  %v10770_v60 = vld [vmem:[%s13922_s4 + $0x484] ss:$16 sps:$4 sm:$0xff]  }
 0x6d8   : > { %4939 = vmatpush1.bf16.msra.mxu0 %v10726_v3  ;;  %v10768_v3 = vld [vmem:[%s13922_s4 + $0x480] ss:$16 sps:$4 sm:$0xff]  }
 0x6d9   : > { %4940 = vmatprep.subr.bf16.mxu0 %v10731_v9  ;;  %v10773_v9 = vld [vmem:[%s13922_s4 + $0x4a4] ss:$16 sps:$4 sm:$0xff]  }
 0x6dc   : > { %4941 = vmatpush1.bf16.msra.mxu0 %v10729_v10  ;;  %v10771_v10 = vld [vmem:[%s13922_s4 + $0x4a0] ss:$16 sps:$4 sm:$0xff]  }
 0x6dd   : > { %4942 = vmatprep.subr.bf16.mxu0 %v10734_v11  ;;  %v10776_v11 = vld [vmem:[%s13922_s4 + $0x4c4] ss:$16 sps:$4 sm:$0xff]  }
 0x6e0   : > { %4943 = vmatpush1.bf16.msra.mxu0 %v10732_v12  ;;  %v10774_v12 = vld [vmem:[%s13922_s4 + $0x4c0] ss:$16 sps:$4 sm:$0xff]  }
 0x6e1   : > { %4944 = vmatprep.subr.bf16.mxu0 %v10737_v63  ;;  %v10779_v63 = vld [vmem:[%s13922_s4 + $0x4e4] ss:$16 sps:$4 sm:$0xff]  }
 0x6e4   : > { %4945 = vmatpush1.bf16.msra.mxu0 %v10735_v13  ;;  %v10777_v13 = vld [vmem:[%s13922_s4 + $0x4e0] ss:$16 sps:$4 sm:$0xff]  }
 0x6e5   : > { %4946 = vmatprep.subr.bf16.mxu0 %v10740_v14  ;;  %v10782_v14 = vld [vmem:[%s13922_s4 + $0x504] ss:$16 sps:$4 sm:$0xff]  }
 0x6e8   : > { %4947 = vmatpush1.bf16.msra.mxu0 %v10738_v15  ;;  %v10780_v15 = vld [vmem:[%s13922_s4 + $0x500] ss:$16 sps:$4 sm:$0xff]  }
 0x6e9   : > { %4948 = vmatprep.subr.bf16.mxu0 %v10743_v7  ;;  %v10785_v7 = vld [vmem:[%s13922_s4 + $0x524] ss:$16 sps:$4 sm:$0xff]  }
 0x6ec   : > { %4949 = vmatpush1.bf16.msra.mxu0 %v10741_v17  ;;  %v10783_v17 = vld [vmem:[%s13922_s4 + $0x520] ss:$16 sps:$4 sm:$0xff]  }
 0x6ed   : > { %4950 = vmatprep.subr.bf16.mxu0 %v10746_v18  ;;  %v10788_v18 = vld [vmem:[%s13922_s4 + $0x544] ss:$16 sps:$4 sm:$0xff]  }
 0x6f0   : > { %4951 = vmatpush1.bf16.msra.mxu0 %v10744_v19  ;;  %v10786_v19 = vld [vmem:[%s13922_s4 + $0x540] ss:$16 sps:$4 sm:$0xff]  }
 0x6f1   : > { %4952 = vmatprep.subr.bf16.mxu0 %v10749_v21  ;;  %v10791_v21 = vld [vmem:[%s13922_s4 + $0x564] ss:$16 sps:$4 sm:$0xff]  }
 0x6f4   : > { %4953 = vmatpush1.bf16.msra.mxu0 %v10747_v22  ;;  %v10789_v22 = vld [vmem:[%s13922_s4 + $0x560] ss:$16 sps:$4 sm:$0xff]  }
 0x6f7   : > { %4957 = vmatmul.mubr.bf16.vlgmr.msra.gmra.mrb[36].mxu0 %v12627_v5 }
 0x6f8   : > { %5060 = vmatprep.mubr.f32.mxu0 %v11045_v42 }
 0x752   : > { %v12822_v24 = vpop.f32.mrb[28].mxu0  ;;  %v4915_v25 = vpop.f32.mrb[28].mxu1 }
 0x753   : > { %v12824_v26 = vpop.f32.mrb[29].mxu0  ;;  %v4917_v27 = vpop.f32.mrb[29].mxu1 }
 0x754   : > { %v12826_v23 = vpop.f32.mrb[30].mxu0  ;;  %v4919_v29 = vpop.f32.mrb[30].mxu1 }
 0x755   : > { %v9837_v31 = vpack.c.bf16 %v12826_v23, %v12822_v24  ;;  %v9825_v32 = vpack.c.bf16 %v4919_v29, %v4915_v25  ;;  %v12835_v34 = vpop.f32.mrb[31].mxu0  ;;  %v4921_v35 = vpop.f32.mrb[31].mxu1  ;;  %v10797_v24 = vld [vmem:[%s13922_s4 + $0x3cc] ss:$16 sps:$4 sm:$0xff]   ;;  %v13014_v23 = vsel %vm4515_vm6, 1.0, %v11045_v42 }
 0x756   : > { %v9834_v36 = vpack.c.bf16 %v12835_v34, %v12824_v26  ;;  %v9822_v37 = vpack.c.bf16 %v4921_v35, %v4917_v27  ;;  %v10794_v27 = vld [vmem:[%s13922_s4 + $0x584] ss:$16 sps:$4 sm:$0xff]   ;;  %v13006_v26 = vsel %vm4514_vm5, 1.0, %v11045_v42  ;;  %v10800_v34 = vld [vmem:[%s13922_s4 + $0x3ec] ss:$16 sps:$4 sm:$0xff]  }
 0x758   : > { %9824 = vmatprep.subr.msk.bf16.mxu0 %vm12829_vm0, %v9822_v37 }
 0x759   : > { %9827 = vmatpush1.bf16.msk.msra.mxu0 %vm12829_vm0, %v9825_v32 }
 0x75a   : > { %5735 = vmatprep.subr.bf16.mxu0 %v10752_v41  ;;  %v10792_v41 = vld [vmem:[%s13922_s4 + $0x580] ss:$16 sps:$4 sm:$0xff]  }
 0x75c   : > { %9043 = vmatmul.mubr.msk.f32.vlgmr.msra.gmra.mrb[40].mxu0 %vm4973_vm1, %v11725_v53 }
 0x75d   : > { %5736 = vmatpush1.bf16.msra.mxu0 %v10750_v43  ;;  %5066 = vmatprep.mubr.f32.mxu0 %v11045_v42 }
 0x75e   : > { %5737 = vmatprep.subr.bf16.mxu0 %v10755_v46 }
 0x760   : > { %9044 = vmatmul.mubr.msk.f32.gmra.mrb[42].mxu0 %vm4973_vm1, %v12432_v28 }
 0x761   : > { %5738 = vmatpush1.bf16.msra.mxu0 %v10753_v51  ;;  %5072 = vmatprep.mubr.f32.mxu0 %v11045_v42 }
 0x762   : > { %5739 = vmatprep.subr.bf16.mxu0 %v10758_v52 }
 0x764   : > { %9045 = vmatmul.mubr.msk.f32.gmra.mrb[44].mxu0 %vm4973_vm1, %v12873_v4 }
 0x765   : > { %5740 = vmatpush1.bf16.msra.mxu0 %v10756_v8  ;;  %5078 = vmatprep.mubr.f32.mxu0 %v11045_v42 }
 0x766   : > { %5741 = vmatprep.subr.bf16.mxu0 %v10761_v55 }
 0x768   : > { %9046 = vmatmul.mubr.msk.f32.gmra.mrb[46].mxu0 %vm4973_vm1, %v12887_v38 }
 0x769   : > { %5742 = vmatpush1.bf16.msra.mxu0 %v10759_v56  ;;  %9185 = vmatprep.mubr.msk.bf16.mxu0 %vm4422_vm14, %v12629_v6 }
 0x76a   : > { %5743 = vmatprep.subr.bf16.mxu0 %v10764_v45  ;;  %v10803_v45 = vld [vmem:[%s13922_s4 + $0x40c] ss:$16 sps:$4 sm:$0xff]  }
 0x76d   : > { %5744 = vmatpush1.bf16.msra.mxu0 %v10762_v58  ;;  %v10801_v58 = vld [vmem:[%s13922_s4 + $0x408] ss:$16 sps:$4 sm:$0xff]  }
 0x76e   : > { %5745 = vmatprep.subr.bf16.mxu0 %v10767_v61  ;;  %v10806_v61 = vld [vmem:[%s13922_s4 + $0x42c] ss:$16 sps:$4 sm:$0xff]  }
 0x771   : > { %5746 = vmatpush1.bf16.msra.mxu0 %v10765_v0  ;;  %v10804_v0 = vld [vmem:[%s13922_s4 + $0x428] ss:$16 sps:$4 sm:$0xff]  }
 0x772   : > { %5747 = vmatprep.subr.bf16.mxu0 %v10770_v60  ;;  %v10809_v60 = vld [vmem:[%s13922_s4 + $0x44c] ss:$16 sps:$4 sm:$0xff]  }
 0x775   : > { %5748 = vmatpush1.bf16.msra.mxu0 %v10768_v3  ;;  %v10807_v3 = vld [vmem:[%s13922_s4 + $0x448] ss:$16 sps:$4 sm:$0xff]  }
 0x776   : > { %5749 = vmatprep.subr.bf16.mxu0 %v10773_v9  ;;  %v10812_v9 = vld [vmem:[%s13922_s4 + $0x46c] ss:$16 sps:$4 sm:$0xff]  }
 0x779   : > { %5750 = vmatpush1.bf16.msra.mxu0 %v10771_v10  ;;  %v10810_v10 = vld [vmem:[%s13922_s4 + $0x468] ss:$16 sps:$4 sm:$0xff]  }
 0x77a   : > { %5751 = vmatprep.subr.bf16.mxu0 %v10776_v11  ;;  %v10815_v11 = vld [vmem:[%s13922_s4 + $0x48c] ss:$16 sps:$4 sm:$0xff]  }
 0x77d   : > { %5752 = vmatpush1.bf16.msra.mxu0 %v10774_v12  ;;  %v10818_v12 = vld [vmem:[%s13922_s4 + $0x4ac] ss:$16 sps:$4 sm:$0xff]  }
 0x77e   : > { %5753 = vmatprep.subr.bf16.mxu0 %v10779_v63  ;;  %v10816_v63 = vld [vmem:[%s13922_s4 + $0x4a8] ss:$16 sps:$4 sm:$0xff]  }
 0x781   : > { %5754 = vmatpush1.bf16.msra.mxu0 %v10777_v13  ;;  %v10821_v13 = vld [vmem:[%s13922_s4 + $0x4cc] ss:$16 sps:$4 sm:$0xff]  }
 0x782   : > { %5755 = vmatprep.subr.bf16.mxu0 %v10782_v14  ;;  %v10819_v14 = vld [vmem:[%s13922_s4 + $0x4c8] ss:$16 sps:$4 sm:$0xff]  }
 0x785   : > { %5756 = vmatpush1.bf16.msra.mxu0 %v10780_v15  ;;  %v10824_v15 = vld [vmem:[%s13922_s4 + $0x4ec] ss:$16 sps:$4 sm:$0xff]  }
 0x786   : > { %5757 = vmatprep.subr.bf16.mxu0 %v10785_v7  ;;  %v10822_v7 = vld [vmem:[%s13922_s4 + $0x4e8] ss:$16 sps:$4 sm:$0xff]  }
 0x789   : > { %5758 = vmatpush1.bf16.msra.mxu0 %v10783_v17  ;;  %v10827_v17 = vld [vmem:[%s13922_s4 + $0x50c] ss:$16 sps:$4 sm:$0xff]  }
 0x78a   : > { %5759 = vmatprep.subr.bf16.mxu0 %v10788_v18  ;;  %v10825_v18 = vld [vmem:[%s13922_s4 + $0x508] ss:$16 sps:$4 sm:$0xff]  }
 0x78d   : > { %5760 = vmatpush1.bf16.msra.mxu0 %v10786_v19  ;;  %v10830_v19 = vld [vmem:[%s13922_s4 + $0x52c] ss:$16 sps:$4 sm:$0xff]  }
 0x78e   : > { %v4503_v25 = vpop.f32.mrb[32].mxu0  ;;  %5761 = vmatprep.subr.bf16.mxu0 %v10791_v21  ;;  %v10828_v21 = vld [vmem:[%s13922_s4 + $0x528] ss:$16 sps:$4 sm:$0xff]  }
 0x78f   : > { %v4505_v29 = vpop.f32.mrb[33].mxu0 }
 0x790   : > { %v4507_v32 = vpop.f32.mrb[34].mxu0 }
 0x791   : > { %v9843_v35 = vpack.c.bf16 %v4507_v32, %v4503_v25  ;;  %v4509_v37 = vpop.f32.mrb[35].mxu0  ;;  %5762 = vmatpush1.bf16.msra.mxu0 %v10789_v22  ;;  %v10833_v22 = vld [vmem:[%s13922_s4 + $0x54c] ss:$16 sps:$4 sm:$0xff]   ;;  %v10831_v25 = vld [vmem:[%s13922_s4 + $0x548] ss:$16 sps:$4 sm:$0xff]  }
 0x792   : > { %v9840_v43 = vpack.c.bf16 %v4509_v37, %v4505_v29  ;;  %5763 = vmatprep.subr.bf16.mxu0 %v10794_v27  ;;  %v10836_v27 = vld [vmem:[%s13922_s4 + $0x56c] ss:$16 sps:$4 sm:$0xff]   ;;  %v10834_v29 = vld [vmem:[%s13922_s4 + $0x568] ss:$16 sps:$4 sm:$0xff]  }
 0x793   : > { %v10839_v32 = vld [vmem:[%s13922_s4 + $0x58c] ss:$16 sps:$4 sm:$0xff]  }
 0x795   : > { %5764 = vmatpush1.bf16.msra.mxu0 %v10792_v41 }
 0x798   : > { %5768 = vmatmul.mubr.bf16.vlgmr.msra.gmra.mrb[48].mxu0 %v12627_v5 }
 0x799   : > { %5913 = vmatprep.mubr.f32.mxu0 %v11045_v42 }
 0x7ca   : > { %v4958_v46 = vpop.f32.mrb[36].mxu0 }
 0x7cb   : > { %v4960_v51 = vpop.f32.mrb[37].mxu0 }
 0x7cc   : > { %v4962_v52 = vpop.f32.mrb[38].mxu0 }
 0x7cd   : > { %v9831_v8 = vpack.c.bf16 %v4962_v52, %v4958_v46  ;;  %v4964_v55 = vpop.f32.mrb[39].mxu0 }
 0x7ce   : > { %v9828_v56 = vpack.c.bf16 %v4964_v55, %v4960_v51 }
 0x7d0   : > { %9830 = vmatprep.subr.msk.bf16.mxu1 %vm12829_vm0, %v9828_v56 }
 0x7d1   : > { %9833 = vmatpush1.bf16.msk.msra.mxu1 %vm12829_vm0, %v9831_v8 }
 0x7d2   : > { %9836 = vmatprep.subr.msk.bf16.mxu1 %vm12829_vm0, %v9834_v36  ;;  %v10798_v36 = vld [vmem:[%s13922_s4 + $0x3e8] ss:$16 sps:$4 sm:$0xff]  }
 0x7d4   : > { %9049 = vmatmul.mubr.msk.f32.vlgmr.msra.gmra.mrb[32].mxu1 %vm4973_vm1, %v11725_v53 }
 0x7d5   : > { %9839 = vmatpush1.bf16.msk.msra.mxu1 %vm12829_vm0, %v9837_v31  ;;  %5155 = vmatprep.mubr.f32.mxu1 %v11045_v42  ;;  %v10795_v31 = vld [vmem:[%s13922_s4 + $0x3c8] ss:$16 sps:$4 sm:$0xff]  }
 0x7d6   : > { %9842 = vmatprep.subr.msk.bf16.mxu1 %vm12829_vm0, %v9840_v43 }
 0x7d8   : > { %9050 = vmatmul.mubr.msk.f32.gmra.mrb[34].mxu1 %vm4973_vm1, %v12432_v28 }
 0x7d9   : > { %5161 = vmatprep.mubr.f32.mxu1 %v11045_v42 }
 0x7dc   : > { %9051 = vmatmul.mubr.msk.f32.gmra.mrb[36].mxu1 %vm4973_vm1, %v12873_v4 }
 0x7dd   : > { %5167 = vmatprep.mubr.f32.mxu1 %v11045_v42 }
 0x7e0   : > { %9052 = vmatmul.mubr.msk.f32.gmra.mrb[38].mxu1 %vm4973_vm1, %v12887_v38 }
 0x7e1   : > { %5260 = vmatprep.mubr.f32.mxu1 %v11045_v42 }
 0x7e4   : > { %9055 = vmatmul.mubr.msk.f32.vlgmr.msra.gmra.mrb[40].mxu1 %vm4973_vm1, %v11742_v57 }
 0x7e5   : > { %9845 = vmatpush1.bf16.msk.msra.mxu1 %vm12829_vm0, %v9843_v35  ;;  %5266 = vmatprep.mubr.f32.mxu1 %v11045_v42  ;;  %v10837_v35 = vld [vmem:[%s13922_s4 + $0x588] ss:$16 sps:$4 sm:$0xff]  }
 0x7e6   : > { %5778 = vmatprep.subr.bf16.mxu1 %v10797_v24 }
 0x7e8   : > { %9056 = vmatmul.mubr.msk.f32.gmra.mrb[42].mxu1 %vm4973_vm1, %v12455_v33 }
 0x7e9   : > { %5272 = vmatprep.mubr.f32.mxu1 %v11045_v42 }
 0x7ec   : > { %9057 = vmatmul.mubr.msk.f32.gmra.mrb[44].mxu1 %vm4973_vm1, %v13006_v26 }
 0x7ed   : > { %5278 = vmatprep.mubr.f32.mxu1 %v11045_v42 }
 0x7f0   : > { %9058 = vmatmul.mubr.msk.f32.gmra.mrb[46].mxu1 %vm4973_vm1, %v13014_v23 }
 0x7f1   : > { %5349 = vmatprep.mubr.f32.mxu1 %v11045_v42 }
 0x7f4   : > { %9061 = vmatmul.mubr.msk.f32.vlgmr.msra.gmra.mrb[32].mxu1 %vm4973_vm1, %v11742_v57 }
 0x7f5   : > { %5779 = vmatpush1.bf16.msra.mxu1 %v10795_v31  ;;  %5355 = vmatprep.mubr.f32.mxu1 %v11045_v42 }
 0x7f6   : > { %5780 = vmatprep.subr.bf16.mxu1 %v10800_v34 }
 0x7f8   : > { %9062 = vmatmul.mubr.msk.f32.gmra.mrb[34].mxu1 %vm4973_vm1, %v12455_v33 }
 0x7f9   : > { %5781 = vmatpush1.bf16.msra.mxu1 %v10798_v36  ;;  %5361 = vmatprep.mubr.f32.mxu1 %v11045_v42 }
 0x7fa   : > { %5782 = vmatprep.subr.bf16.mxu1 %v10803_v45 }
 0x7fc   : > { %9063 = vmatmul.mubr.msk.f32.gmra.mrb[36].mxu1 %vm4973_vm1, %v13006_v26 }
 0x7fd   : > { %5783 = vmatpush1.bf16.msra.mxu1 %v10801_v58  ;;  %5367 = vmatprep.mubr.f32.mxu1 %v11045_v42  ;;  %v13142_v58 = vsel %vm5822_vm8, 1.0, %v11045_v42 }
 0x7fe   : > { %5784 = vmatprep.subr.bf16.mxu1 %v10806_v61  ;;  %v10840_v61 = vld [vmem:[%s13923_s5 + $0x40] sm:$0xff]  }
 0x800   : > { %9064 = vmatmul.mubr.msk.f32.gmra.mrb[38].mxu1 %vm4973_vm1, %v13014_v23 }
 0x801   : > { %5785 = vmatpush1.bf16.msra.mxu1 %v10804_v0  ;;  %9186 = vmatprep.mubr.msk.bf16.mxu1 %vm4422_vm14, %v12629_v6  ;;  %v10813_v6 = vld [vmem:[%s13922_s4 + $0x488] ss:$16 sps:$4 sm:$0xff]   ;;  %v10842_v0 = vld [vmem:[%s13923_s5] sm:$0xff]  }
 0x802   : > { %5786 = vmatprep.subr.bf16.mxu1 %v10809_v60  ;;  %v10844_v60 = vld [vmem:[%s13923_s5 + $0x48] sm:$0xff]  }
 0x805   : > { %5787 = vmatpush1.bf16.msra.mxu1 %v10807_v3  ;;  %v10846_v3 = vld [vmem:[%s13923_s5 + $0x8] sm:$0xff]  }
 0x806   : > { %5788 = vmatprep.subr.bf16.mxu1 %v10812_v9  ;;  %v10848_v9 = vld [vmem:[%s13923_s5 + $0x50] sm:$0xff]  }
 0x809   : > { %5789 = vmatpush1.bf16.msra.mxu1 %v10810_v10  ;;  %v10850_v10 = vld [vmem:[%s13923_s5 + $0x10] sm:$0xff]  }
 0x80a   : > { %5790 = vmatprep.subr.bf16.mxu1 %v10815_v11  ;;  %v10852_v11 = vld [vmem:[%s13923_s5 + $0x58] sm:$0xff]  }
 0x80d   : > { %5791 = vmatpush1.bf16.msra.mxu1 %v10813_v6  ;;  %v10854_v6 = vld [vmem:[%s13923_s5 + $0x18] sm:$0xff]  }
 0x80e   : > { %5792 = vmatprep.subr.bf16.mxu1 %v10818_v12  ;;  %v10856_v12 = vld [vmem:[%s13923_s5 + $0x60] sm:$0xff]  }
 0x811   : > { %5793 = vmatpush1.bf16.msra.mxu1 %v10816_v63 }
 0x812   : > { %5794 = vmatprep.subr.bf16.mxu1 %v10821_v13 }
 0x815   : > { %5795 = vmatpush1.bf16.msra.mxu1 %v10819_v14 }
 0x816   : > { %5796 = vmatprep.subr.bf16.mxu1 %v10824_v15 }
 0x819   : > { %5797 = vmatpush1.bf16.msra.mxu1 %v10822_v7 }
 0x81a   : > { %5798 = vmatprep.subr.bf16.mxu1 %v10827_v17 }
 0x81d   : > { %5799 = vmatpush1.bf16.msra.mxu1 %v10825_v18 }
 0x81e   : > { %5800 = vmatprep.subr.bf16.mxu1 %v10830_v19 }
 0x821   : > { %5801 = vmatpush1.bf16.msra.mxu1 %v10828_v21 }
 0x822   : > { %5802 = vmatprep.subr.bf16.mxu1 %v10833_v22 }
 0x825   : > { %5803 = vmatpush1.bf16.msra.mxu1 %v10831_v25 }
 0x826   : > { %5804 = vmatprep.subr.bf16.mxu1 %v10836_v27 }
 0x829   : > { %5805 = vmatpush1.bf16.msra.mxu1 %v10834_v29 }
 0x82a   : > { %5806 = vmatprep.subr.bf16.mxu1 %v10839_v32 }
 0x82d   : > { %5807 = vmatpush1.bf16.msra.mxu1 %v10837_v35 }
 0x82f   : > { %v5062_v37 = vpop.f32.mrb[40].mxu0 }
 0x830   : > { %5811 = vmatmul.mubr.bf16.vlgmr.msra.gmra.mrb[48].mxu1 %v12627_v5  ;;  %v5064_v41 = vpop.f32.mrb[41].mxu0  ;;  %v13134_v5 = vsel %vm5821_vm7, 1.0, %v11045_v42 }
 0x831   : > { %6002 = vmatprep.mubr.f32.mxu1 %v11045_v42 }
 0x833   : > { %v5068_v43 = vpop.f32.mrb[42].mxu0 }
 0x834   : > { %v5070_v46 = vpop.f32.mrb[43].mxu0 }
 0x837   : > { %v5074_v51 = vpop.f32.mrb[44].mxu0 }
 0x838   : > { %v5076_v52 = vpop.f32.mrb[45].mxu0 }
 0x83b   : > { %v5080_v8 = vpop.f32.mrb[46].mxu0 }
 0x83c   : > { %v5082_v55 = vpop.f32.mrb[47].mxu0 }
 0x86b   : > { %v5769_v56 = vpop.f32.mrb[48].mxu0 }
 0x86c   : > { %v5771_v24 = vpop.f32.mrb[49].mxu0 }
 0x86d   : > { %v5773_v31 = vpop.f32.mrb[50].mxu0 }
 0x86e   : > { %v9849_v34 = vpack.c.bf16 %v5773_v31, %v5769_v56  ;;  %v5775_v36 = vpop.f32.mrb[51].mxu0 }
 0x86f   : > { %v9846_v45 = vpack.c.bf16 %v5775_v36, %v5771_v24 }
 0x871   : > { %9848 = vmatprep.subr.msk.bf16.mxu0 %vm12829_vm0, %v9846_v45 }
 0x872   : > { %9851 = vmatpush1.bf16.msk.msra.mxu0 %vm12829_vm0, %v9849_v34 }
 0x873   : > { %9582 = vmatprep.subr.bf16.mxu0 %v10840_v61  ;;  %v10841_v61 = vld [vmem:[%s13923_s5 + $0x138] sm:$0xff]  }
 0x875   : > { %9191 = vmatmul.mubr.msk.f32.vlgmr.msra.gmra.mrb[52].mxu0 %vm4973_vm1, %v11921_v62 }
 0x876   : > { %5919 = vmatprep.mubr.f32.mxu0 %v11045_v42  ;;  %9583 = vmatpush3.bf16.msra.mxu0 %v10842_v0  ;;  %v10843_v0 = vld [vmem:[%s13923_s5 + $0xf8] sm:$0xff]  }
 0x877   : > { %9584 = vmatprep.subr.bf16.mxu0 %v10844_v60  ;;  %v10845_v60 = vld [vmem:[%s13923_s5 + $0x140] sm:$0xff]  }
 0x879   : > { %9192 = vmatmul.mubr.msk.f32.gmra.mrb[54].mxu0 %vm4973_vm1, %v12516_v20 }
 0x87a   : > { %5925 = vmatprep.mubr.f32.mxu0 %v11045_v42  ;;  %9585 = vmatpush3.bf16.msra.mxu0 %v10846_v3  ;;  %v10847_v3 = vld [vmem:[%s13923_s5 + $0x100] sm:$0xff]  }
 0x87b   : > { %9586 = vmatprep.subr.bf16.mxu0 %v10848_v9  ;;  %v10849_v9 = vld [vmem:[%s13923_s5 + $0x148] sm:$0xff]  }
 0x87d   : > { %9193 = vmatmul.mubr.msk.f32.gmra.mrb[56].mxu0 %vm4973_vm1, %v13134_v5 }
 0x87e   : > { %5931 = vmatprep.mubr.f32.mxu0 %v11045_v42  ;;  %9587 = vmatpush3.bf16.msra.mxu0 %v10850_v10  ;;  %v10851_v10 = vld [vmem:[%s13923_s5 + $0x108] sm:$0xff]  }
 0x87f   : > { %9588 = vmatprep.subr.bf16.mxu0 %v10852_v11  ;;  %v10853_v11 = vld [vmem:[%s13923_s5 + $0x150] sm:$0xff]  }
 0x881   : > { %9194 = vmatmul.mubr.msk.f32.gmra.mrb[58].mxu0 %vm4973_vm1, %v13142_v58 }
 0x882   : > { %9589 = vmatpush3.bf16.msra.mxu0 %v10854_v6  ;;  %v10855_v6 = vld [vmem:[%s13923_s5 + $0x110] sm:$0xff]  }
 0x883   : > { %9590 = vmatprep.subr.bf16.mxu0 %v10856_v12  ;;  %v10857_v12 = vld [vmem:[%s13923_s5 + $0x158] sm:$0xff]  }
 0x8b7   : > { %v5262_v63 = vpop.f32.mrb[40].mxu1 }
 0x8b8   : > { %v13173_v13 = vadd.f32 %v5262_v63, %v5062_v37  ;;  %v5264_v14 = vpop.f32.mrb[41].mxu1  ;;  %v10859_v63 = vld [vmem:[%s13923_s5 + $0x118] sm:$0xff]  }
 0x8b9   : > { %v13175_v15 = vadd.f32 %v5264_v14, %v5064_v41  ;;  %v10858_v41 = vld [vmem:[%s13923_s5 + $0x20] sm:$0xff]  }
 0x8ba   : > { %9591 = vmatpush3.bf16.msra.mxu0 %v10858_v41  ;;  %v10861_v14 = vld [vmem:[%s13923_s5 + $0x160] sm:$0xff]  }
 0x8bb   : > { %v5268_v7 = vpop.f32.mrb[42].mxu1 }
 0x8bc   : > { %v13177_v17 = vadd.f32 %v5268_v7, %v5068_v43  ;;  %v5270_v18 = vpop.f32.mrb[43].mxu1  ;;  %v10860_v43 = vld [vmem:[%s13923_s5 + $0x68] sm:$0xff]   ;;  %v10863_v7 = vld [vmem:[%s13923_s5 + $0x120] sm:$0xff]  }
 0x8bd   : > { %v13179_v19 = vadd.f32 %v5270_v18, %v5070_v46  ;;  %v10862_v46 = vld [vmem:[%s13923_s5 + $0x28] sm:$0xff]   ;;  %9592 = vmatprep.subr.bf16.mxu0 %v10860_v43 }
 0x8be   : > { %9593 = vmatpush3.bf16.msra.mxu0 %v10862_v46  ;;  %v10865_v18 = vld [vmem:[%s13923_s5 + $0x168] sm:$0xff]  }
 0x8bf   : > { %v5274_v21 = vpop.f32.mrb[44].mxu1 }
 0x8c0   : > { %v13181_v22 = vadd.f32 %v5274_v21, %v5074_v51  ;;  %v5276_v25 = vpop.f32.mrb[45].mxu1  ;;  %v10864_v51 = vld [vmem:[%s13923_s5 + $0x70] sm:$0xff]   ;;  %v10867_v21 = vld [vmem:[%s13923_s5 + $0x128] sm:$0xff]  }
 0x8c1   : > { %v13183_v27 = vadd.f32 %v5276_v25, %v5076_v52  ;;  %v10866_v52 = vld [vmem:[%s13923_s5 + $0x30] sm:$0xff]   ;;  %9594 = vmatprep.subr.bf16.mxu0 %v10864_v51 }
 0x8c2   : > { %9595 = vmatpush3.bf16.msra.mxu0 %v10866_v52  ;;  %v10869_v25 = vld [vmem:[%s13923_s5 + $0x170] sm:$0xff]  }
 0x8c3   : > { %v5280_v29 = vpop.f32.mrb[46].mxu1 }
 0x8c4   : > { %v13185_v32 = vadd.f32 %v5280_v29, %v5080_v8  ;;  %v5282_v35 = vpop.f32.mrb[47].mxu1  ;;  %v10868_v8 = vld [vmem:[%s13923_s5 + $0x78] sm:$0xff]   ;;  %v10871_v29 = vld [vmem:[%s13923_s5 + $0x130] sm:$0xff]  }
 0x8c5   : > { %v13187_v37 = vadd.f32 %v5282_v35, %v5082_v55  ;;  %v10870_v55 = vld [vmem:[%s13923_s5 + $0x38] sm:$0xff]   ;;  %9596 = vmatprep.subr.bf16.mxu0 %v10868_v8  ;;  %v13278_v35 = vld [vmem:[%s13927_s9] sm:$0xf] }
 0x8c6   : > { %9597 = vmatpush3.bf16.msra.mxu0 %v10870_v55  ;;  %v6048_v46 = vrot.slane %v13278_v35, %v11465_v40  ;;  %v6052_v8 = vrot.slane %v13278_v35, %v11480_v1 }
 0x8c7   : > { %6408 = vmatprep.subr.bf16.mxu0 %v11044_v2 }
 0x903   : > { %v5812_v56 = vpop.f32.mrb[48].mxu1 }
 0x904   : > { %v5814_v24 = vpop.f32.mrb[49].mxu1 }
 0x905   : > { %v5816_v31 = vpop.f32.mrb[50].mxu1 }
 0x906   : > { %v9855_v34 = vpack.c.bf16 %v5816_v31, %v5812_v56  ;;  %v5818_v36 = vpop.f32.mrb[51].mxu1 }
 0x907   : > { %v9852_v45 = vpack.c.bf16 %v5818_v36, %v5814_v24 }
 0x909   : > { %9854 = vmatprep.subr.msk.bf16.mxu1 %vm12829_vm0, %v9852_v45 }
 0x90a   : > { %9857 = vmatpush1.bf16.msk.msra.mxu1 %vm12829_vm0, %v9855_v34 }
 0x90b   : > { %9610 = vmatprep.subr.bf16.mxu1 %v10841_v61 }
 0x90d   : > { %9197 = vmatmul.mubr.msk.f32.vlgmr.msra.gmra.mrb[32].mxu1 %vm4973_vm1, %v11921_v62 }
 0x90e   : > { %6008 = vmatprep.mubr.f32.mxu1 %v11045_v42  ;;  %9611 = vmatpush3.bf16.msra.mxu1 %v10843_v0 }
 0x90f   : > { %9612 = vmatprep.subr.bf16.mxu1 %v10845_v60 }
 0x911   : > { %9198 = vmatmul.mubr.msk.f32.gmra.mrb[34].mxu1 %vm4973_vm1, %v12516_v20 }
 0x912   : > { %6014 = vmatprep.mubr.f32.mxu1 %v11045_v42  ;;  %9613 = vmatpush3.bf16.msra.mxu1 %v10847_v3 }
 0x913   : > { %9614 = vmatprep.subr.bf16.mxu1 %v10849_v9 }
 0x915   : > { %9199 = vmatmul.mubr.msk.f32.gmra.mrb[36].mxu1 %vm4973_vm1, %v13134_v5 }
 0x916   : > { %6020 = vmatprep.mubr.f32.mxu1 %v11045_v42  ;;  %9615 = vmatpush3.bf16.msra.mxu1 %v10851_v10 }
 0x917   : > { %9616 = vmatprep.subr.bf16.mxu1 %v10853_v11 }
 0x919   : > { %9200 = vmatmul.mubr.msk.f32.gmra.mrb[38].mxu1 %vm4973_vm1, %v13142_v58 }
 0x91a   : > { %9617 = vmatpush3.bf16.msra.mxu1 %v10855_v6  ;;  %v10873_v6 = vld [vmem:[%s13923_s5 + $0x80] sm:$0xff]  }
 0x91b   : > { %9618 = vmatprep.subr.bf16.mxu1 %v10857_v12 }
 0x91e   : > { %9619 = vmatpush3.bf16.msra.mxu1 %v10859_v63 }
 0x91f   : > { %9620 = vmatprep.subr.bf16.mxu1 %v10861_v14 }
 0x922   : > { %9621 = vmatpush3.bf16.msra.mxu1 %v10863_v7 }
 0x923   : > { %9622 = vmatprep.subr.bf16.mxu1 %v10865_v18 }
 0x926   : > { %9623 = vmatpush3.bf16.msra.mxu1 %v10867_v21 }
 0x927   : > { %9624 = vmatprep.subr.bf16.mxu1 %v10869_v25 }
 0x92a   : > { %9625 = vmatpush3.bf16.msra.mxu1 %v10871_v29 }
 0x92b   : > { %6771 = vmatprep.subr.bf16.mxu1 %v11044_v2 }
 0x948   : > { %v5915_v41 = vpop.f32.mrb[52].mxu0 }
 0x949   : > { %v6027_v43 = vadd.f32 %v5915_v41, %v13173_v13  ;;  %v5917_v51 = vpop.f32.mrb[53].mxu0 }
 0x94a   : > { %v6028_v52 = vadd.f32 %v5917_v51, %v13175_v15  ;;  %v10876_v51 = vld [vmem:[%s13923_s5 + $0x188] sm:$0xff]  }
 0x94b   : > { %v6065_v56 = vadd.f32 %v6048_v46, %v6027_v43 }
 0x94c   : > { %v5921_v55 = vpop.f32.mrb[54].mxu0  ;;  %v6066_v34 = vadd.f32 %v6052_v8, %v6028_v52  ;;  %v10877_v52 = vld [vmem:[%s13923_s5 + $0x90] sm:$0xff]  }
 0x94d   : > { %v6031_v24 = vadd.f32 %v5921_v55, %v13177_v17  ;;  %v5923_v31 = vpop.f32.mrb[55].mxu0  ;;  %v6081_v0 = vmax.f32 %v6065_v56, 0.0  ;;  %v10879_v55 = vld [vmem:[%s13923_s5 + $0x98] sm:$0xff]  }
 0x94e   : > { %v6032_v36 = vadd.f32 %v5923_v31, %v13179_v19  ;;  %v6082_v15 = vmax.f32 %v6066_v34, 0.0  ;;  %v10872_v19 = vld [vmem:[%s13923_s5 + $0x178] sm:$0xff]   ;;  %v10882_v31 = vld [vmem:[%s13923_s5 + $0x1a0] sm:$0xff]   ;;  %v10883_v34 = vld [vmem:[%s13923_s5 + $0xa8] sm:$0xff]  }
 0x94f   : > { %v6069_v45 = vadd.f32 %v6048_v46, %v6031_v24  ;;  %v10880_v56 = vld [vmem:[%s13923_s5 + $0x198] sm:$0xff]   ;;  %v10881_v24 = vld [vmem:[%s13923_s5 + $0xa0] sm:$0xff]  }
 0x950   : > { %v6070_v61 = vadd.f32 %v6052_v8, %v6032_v36  ;;  %v5927_v13 = vpop.f32.mrb[56].mxu0  ;;  %v10884_v36 = vld [vmem:[%s13923_s5 + $0x1a8] sm:$0xff]  }
 0x951   : > { %v6085_v60 = vmax.f32 %v6069_v45, 0.0  ;;  %v6035_v40 = vadd.f32 %v5927_v13, %v13181_v22  ;;  %v5929_v3 = vpop.f32.mrb[57].mxu0  ;;  %v10885_v45 = vld [vmem:[%s13923_s5 + $0xb0] sm:$0xff]   ;;  %v10887_v13 = vld [vmem:[%s13923_s5 + $0xb8] sm:$0xff]  }
 0x952   : > { %v6086_v9 = vmax.f32 %v6070_v61, 0.0  ;;  %v6036_v1 = vadd.f32 %v5929_v3, %v13183_v27  ;;  %v10886_v61 = vld [vmem:[%s13923_s5 + $0x1b0] sm:$0xff]   ;;  %v10891_v3 = vld [vmem:[%s13923_s5 + $0xc8] sm:$0xff]  }
 0x953   : > { %v13290_v10 = vpack.c.bf16 %v6085_v60, %v6081_v0  ;;  %v6073_v12 = vadd.f32 %v6048_v46, %v6035_v40  ;;  %v10888_v0 = vld [vmem:[%s13923_s5 + $0x1b8] sm:$0xff]   ;;  %v10889_v60 = vld [vmem:[%s13923_s5 + $0xc0] sm:$0xff]  }
 0x954   : > { %v13292_v11 = vpack.c.bf16 %v6086_v9, %v6082_v15  ;;  %v5933_v17 = vpop.f32.mrb[58].mxu0  ;;  %v6074_v14 = vadd.f32 %v6052_v8, %v6036_v1  ;;  %v10890_v40 = vld [vmem:[%s13923_s5 + $0x1c0] sm:$0xff]   ;;  %v10892_v15 = vld [vmem:[%s13923_s5 + $0x1c8] sm:$0xff]   ;;  %v10893_v9 = vld [vmem:[%s13923_s5 + $0xd0] sm:$0xff]  }
 0x955   : > { %v6039_v22 = vadd.f32 %v5933_v17, %v13185_v32  ;;  %v5935_v63 = vpop.f32.mrb[59].mxu0  ;;  %v10874_v32 = vld [vmem:[%s13923_s5 + $0x180] sm:$0xff]   ;;  %v6089_v21 = vmax.f32 %v6073_v12, 0.0  ;;  %v10894_v1 = vld [vmem:[%s13923_s5 + $0x1d0] sm:$0xff]   ;;  %v10895_v17 = vld [vmem:[%s13923_s5 + $0xd8] sm:$0xff]  }
 0x956   : > { %v6040_v27 = vadd.f32 %v5935_v63, %v13187_v37  ;;  %6391 = vmatprep.mubr.bf16.mxu0 %v13292_v11  ;;  %6754 = vmatprep.mubr.bf16.mxu1 %v13292_v11  ;;  %v10875_v37 = vld [vmem:[%s13923_s5 + $0x88] sm:$0xff]   ;;  %v6090_v29 = vmax.f32 %v6074_v14, 0.0  ;;  %v10898_v12 = vld [vmem:[%s13923_s5 + $0x1e0] sm:$0xff]   ;;  %v10901_v14 = vld [vmem:[%s13923_s5 + $0xf0] sm:$0xff]  }
 0x957   : > { %v6077_v7 = vadd.f32 %v6048_v46, %v6039_v22  ;;  %6392 = vmatmul.mubr.bf16.vlgmr.msra.gmra.mrb[60].mxu0 %v13290_v10  ;;  %6755 = vmatmul.mubr.bf16.vlgmr.msra.gmra.mrb[52].mxu1 %v13290_v10  ;;  %v10899_v22 = vld [vmem:[%s13923_s5 + $0xe8] sm:$0xff]  }
 0x958   : > { %v6078_v18 = vadd.f32 %v6052_v8, %v6040_v27  ;;  %6772 = vmatpush1.bf16.msra.mxu1 %v10872_v19  ;;  %6409 = vmatpush1.bf16.msra.mxu0 %v10873_v6  ;;  %v10878_v8 = vld [vmem:[%s13923_s5 + $0x190] sm:$0xff]   ;;  %v10896_v19 = vld [vmem:[%s13923_s5 + $0x1d8] sm:$0xff]   ;;  %v10897_v6 = vld [vmem:[%s13923_s5 + $0xe0] sm:$0xff]   ;;  %v6056_v27 = vrot.slane %v13278_v35, %v2479_v44 }
 0x959   : > { %v6093_v25 = vmax.f32 %v6077_v7, 0.0  ;;  %6773 = vmatprep.subr.bf16.mxu1 %v11044_v2  ;;  %6410 = vmatprep.subr.bf16.mxu0 %v11044_v2  ;;  %v10900_v63 = vld [vmem:[%s13923_s5 + $0x1e8] sm:$0xff]   ;;  %v6060_v7 = vrot.slane %v13278_v35, %v2483_v50  ;;  %v10902_v35 = vld [vmem:[%s13923_s5 + $0x270] sm:$0xff]  }
 0x95a   : > { %v6094_v41 = vmax.f32 %v6078_v18, 0.0 }
 0x95b   : > { %v13314_v43 = vpack.c.bf16 %v6093_v25, %v6089_v21 }
 0x95c   : > { %v13316_v46 = vpack.c.bf16 %v6094_v41, %v6090_v29  ;;  %6774 = vmatpush1.bf16.msra.mxu1 %v10874_v32  ;;  %6411 = vmatpush1.bf16.msra.mxu0 %v10875_v37 }
 0x95d   : > { %6775 = vmatprep.subr.bf16.mxu1 %v11044_v2  ;;  %6412 = vmatprep.subr.bf16.mxu0 %v11044_v2 }
 0x95e   : > { %6399 = vmatprep.mubr.bf16.mxu0 %v13316_v46  ;;  %6762 = vmatprep.mubr.bf16.mxu1 %v13316_v46 }
 0x95f   : > { %6400 = vmatmul.mubr.bf16.gmra.mrb[64].mxu0 %v13314_v43  ;;  %6763 = vmatmul.mubr.bf16.gmra.mrb[56].mxu1 %v13314_v43 }
 0x960   : > { %6776 = vmatpush1.bf16.msra.mxu1 %v10876_v51  ;;  %6413 = vmatpush1.bf16.msra.mxu0 %v10877_v52 }
 0x961   : > { %6777 = vmatprep.subr.bf16.mxu1 %v11044_v2  ;;  %6414 = vmatprep.subr.bf16.mxu0 %v11044_v2 }
 0x964   : > { %6778 = vmatpush1.bf16.msra.mxu1 %v10878_v8  ;;  %6415 = vmatpush1.bf16.msra.mxu0 %v10879_v55 }
 0x965   : > { %6779 = vmatprep.subr.bf16.mxu1 %v11044_v2  ;;  %6416 = vmatprep.subr.bf16.mxu0 %v11044_v2 }
 0x968   : > { %6780 = vmatpush1.bf16.msra.mxu1 %v10880_v56  ;;  %6417 = vmatpush1.bf16.msra.mxu0 %v10881_v24 }
 0x969   : > { %6781 = vmatprep.subr.bf16.mxu1 %v11044_v2  ;;  %6418 = vmatprep.subr.bf16.mxu0 %v11044_v2 }
 0x96c   : > { %6782 = vmatpush1.bf16.msra.mxu1 %v10882_v31  ;;  %6419 = vmatpush1.bf16.msra.mxu0 %v10883_v34 }
 0x96d   : > { %6783 = vmatprep.subr.bf16.mxu1 %v11044_v2  ;;  %6420 = vmatprep.subr.bf16.mxu0 %v11044_v2 }
 0x970   : > { %6784 = vmatpush1.bf16.msra.mxu1 %v10884_v36  ;;  %6421 = vmatpush1.bf16.msra.mxu0 %v10885_v45 }
 0x971   : > { %6785 = vmatprep.subr.bf16.mxu1 %v11044_v2  ;;  %6422 = vmatprep.subr.bf16.mxu0 %v11044_v2 }
 0x974   : > { %6786 = vmatpush1.bf16.msra.mxu1 %v10886_v61  ;;  %6423 = vmatpush1.bf16.msra.mxu0 %v10887_v13 }
 0x975   : > { %6787 = vmatprep.subr.bf16.mxu1 %v11044_v2  ;;  %6424 = vmatprep.subr.bf16.mxu0 %v11044_v2 }
 0x978   : > { %6788 = vmatpush1.bf16.msra.mxu1 %v10888_v0  ;;  %6425 = vmatpush1.bf16.msra.mxu0 %v10889_v60  ;;  %v10903_v60 = vld [vmem:[%s13923_s5 + $0x278] sm:$0xff]  }
 0x979   : > { %6789 = vmatprep.subr.bf16.mxu1 %v11044_v2  ;;  %6426 = vmatprep.subr.bf16.mxu0 %v11044_v2 }
 0x97c   : > { %6790 = vmatpush1.bf16.msra.mxu1 %v10890_v40  ;;  %6427 = vmatpush1.bf16.msra.mxu0 %v10891_v3 }
 0x97d   : > { %6791 = vmatprep.subr.bf16.mxu1 %v11044_v2  ;;  %6428 = vmatprep.subr.bf16.mxu0 %v11044_v2 }
 0x980   : > { %6792 = vmatpush1.bf16.msra.mxu1 %v10892_v15  ;;  %6429 = vmatpush1.bf16.msra.mxu0 %v10893_v9 }
 0x981   : > { %6793 = vmatprep.subr.bf16.mxu1 %v11044_v2  ;;  %6430 = vmatprep.subr.bf16.mxu0 %v11044_v2 }
 0x984   : > { %6794 = vmatpush1.bf16.msra.mxu1 %v10894_v1  ;;  %6431 = vmatpush1.bf16.msra.mxu0 %v10895_v17 }
 0x985   : > { %6795 = vmatprep.subr.bf16.mxu1 %v11044_v2  ;;  %6432 = vmatprep.subr.bf16.mxu0 %v11044_v2 }
 0x988   : > { %6796 = vmatpush1.bf16.msra.mxu1 %v10896_v19  ;;  %6433 = vmatpush1.bf16.msra.mxu0 %v10897_v6  ;;  %v10904_v19 = vld [vmem:[%s13923_s5 + $0x280] sm:$0xff]   ;;  %v10905_v6 = vld [vmem:[%s13923_s5 + $0x288] sm:$0xff]  }
 0x989   : > { %6797 = vmatprep.subr.bf16.mxu1 %v11044_v2  ;;  %6434 = vmatprep.subr.bf16.mxu0 %v11044_v2 }
 0x98c   : > { %6798 = vmatpush1.bf16.msra.mxu1 %v10898_v12  ;;  %6435 = vmatpush1.bf16.msra.mxu0 %v10899_v22  ;;  %v10906_v12 = vld [vmem:[%s13923_s5 + $0x290] sm:$0xff]   ;;  %v10907_v22 = vld [vmem:[%s13923_s5 + $0x298] sm:$0xff]  }
 0x98d   : > { %6799 = vmatprep.subr.bf16.mxu1 %v11044_v2  ;;  %6436 = vmatprep.subr.bf16.mxu0 %v11044_v2 }
 0x990   : > { %6800 = vmatpush1.bf16.msra.mxu1 %v10900_v63  ;;  %6437 = vmatpush1.bf16.msra.mxu0 %v10901_v14  ;;  %v10908_v63 = vld [vmem:[%s13923_s5 + $0x2a0] sm:$0xff]   ;;  %v10909_v14 = vld [vmem:[%s13923_s5 + $0x2a8] sm:$0xff]  }
 0x991   : > { %7387 = vmatprep.subr.bf16.mxu1 %v11044_v2 }
 0x9e0   : > { %v6004_v18 = vpop.f32.mrb[32].mxu1 }
 0x9e1   : > { %v6067_v32 = vadd.f32 %v6056_v27, %v6004_v18  ;;  %v6006_v37 = vpop.f32.mrb[33].mxu1  ;;  %v10912_v18 = vld [vmem:[%s13923_s5 + $0x2c0] sm:$0xff]  }
 0x9e2   : > { %v6068_v21 = vadd.f32 %v6060_v7, %v6006_v37  ;;  %v10914_v37 = vld [vmem:[%s13923_s5 + $0x2d0] sm:$0xff]  }
 0x9e3   : > { %v6083_v52 = vmax.f32 %v6067_v32, 0.0  ;;  %v10913_v32 = vld [vmem:[%s13923_s5 + $0x2c8] sm:$0xff]  }
 0x9e4   : > { %v6010_v25 = vpop.f32.mrb[34].mxu1  ;;  %v6084_v55 = vmax.f32 %v6068_v21, 0.0  ;;  %v10915_v21 = vld [vmem:[%s13923_s5 + $0x2d8] sm:$0xff]  }
 0x9e5   : > { %v6071_v29 = vadd.f32 %v6056_v27, %v6010_v25  ;;  %v6012_v41 = vpop.f32.mrb[35].mxu1  ;;  %v10916_v25 = vld [vmem:[%s13923_s5 + $0x2e0] sm:$0xff]  }
 0x9e6   : > { %v6072_v51 = vadd.f32 %v6060_v7, %v6012_v41 }
 0x9e7   : > { %v6087_v8 = vmax.f32 %v6071_v29, 0.0  ;;  %v10917_v29 = vld [vmem:[%s13923_s5 + $0x368] sm:$0xff]  }
 0x9e8   : > { %v6088_v56 = vmax.f32 %v6072_v51, 0.0  ;;  %v6016_v24 = vpop.f32.mrb[36].mxu1 }
 0x9e9   : > { %v13433_v31 = vpack.c.bf16 %v6087_v8, %v6083_v52  ;;  %v6075_v44 = vadd.f32 %v6056_v27, %v6016_v24  ;;  %v6018_v34 = vpop.f32.mrb[37].mxu1  ;;  %v10918_v52 = vld [vmem:[%s13923_s5 + $0x370] sm:$0xff]  }
 0x9ea   : > { %v13435_v36 = vpack.c.bf16 %v6088_v56, %v6084_v55  ;;  %v6076_v50 = vadd.f32 %v6060_v7, %v6018_v34 }
 0x9eb   : > { %v6091_v40 = vmax.f32 %v6075_v44, 0.0 }
 0x9ec   : > { %v6022_v45 = vpop.f32.mrb[38].mxu1  ;;  %9232 = vmatprep.mubr.msk.bf16.mxu0 %vm4422_vm14, %v13435_v36  ;;  %9331 = vmatprep.mubr.msk.bf16.mxu1 %vm4422_vm14, %v13435_v36  ;;  %v6092_v15 = vmax.f32 %v6076_v50, 0.0 }
 0x9ed   : > { %v6079_v61 = vadd.f32 %v6056_v27, %v6022_v45  ;;  %v6024_v13 = vpop.f32.mrb[39].mxu1  ;;  %6441 = vmatmul.mubr.bf16.vlgmr.msra.gmra.mrb[68].mxu0 %v13433_v31  ;;  %6804 = vmatmul.mubr.bf16.vlgmr.msra.gmra.mrb[60].mxu1 %v13433_v31  ;;  %v10910_v27 = vld [vmem:[%s13923_s5 + $0x2b0] sm:$0xff]  }
 0x9ee   : > { %v6080_v0 = vadd.f32 %v6060_v7, %v6024_v13  ;;  %7388 = vmatpush1.bf16.msra.mxu1 %v10902_v35  ;;  %v10911_v7 = vld [vmem:[%s13923_s5 + $0x2b8] sm:$0xff]  }
 0x9ef   : > { %v6095_v3 = vmax.f32 %v6079_v61, 0.0  ;;  %7389 = vmatprep.subr.bf16.mxu1 %v11044_v2  ;;  %v10919_v13 = vld [vmem:[%s13923_s5 + $0x378] sm:$0xff]  }
 0x9f0   : > { %v6096_v9 = vmax.f32 %v6080_v0, 0.0 }
 0x9f1   : > { %v13450_v1 = vpack.c.bf16 %v6095_v3, %v6091_v40  ;;  %v10920_v40 = vld [vmem:[%s13923_s5 + $0x380] sm:$0xff]  }
 0x9f2   : > { %v13452_v17 = vpack.c.bf16 %v6096_v9, %v6092_v15  ;;  %7390 = vmatpush1.bf16.msra.mxu1 %v10903_v60 }
 0x9f3   : > { %7391 = vmatprep.subr.bf16.mxu1 %v11044_v2 }
 0x9f4   : > { %9233 = vmatprep.mubr.msk.bf16.mxu0 %vm4422_vm14, %v13452_v17  ;;  %9332 = vmatprep.mubr.msk.bf16.mxu1 %vm4422_vm14, %v13452_v17 }
 0x9f5   : > { %6449 = vmatmul.mubr.bf16.gmra.mrb[72].mxu0 %v13450_v1  ;;  %6812 = vmatmul.mubr.bf16.gmra.mrb[64].mxu1 %v13450_v1 }
 0x9f6   : > { %7392 = vmatpush1.bf16.msra.mxu1 %v10904_v19  ;;  %9448 = vmatprep.mubr.msk.bf16.mxu1 %vm4422_vm14, %v13435_v36 }
 0x9f7   : > { %7393 = vmatprep.subr.bf16.mxu1 %v11044_v2  ;;  %9750 = vmatprep.mubr.msk.f32.mxu0 %vm6832_vm9, %v11725_v53  ;;  %v10931_v53 = vld [vmem:[%s13923_s5 + $0x3d8] sm:$0xff]  }
 0x9fa   : > { %7394 = vmatpush1.bf16.msra.mxu1 %v10905_v6 }
 0x9fb   : > { %7395 = vmatprep.subr.bf16.mxu1 %v11044_v2 }
 0x9fe   : > { %7396 = vmatpush1.bf16.msra.mxu1 %v10906_v12 }
 0x9ff   : > { %7397 = vmatprep.subr.bf16.mxu1 %v11044_v2 }
 0xa02   : > { %7398 = vmatpush1.bf16.msra.mxu1 %v10907_v22 }
 0xa03   : > { %7399 = vmatprep.subr.bf16.mxu1 %v11044_v2 }
 0xa06   : > { %7400 = vmatpush1.bf16.msra.mxu1 %v10908_v63 }
 0xa07   : > { %7401 = vmatprep.subr.bf16.mxu1 %v11044_v2 }
 0xa0a   : > { %7402 = vmatpush1.bf16.msra.mxu1 %v10909_v14 }
 0xa0b   : > { %7403 = vmatprep.subr.bf16.mxu1 %v11044_v2 }
 0xa0e   : > { %7404 = vmatpush1.bf16.msra.mxu1 %v10910_v27  ;;  %v10921_v27 = vld [vmem:[%s13923_s5 + $0x388] sm:$0xff]  }
 0xa0f   : > { %7405 = vmatprep.subr.bf16.mxu1 %v11044_v2 }
 0xa12   : > { %7406 = vmatpush1.bf16.msra.mxu1 %v10911_v7  ;;  %v10922_v7 = vld [vmem:[%s13923_s5 + $0x390] sm:$0xff]  }
 0xa13   : > { %7407 = vmatprep.subr.bf16.mxu1 %v11044_v2 }
 0xa16   : > { %7408 = vmatpush1.bf16.msra.mxu1 %v10912_v18  ;;  %v10923_v18 = vld [vmem:[%s13923_s5 + $0x398] sm:$0xff]  }
 0xa17   : > { %7409 = vmatprep.subr.bf16.mxu1 %v11044_v2 }
 0xa1a   : > { %7410 = vmatpush1.bf16.msra.mxu1 %v10913_v32  ;;  %v10924_v32 = vld [vmem:[%s13923_s5 + $0x3a0] sm:$0xff]  }
 0xa1b   : > { %7411 = vmatprep.subr.bf16.mxu1 %v11044_v2 }
 0xa1e   : > { %7412 = vmatpush1.bf16.msra.mxu1 %v10914_v37  ;;  %v10925_v37 = vld [vmem:[%s13923_s5 + $0x3a8] sm:$0xff]  }
 0xa1f   : > { %7413 = vmatprep.subr.bf16.mxu1 %v11044_v2 }
 0xa22   : > { %7414 = vmatpush1.bf16.msra.mxu1 %v10915_v21  ;;  %v10926_v21 = vld [vmem:[%s13923_s5 + $0x3b0] sm:$0xff]  }
 0xa23   : > { %7415 = vmatprep.subr.bf16.mxu1 %v11044_v2 }
 0xa26   : > { %7416 = vmatpush1.bf16.msra.mxu1 %v10916_v25  ;;  %v10927_v25 = vld [vmem:[%s13923_s5 + $0x3b8] sm:$0xff]  }
 0xa27   : > { %7882 = vmatprep.subr.bf16.mxu1 %v11044_v2 }
 0xa29   : > { %7420 = vmatmul.mubr.bf16.vlgmr.msra.gmra.mrb[68].mxu1 %v13433_v31 }
 0xa2a   : > { %9449 = vmatprep.mubr.msk.bf16.mxu1 %vm4422_vm14, %v13452_v17  ;;  %7883 = vmatpush1.bf16.msra.mxu1 %v10917_v29  ;;  %v9598_v41 = vpop.f32.mrb[60].mxu0  ;;  %v9626_v51 = vpop.f32.mrb[52].mxu1  ;;  %v10928_v29 = vld [vmem:[%s13923_s5 + $0x3c0] sm:$0xff]  }
 0xa2b   : > { %7884 = vmatprep.subr.bf16.mxu1 %v11044_v2  ;;  %v9599_v8 = vpop.f32.mrb[61].mxu0  ;;  %v9627_v55 = vpop.f32.mrb[53].mxu1 }
 0xa2c   : > { %v13525_v56 = vadd.f32 %v9599_v8, %v9598_v41  ;;  %v13527_v24 = vadd.f32 %v9627_v55, %v9626_v51  ;;  %v9601_v44 = vpop.f32.mrb[62].mxu0  ;;  %v9629_v34 = vpop.f32.mrb[54].mxu1  ;;  %v10929_v41 = vld [vmem:[%s13923_s5 + $0x3c8] sm:$0xff]   ;;  %v10930_v51 = vld [vmem:[%s13923_s5 + $0x3d0] sm:$0xff]  }
 0xa2d   : > { %v9602_v50 = vpop.f32.mrb[63].mxu0  ;;  %v9630_v35 = vpop.f32.mrb[55].mxu1 }
 0xa2e   : > { %7885 = vmatpush1.bf16.msra.mxu1 %v10918_v52  ;;  %v13529_v45 = vadd.f32 %v9602_v50, %v9601_v44  ;;  %v13531_v61 = vadd.f32 %v9630_v35, %v9629_v34 }
 0xa2f   : > { %7886 = vmatprep.subr.bf16.mxu1 %v11044_v2 }
 0xa31   : > { %7428 = vmatmul.mubr.bf16.gmra.mrb[72].mxu1 %v13450_v1 }
 0xa32   : > { %7887 = vmatpush1.bf16.msra.mxu1 %v10919_v13  ;;  %9556 = vmatprep.mubr.msk.bf16.mxu1 %vm4422_vm14, %v13435_v36  ;;  %v9604_v0 = vpop.f32.mrb[64].mxu0  ;;  %v9632_v60 = vpop.f32.mrb[56].mxu1 }
 0xa33   : > { %7888 = vmatprep.subr.bf16.mxu1 %v11044_v2  ;;  %v9605_v3 = vpop.f32.mrb[65].mxu0  ;;  %v9633_v15 = vpop.f32.mrb[57].mxu1 }
 0xa34   : > { %v13544_v9 = vadd.f32 %v9605_v3, %v9604_v0  ;;  %v13546_v19 = vadd.f32 %v9633_v15, %v9632_v60  ;;  %v9607_v6 = vpop.f32.mrb[66].mxu0  ;;  %v9635_v12 = vpop.f32.mrb[58].mxu1 }
 0xa35   : > { %v9608_v22 = vpop.f32.mrb[67].mxu0  ;;  %v9636_v63 = vpop.f32.mrb[59].mxu1 }
 0xa36   : > { %7889 = vmatpush1.bf16.msra.mxu1 %v10920_v40  ;;  %v13548_v36 = vadd.f32 %v9608_v22, %v9607_v6  ;;  %v13550_v14 = vadd.f32 %v9636_v63, %v9635_v12 }
 0xa37   : > { %7890 = vmatprep.subr.bf16.mxu1 %v11044_v2 }
 0xa3a   : > { %7891 = vmatpush1.bf16.msra.mxu1 %v10921_v27 }
 0xa3b   : > { %7892 = vmatprep.subr.bf16.mxu1 %v11044_v2 }
 0xa3e   : > { %7893 = vmatpush1.bf16.msra.mxu1 %v10922_v7 }
 0xa3f   : > { %7894 = vmatprep.subr.bf16.mxu1 %v11044_v2 }
 0xa42   : > { %7895 = vmatpush1.bf16.msra.mxu1 %v10923_v18 }
 0xa43   : > { %7896 = vmatprep.subr.bf16.mxu1 %v11044_v2 }
 0xa46   : > { %7897 = vmatpush1.bf16.msra.mxu1 %v10924_v32  ;;  %v13611_v32 = vadd.s32 32, %v11461_v39 }
 0xa47   : > { %7898 = vmatprep.subr.bf16.mxu1 %v11044_v2 }
 0xa48   : > { %vm6820_vm10 = vcmp.eq.s32.totalorder %v13611_v32, %v11720_v48  ;;  %vm7436_vm4 = vcmp.eq.s32.totalorder %v13611_v32, %v11916_v59 }
 0xa4a   : > { %7899 = vmatpush1.bf16.msra.mxu1 %v10925_v37  ;;  %v10932_v37 = vld [vmem:[%s13923_s5 + $0x230] sm:$0xff]  }
 0xa4b   : > { %7900 = vmatprep.subr.bf16.mxu1 %v11044_v2 }
 0xa4e   : > { %7901 = vmatpush1.bf16.msra.mxu1 %v10926_v21 }
 0xa4f   : > { %7902 = vmatprep.subr.bf16.mxu1 %v11044_v2 }
 0xa52   : > { %7903 = vmatpush1.bf16.msra.mxu1 %v10927_v25 }
 0xa53   : > { %7904 = vmatprep.subr.bf16.mxu1 %v11044_v2 }
 0xa56   : > { %7905 = vmatpush1.bf16.msra.mxu1 %v10928_v29  ;;  %v10936_v29 = vld [vmem:[%s13923_s5 + $0x240] sm:$0xff]  }
 0xa57   : > { %7906 = vmatprep.subr.bf16.mxu1 %v11044_v2 }
 0xa5a   : > { %7907 = vmatpush1.bf16.msra.mxu1 %v10929_v41 }
 0xa5b   : > { %7908 = vmatprep.subr.bf16.mxu1 %v11044_v2 }
 0xa5e   : > { %7909 = vmatpush1.bf16.msra.mxu1 %v10930_v51  ;;  %v10938_v51 = vld [vmem:[%s13923_s5 + $0x248] sm:$0xff]  }
 0xa5f   : > { %7910 = vmatprep.subr.bf16.mxu1 %v11044_v2 }
 0xa62   : > { %7911 = vmatpush1.bf16.msra.mxu1 %v10931_v53  ;;  %v10939_v53 = vld [vmem:[%s13923_s5 + $0x208] sm:$0xff]  }
 0xa65   : > { %7915 = vmatmul.mubr.bf16.vlgmr.msra.gmra.mrb[76].mxu1 %v13433_v31 }
 0xa66   : > { %9557 = vmatprep.mubr.msk.bf16.mxu1 %vm4422_vm14, %v13452_v17  ;;  %vm6461_vm14 = vcmp.eq.s32.totalorder %v13611_v32, %v11717_v47 }
 0xa67   : > { %v9234_v25 = vsel %vm6461_vm14, 1.0, %v11045_v42 }
 0xa6d   : > { %7923 = vmatmul.mubr.bf16.gmra.mrb[80].mxu1 %v13450_v1 }
 0xac0   : > { %v6442_v52 = vpop.f32.mrb[68].mxu0  ;;  %v6805_v8 = vpop.f32.mrb[60].mxu1 }
 0xac1   : > { %v6443_v55 = vadd.f32 %v13525_v56, %v6442_v52  ;;  %v6806_v44 = vadd.f32 %v13527_v24, %v6805_v8  ;;  %v6444_v34 = vpop.f32.mrb[69].mxu0  ;;  %v6807_v50 = vpop.f32.mrb[61].mxu1  ;;  %v10940_v52 = vld [vmem:[%s13923_s5 + $0x250] sm:$0xff]  }
 0xac2   : > { %v6445_v35 = vpop.f32.mrb[70].mxu0  ;;  %v6808_v13 = vpop.f32.mrb[62].mxu1  ;;  %v10941_v8 = vld [vmem:[%s13923_s5 + $0x210] sm:$0xff]   ;;  %v10944_v34 = vld [vmem:[%s13923_s5 + $0x260] sm:$0xff]  }
 0xac3   : > { %v6446_v2 = vadd.f32 %v13529_v45, %v6445_v35  ;;  %v6809_v0 = vadd.f32 %v13531_v61, %v6808_v13  ;;  %v6447_v31 = vpop.f32.mrb[71].mxu0  ;;  %v6810_v60 = vpop.f32.mrb[63].mxu1  ;;  %v10945_v50 = vld [vmem:[%s13923_s5 + $0x220] sm:$0xff]   ;;  %v10946_v35 = vld [vmem:[%s13923_s5 + $0x268] sm:$0xff]  }
 0xac5   : > { %v9868_v40 = vpack.c.bf16 %v6446_v2, %v6443_v55  ;;  %v9858_v17 = vpack.c.bf16 %v6809_v0, %v6806_v44  ;;  %v10942_v55 = vld [vmem:[%s13923_s5 + $0x258] sm:$0xff]   ;;  %v10947_v2 = vld [vmem:[%s13923_s5 + $0x228] sm:$0xff]  }
 0xac6   : > { %v10943_v44 = vld [vmem:[%s13923_s5 + $0x218] sm:$0xff]  }
 0xac7   : > { %9859 = vmatprep.subr.bf16.mxu0 %v9858_v17 }
 0xac8   : > { %v6450_v1 = vpop.f32.mrb[72].mxu0  ;;  %v6813_v3 = vpop.f32.mrb[64].mxu1  ;;  %9861 = vmatpush3.bf16.msra.mxu0 %v9858_v17 }
 0xac9   : > { %v6451_v56 = vadd.f32 %v13544_v9, %v6450_v1  ;;  %v6814_v24 = vadd.f32 %v13546_v19, %v6813_v3  ;;  %v6452_v15 = vpop.f32.mrb[73].mxu0  ;;  %v6815_v6 = vpop.f32.mrb[65].mxu1  ;;  %v13618_v9 = vadd.s32 40, %v11461_v39  ;;  %v13623_v19 = vadd.s32 48, %v11461_v39 }
 0xaca   : > { %v6453_v12 = vpop.f32.mrb[74].mxu0  ;;  %v6816_v22 = vpop.f32.mrb[66].mxu1 }
 0xacb   : > { %v6454_v45 = vadd.f32 %v13548_v36, %v6453_v12  ;;  %v6817_v61 = vadd.f32 %v13550_v14, %v6816_v22  ;;  %v6455_v63 = vpop.f32.mrb[75].mxu0  ;;  %v6818_v27 = vpop.f32.mrb[67].mxu1  ;;  %v9333_v36 = vsel %vm6820_vm10, 1.0, %v11045_v42  ;;  %vm6821_vm11 = vcmp.eq.s32.totalorder %v13618_v9, %v11720_v48 }
 0xacc   : > { %v13635_v14 = vadd.s32 56, %v11461_v39  ;;  %vm6822_vm12 = vcmp.eq.s32.totalorder %v13623_v19, %v11720_v48  ;;  %vm6462_vm15 = vcmp.eq.s32.totalorder %v13618_v9, %v11717_v47  ;;  %vm6463_vm1 = vcmp.eq.s32.totalorder %v13623_v19, %v11717_v47 }
 0xacd   : > { %v9872_v7 = vpack.c.bf16 %v6454_v45, %v6451_v56  ;;  %v9862_v18 = vpack.c.bf16 %v6817_v61, %v6814_v24  ;;  %v9236_v41 = vsel %vm6463_vm1, 1.0, %v11045_v42  ;;  %vm7437_vm5 = vcmp.eq.s32.totalorder %v13618_v9, %v11916_v59 }
 0xace   : > { %vm6823_vm13 = vcmp.eq.s32.totalorder %v13635_v14, %v11720_v48  ;;  %v10934_v48 = vld [vmem:[%s13923_s5 + $0x238] sm:$0xff]   ;;  %vm6464_vm2 = vcmp.eq.s32.totalorder %v13635_v14, %v11717_v47  ;;  %vm7438_vm6 = vcmp.eq.s32.totalorder %v13623_v19, %v11916_v59  ;;  %vm7439_vm7 = vcmp.eq.s32.totalorder %v13635_v14, %v11916_v59  ;;  %v10956_v59 = vld [vmem:[%s13923_s5 + $0x348] sm:$0xff]  }
 0xacf   : > { %9864 = vmatprep.subr.msk.bf16.mxu0 %vm12829_vm0, %v9862_v18  ;;  %v9336_v21 = vsel %vm6823_vm13, 1.0, %v11045_v42 }
 0xad0   : > { %9867 = vmatpush3.bf16.msk.msra.mxu0 %vm12829_vm0, %v9862_v18 }
 0xad1   : > { %9869 = vmatprep.subr.bf16.mxu0 %v9868_v40 }
 0xad3   : > { %9751 = vmatmul.mubr.msk.f32.vlgmr.msra.gmra.mrb[76].mxu0 %vm6832_vm9, %v12432_v28  ;;  %v9334_v28 = vsel %vm6821_vm11, 1.0, %v11045_v42 }
 0xad4   : > { %9871 = vmatpush3.bf16.msra.mxu0 %v9868_v40  ;;  %9753 = vmatprep.mubr.msk.f32.mxu0 %vm6832_vm9, %v12873_v4  ;;  %v9335_v4 = vsel %vm6822_vm12, 1.0, %v11045_v42 }
 0xad5   : > { %9874 = vmatprep.subr.msk.bf16.mxu0 %vm12829_vm0, %v9872_v7 }
 0xad7   : > { %9754 = vmatmul.mubr.msk.f32.gmra.mrb[78].mxu0 %vm6832_vm9, %v12887_v38  ;;  %v10933_v38 = vld [vmem:[%s13923_s5 + $0x1f0] sm:$0xff]  }
 0xad8   : > { %9877 = vmatpush3.bf16.msk.msra.mxu0 %vm12829_vm0, %v9872_v7  ;;  %9756 = vmatprep.mubr.msk.f32.mxu0 %vm6832_vm9, %v9333_v36 }
 0xad9   : > { %9662 = vmatprep.subr.bf16.mxu0 %v10932_v37 }
 0xadb   : > { %9757 = vmatmul.mubr.msk.f32.gmra.mrb[80].mxu0 %vm6832_vm9, %v9334_v28 }
 0xadc   : > { %9759 = vmatprep.mubr.msk.f32.mxu0 %vm6832_vm9, %v9335_v4 }
 0xadf   : > { %9760 = vmatmul.mubr.msk.f32.gmra.mrb[82].mxu0 %vm6832_vm9, %v9336_v21 }
 0xae0   : > { %9770 = vmatprep.mubr.msk.f32.mxu0 %vm6832_vm9, %v11742_v57  ;;  %v10935_v57 = vld [vmem:[%s13923_s5 + $0x1f8] sm:$0xff]  }
 0xae3   : > { %9771 = vmatmul.mubr.msk.f32.vlgmr.msra.gmra.mrb[76].mxu0 %vm6832_vm9, %v12455_v33  ;;  %v9235_v33 = vsel %vm6462_vm15, 1.0, %v11045_v42 }
 0xae4   : > { %9663 = vmatpush3.bf16.msra.mxu0 %v10933_v38  ;;  %9773 = vmatprep.mubr.msk.f32.mxu0 %vm6832_vm9, %v13006_v26  ;;  %v10937_v26 = vld [vmem:[%s13923_s5 + $0x200] sm:$0xff]  }
 0xae5   : > { %9664 = vmatprep.subr.bf16.mxu0 %v10934_v48 }
 0xae7   : > { %9774 = vmatmul.mubr.msk.f32.gmra.mrb[78].mxu0 %vm6832_vm9, %v13014_v23  ;;  %v9237_v23 = vsel %vm6464_vm2, 1.0, %v11045_v42 }
 0xae8   : > { %9665 = vmatpush3.bf16.msra.mxu0 %v10935_v57  ;;  %9776 = vmatprep.mubr.msk.f32.mxu0 %vm6832_vm9, %v9234_v25 }
 0xae9   : > { %9666 = vmatprep.subr.bf16.mxu0 %v10936_v29 }
 0xaeb   : > { %9777 = vmatmul.mubr.msk.f32.gmra.mrb[80].mxu0 %vm6832_vm9, %v9235_v33 }
 0xaec   : > { %9667 = vmatpush3.bf16.msra.mxu0 %v10937_v26  ;;  %9779 = vmatprep.mubr.msk.f32.mxu0 %vm6832_vm9, %v9236_v41 }
 0xaed   : > { %9668 = vmatprep.subr.bf16.mxu0 %v10938_v51  ;;  %v10948_v51 = vld [vmem:[%s13923_s5 + $0x328] sm:$0xff]  }
 0xaef   : > { %9780 = vmatmul.mubr.msk.f32.gmra.mrb[82].mxu0 %vm6832_vm9, %v9237_v23  ;;  %v10949_v23 = vld [vmem:[%s13923_s5 + $0x2e8] sm:$0xff]  }
 0xaf0   : > { %9669 = vmatpush3.bf16.msra.mxu0 %v10939_v53  ;;  %7370 = vmatprep.mubr.bf16.mxu0 %v13292_v11  ;;  %v10950_v53 = vld [vmem:[%s13923_s5 + $0x330] sm:$0xff]  }
 0xaf1   : > { %9670 = vmatprep.subr.bf16.mxu0 %v10940_v52  ;;  %v10951_v52 = vld [vmem:[%s13923_s5 + $0x2f0] sm:$0xff]  }
 0xaf4   : > { %9671 = vmatpush3.bf16.msra.mxu0 %v10941_v8  ;;  %v9450_v8 = vsel %vm7436_vm4, 1.0, %v11045_v42 }
 0xaf5   : > { %9672 = vmatprep.subr.bf16.mxu0 %v10942_v55  ;;  %v10952_v55 = vld [vmem:[%s13923_s5 + $0x338] sm:$0xff]  }
 0xaf8   : > { %9673 = vmatpush3.bf16.msra.mxu0 %v10943_v44  ;;  %v9452_v44 = vsel %vm7438_vm6, 1.0, %v11045_v42 }
 0xaf9   : > { %9674 = vmatprep.subr.bf16.mxu0 %v10944_v34  ;;  %v10954_v34 = vld [vmem:[%s13923_s5 + $0x340] sm:$0xff]  }
 0xafc   : > { %9675 = vmatpush3.bf16.msra.mxu0 %v10945_v50  ;;  %v7421_v13 = vpop.f32.mrb[68].mxu1  ;;  %v10955_v50 = vld [vmem:[%s13923_s5 + $0x300] sm:$0xff]  }
 0xafd   : > { %v7423_v0 = vpop.f32.mrb[69].mxu1  ;;  %9676 = vmatprep.subr.bf16.mxu0 %v10946_v35  ;;  %v10957_v35 = vld [vmem:[%s13923_s5 + $0x308] sm:$0xff]  }
 0xafe   : > { %v7424_v31 = vpop.f32.mrb[70].mxu1  ;;  %v10960_v0 = vld [vmem:[%s13923_s5 + $0x358] sm:$0xff]  }
 0xaff   : > { %v7426_v60 = vpop.f32.mrb[71].mxu1 }
 0xb00   : > { %9677 = vmatpush3.bf16.msra.mxu0 %v10947_v2  ;;  %v10959_v2 = vld [vmem:[%s13923_s5 + $0x310] sm:$0xff]   ;;  %v10963_v60 = vld [vmem:[%s13923_s5 + $0x320] sm:$0xff]  }
 0xb03   : > { %7371 = vmatmul.mubr.bf16.vlgmr.msra.gmra.mrb[84].mxu0 %v13290_v10 }
 0xb04   : > { %7378 = vmatprep.mubr.bf16.mxu0 %v13316_v46  ;;  %v7429_v40 = vpop.f32.mrb[72].mxu1 }
 0xb05   : > { %v7431_v17 = vpop.f32.mrb[73].mxu1 }
 0xb06   : > { %v7432_v1 = vpop.f32.mrb[74].mxu1 }
 0xb07   : > { %v7434_v3 = vpop.f32.mrb[75].mxu1 }
 0xb0b   : > { %7379 = vmatmul.mubr.bf16.gmra.mrb[88].mxu0 %v13314_v43 }
 0xb0c   : > { %9790 = vmatprep.mubr.msk.f32.mxu0 %vm6832_vm9, %v11921_v62 }
 0xb38   : > { %v13730_v56 = vpop.f32.mrb[76].mxu1 }
 0xb39   : > { %v7918_v24 = vpop.f32.mrb[77].mxu1 }
 0xb3a   : > { %v13732_v15 = vpop.f32.mrb[78].mxu1 }
 0xb3b   : > { %v7921_v6 = vpop.f32.mrb[79].mxu1 }
 0xb40   : > { %v13734_v12 = vpop.f32.mrb[80].mxu1 }
 0xb41   : > { %v7926_v22 = vpop.f32.mrb[81].mxu1 }
 0xb42   : > { %v13736_v45 = vpop.f32.mrb[82].mxu1 }
 0xb43   : > { %v7929_v61 = vpop.f32.mrb[83].mxu1 }
 0xbd6   : > { %v9678_v63 = vpop.f32.mrb[84].mxu0 }
 0xbd7   : > { %v9679_v27 = vpop.f32.mrb[85].mxu0 }
 0xbd8   : > { %v9680_v7 = vadd.f32 %v9679_v27, %v9678_v63  ;;  %v9681_v18 = vpop.f32.mrb[86].mxu0 }
 0xbd9   : > { %v9682_v36 = vpop.f32.mrb[87].mxu0 }
 0xbda   : > { %v7422_v37 = vadd.f32 %v9680_v7, %v7421_v13  ;;  %v9683_v28 = vadd.f32 %v9682_v36, %v9681_v18  ;;  %v10958_v13 = vld [vmem:[%s13923_s5 + $0x350] sm:$0xff]  }
 0xbdc   : > { %v7425_v62 = vadd.f32 %v9683_v28, %v7424_v31  ;;  %v10962_v31 = vld [vmem:[%s13923_s5 + $0x360] sm:$0xff]  }
 0xbde   : > { %v9684_v4 = vpop.f32.mrb[88].mxu0  ;;  %v9878_v21 = vpack.c.bf16 %v7425_v62, %v7422_v37 }
 0xbdf   : > { %v9685_v38 = vpop.f32.mrb[89].mxu0 }
 0xbe0   : > { %v9686_v48 = vadd.f32 %v9685_v38, %v9684_v4  ;;  %v9687_v57 = vpop.f32.mrb[90].mxu0  ;;  %9879 = vmatprep.subr.bf16.mxu0 %v9878_v21 }
 0xbe1   : > { %v9688_v25 = vpop.f32.mrb[91].mxu0  ;;  %9881 = vmatpush3.bf16.msra.mxu0 %v9878_v21 }
 0xbe2   : > { %v7430_v29 = vadd.f32 %v9686_v48, %v7429_v40  ;;  %v9689_v33 = vadd.f32 %v9688_v25, %v9687_v57  ;;  %v7931_v40 = vadd.s32 3, %v11717_v47 }
 0xbe4   : > { %v7433_v26 = vadd.f32 %v9689_v33, %v7432_v1  ;;  %vm7932_vm8 = vcmp.eq.s32.totalorder %v11461_v39, %v7931_v40  ;;  %vm7938_vm10 = vcmp.eq.s32.totalorder %v13623_v19, %v7931_v40  ;;  %vm7933_vm11 = vcmp.eq.s32.totalorder %v12414_v16, %v7931_v40 }
 0xbe5   : > { %v9558_v17 = vsel %vm7932_vm8, 1.0, %v11045_v42  ;;  %v9564_v1 = vsel %vm7938_vm10, 1.0, %v11045_v42  ;;  %vm7939_vm12 = vcmp.eq.s32.totalorder %v13635_v14, %v7931_v40  ;;  %vm7934_vm13 = vcmp.eq.s32.totalorder %v12853_v49, %v7931_v40 }
 0xbe6   : > { %v9882_v41 = vpack.c.bf16 %v7433_v26, %v7430_v29  ;;  %9819 = vmatprep.mubr.msk.f32.mxu1 %vm6832_vm9, %v9564_v1  ;;  %v9565_v16 = vsel %vm7939_vm12, 1.0, %v11045_v42  ;;  %v9560_v14 = vsel %vm7934_vm13, 1.0, %v11045_v42  ;;  %vm7935_vm14 = vcmp.eq.s32.totalorder %v12867_v54, %v7931_v40 }
 0xbe7   : > { %vm7936_vm15 = vcmp.eq.s32.totalorder %v13611_v32, %v7931_v40  ;;  %v9561_v49 = vsel %vm7935_vm14, 1.0, %v11045_v42  ;;  %v9575_v32 = vld [vmem:[%s13928_s10] ss:$0 sm:$0xff] }
 0xbe8   : > { %9884 = vmatprep.subr.msk.bf16.mxu0 %vm12829_vm0, %v9882_v41  ;;  %v9562_v30 = vsel %vm7936_vm15, 1.0, %v11045_v42 }
 0xbe9   : > { %9887 = vmatpush3.bf16.msk.msra.mxu0 %vm12829_vm0, %v9882_v41 }
 0xbea   : > { %9702 = vmatprep.subr.bf16.mxu0 %v10948_v51 }
 0xbec   : > { %9791 = vmatmul.mubr.msk.f32.vlgmr.msra.gmra.mrb[76].mxu0 %vm6832_vm9, %v12516_v20  ;;  %v9451_v20 = vsel %vm7437_vm5, 1.0, %v11045_v42 }
 0xbed   : > { %9703 = vmatpush3.bf16.msra.mxu0 %v10949_v23  ;;  %9793 = vmatprep.mubr.msk.f32.mxu0 %vm6832_vm9, %v13134_v5  ;;  %v10953_v5 = vld [vmem:[%s13923_s5 + $0x2f8] sm:$0xff]  }
 0xbee   : > { %9704 = vmatprep.subr.bf16.mxu0 %v10950_v53 }
 0xbf0   : > { %9794 = vmatmul.mubr.msk.f32.gmra.mrb[78].mxu0 %vm6832_vm9, %v13142_v58  ;;  %v9453_v58 = vsel %vm7439_vm7, 1.0, %v11045_v42 }
 0xbf1   : > { %9705 = vmatpush3.bf16.msra.mxu0 %v10951_v52  ;;  %9796 = vmatprep.mubr.msk.f32.mxu0 %vm6832_vm9, %v9450_v8 }
 0xbf2   : > { %9706 = vmatprep.subr.bf16.mxu0 %v10952_v55 }
 0xbf4   : > { %9797 = vmatmul.mubr.msk.f32.gmra.mrb[80].mxu0 %vm6832_vm9, %v9451_v20 }
 0xbf5   : > { %9707 = vmatpush3.bf16.msra.mxu0 %v10953_v5  ;;  %9799 = vmatprep.mubr.msk.f32.mxu0 %vm6832_vm9, %v9452_v44 }
 0xbf6   : > { %9708 = vmatprep.subr.bf16.mxu0 %v10954_v34 }
 0xbf8   : > { %9800 = vmatmul.mubr.msk.f32.gmra.mrb[82].mxu0 %vm6832_vm9, %v9453_v58 }
 0xbf9   : > { %9709 = vmatpush3.bf16.msra.mxu0 %v10955_v50  ;;  %7865 = vmatprep.mubr.bf16.mxu0 %v13292_v11  ;;  %v10961_v11 = vld [vmem:[%s13923_s5 + $0x318] sm:$0xff]  }
 0xbfa   : > { %9710 = vmatprep.subr.bf16.mxu0 %v10956_v59 }
 0xbfd   : > { %9711 = vmatpush3.bf16.msra.mxu0 %v10957_v35 }
 0xbfe   : > { %9712 = vmatprep.subr.bf16.mxu0 %v10958_v13 }
 0xc01   : > { %9713 = vmatpush3.bf16.msra.mxu0 %v10959_v2 }
 0xc02   : > { %9714 = vmatprep.subr.bf16.mxu0 %v10960_v0 }
 0xc05   : > { %9715 = vmatpush3.bf16.msra.mxu0 %v10961_v11 }
 0xc06   : > { %9716 = vmatprep.subr.bf16.mxu0 %v10962_v31 }
 0xc09   : > { %9717 = vmatpush3.bf16.msra.mxu0 %v10963_v60 }
 0xc0c   : > { %7866 = vmatmul.mubr.bf16.vlgmr.msra.gmra.mrb[92].mxu0 %v13290_v10 }
 0xc0d   : > { %7873 = vmatprep.mubr.bf16.mxu0 %v13316_v46 }
 0xc14   : > { %7874 = vmatmul.mubr.bf16.gmra.mrb[96].mxu0 %v13314_v43 }
 0xc15   : > { %9810 = vmatprep.mubr.msk.f32.mxu0 %vm6832_vm9, %v9558_v17 }
 0xccb   : > { %v9801_v3 = vpop.f32.mrb[82].mxu0 }
 0xccc   : > { %v7567_v10 = vpop.f32.mrb[83].mxu0 }
 0xcdf   : > { %v9718_v24 = vpop.f32.mrb[92].mxu0 }
 0xce0   : > { %v9719_v46 = vpop.f32.mrb[93].mxu0 }
 0xce1   : > { %v9720_v6 = vadd.f32 %v9719_v46, %v9718_v24  ;;  %v9721_v43 = vpop.f32.mrb[94].mxu0 }
 0xce2   : > { %v9722_v22 = vpop.f32.mrb[95].mxu0 }
 0xce3   : > { %v7917_v47 = vadd.f32 %v9720_v6, %v13730_v56  ;;  %v9723_v39 = vadd.f32 %v9722_v22, %v9721_v43  ;;  %v9559_v56 = vsel %vm7933_vm11, 1.0, %v11045_v42 }
 0xce5   : > { %v7920_v19 = vadd.f32 %v9723_v39, %v13732_v15 }
 0xce7   : > { %v9888_v61 = vpack.c.bf16 %v7920_v19, %v7917_v47  ;;  %v9724_v63 = vpop.f32.mrb[96].mxu0 }
 0xce8   : > { %v9725_v27 = vpop.f32.mrb[97].mxu0 }
 0xce9   : > { %v9726_v7 = vadd.f32 %v9725_v27, %v9724_v63  ;;  %v9727_v18 = vpop.f32.mrb[98].mxu0  ;;  %9889 = vmatprep.subr.bf16.mxu0 %v9888_v61  ;;  %9898 = vmatprep.subr.bf16.mxu1 %v9888_v61 }
 0xcea   : > { %v9728_v36 = vpop.f32.mrb[99].mxu0  ;;  %9891 = vmatpush3.bf16.msra.mxu0 %v9888_v61  ;;  %9900 = vmatpush3.bf16.msra.mxu1 %v9888_v61 }
 0xceb   : > { %v7925_v37 = vadd.f32 %v9726_v7, %v13734_v12  ;;  %v9729_v28 = vadd.f32 %v9728_v36, %v9727_v18 }
 0xced   : > { %v7928_v62 = vadd.f32 %v9729_v28, %v13736_v45 }
 0xcef   : > { %v9892_v4 = vpack.c.bf16 %v7928_v62, %v7925_v37 }
 0xcf1   : > { %9894 = vmatprep.subr.msk.bf16.mxu0 %vm12829_vm0, %v9892_v4  ;;  %9899 = vmatprep.subr.msk.bf16.mxu1 %vm12829_vm0, %v9892_v4 }
 0xcf2   : > { %9897 = vmatpush3.bf16.msk.msra.mxu0 %vm12829_vm0, %v9892_v4  ;;  %9901 = vmatpush3.bf16.msk.msra.mxu1 %vm12829_vm0, %v9892_v4  ;;  %vm7937_vm0 = vcmp.eq.s32.totalorder %v13618_v9, %v7931_v40 }
 0xcf3   : > { %v9563_v54 = vsel %vm7937_vm0, 1.0, %v11045_v42 }
 0xcf5   : > { %9811 = vmatmul.mubr.msk.f32.vlgmr.msra.gmra.mrb[76].mxu0 %vm6832_vm9, %v9559_v56  ;;  %9820 = vmatmul.mubr.msk.f32.vlgmr.msra.gmra.mrb[84].mxu1 %vm6832_vm9, %v9565_v16 }
 0xcf6   : > { %9813 = vmatprep.mubr.msk.f32.mxu0 %vm6832_vm9, %v9560_v14 }
 0xcf9   : > { %9814 = vmatmul.mubr.msk.f32.gmra.mrb[78].mxu0 %vm6832_vm9, %v9561_v49 }
 0xcfa   : > { %9816 = vmatprep.mubr.msk.f32.mxu0 %vm6832_vm9, %v9562_v30 }
 0xcfd   : > { %9817 = vmatmul.mubr.msk.f32.gmra.mrb[80].mxu0 %vm6832_vm9, %v9563_v54 }
 0xdc8   : > { %v9812_v15 = vpop.f32.mrb[76].mxu0  ;;  %v9821_v12 = vpop.f32.mrb[84].mxu1 }
 0xdc9   : > { %v8104_v45 = vadd.f32 %v9812_v15, %v9575_v32  ;;  %v9918_v21 = vadd.f32 %v9821_v12, %v9801_v3  ;;  %v8049_v38 = vpop.f32.mrb[77].mxu0  ;;  %v8079_v9 = vpop.f32.mrb[85].mxu1 }
 0xdca   : > { %v8103_v48 = vadd.f32 %v9575_v32, %v8049_v38  ;;  %v9919_v57 = vadd.f32 %v8079_v9, %v7567_v10 }
 0xdcb   : > { %10964 = vtanh.f32 %v8104_v45  ;;  %v8110_v25 = vadd.f32 %v9918_v21, %v9575_v32 }
 0xdcc   : > { %10966 = vtanh.f32 %v8103_v48  ;;  %v8109_v42 = vadd.f32 %v9919_v57, %v9575_v32  ;;  %v9815_v29 = vpop.f32.mrb[78].mxu0 }
 0xdcd   : > { %10968 = vtanh.f32 %v8110_v25  ;;  %v8106_v33 = vadd.f32 %v9815_v29, %v9575_v32  ;;  %v8059_v26 = vpop.f32.mrb[79].mxu0 }
 0xdce   : > { %10970 = vtanh.f32 %v8109_v42  ;;  %v8105_v41 = vadd.f32 %v9575_v32, %v8059_v26 }
 0xdcf   : > { %10972 = vtanh.f32 %v8106_v33 }
 0xdd0   : > { %10974 = vtanh.f32 %v8105_v41  ;;  %v9818_v51 = vpop.f32.mrb[80].mxu0 }
 0xdd1   : > { %v8108_v23 = vadd.f32 %v9818_v51, %v9575_v32  ;;  %v8069_v53 = vpop.f32.mrb[81].mxu0 }
 0xdd2   : > { %v8107_v52 = vadd.f32 %v9575_v32, %v8069_v53 }
 0xdd3   : > { %10976 = vtanh.f32 %v8108_v23 }
 0xdd4   : > { %10978 = vtanh.f32 %v8107_v52 }
 0xdd5   : > { %v10965_v8 = vpop.eup %10964 }
 0xdd6   : > { %v10967_v55 = vpop.eup %10966  ;;  %8120 = vst.msk [vmem:[%s375_s19 + $0x8] sm:$0xff] %vm1148_vm3, %v10965_v8 }
 0xdd7   : > { %v10969_v20 = vpop.eup %10968  ;;  %8119 = vst.msk [vmem:[%s375_s19] sm:$0xff] %vm1148_vm3, %v10967_v55 }
 0xdd8   : > { %v10971_v5 = vpop.eup %10970  ;;  %8126 = vst.msk [vmem:[%s375_s19 + $0x38] sm:$0xff] %vm1148_vm3, %v10969_v20 }
 0xdd9   : > { %v10973_v44 = vpop.eup %10972  ;;  %8125 = vst.msk [vmem:[%s375_s19 + $0x30] sm:$0xff] %vm1148_vm3, %v10971_v5 }
 0xdda   : > { %v10975_v34 = vpop.eup %10974  ;;  %8122 = vst.msk [vmem:[%s375_s19 + $0x18] sm:$0xff] %vm1148_vm3, %v10973_v44 }
 0xddb   : > { %8121 = vst.msk [vmem:[%s375_s19 + $0x10] sm:$0xff] %vm1148_vm3, %v10975_v34 }
 0xddd   : > { %v10977_v58 = vpop.eup %10976 }
 0xdde   : > { %v10979_v50 = vpop.eup %10978  ;;  %8124 = vst.msk [vmem:[%s375_s19 + $0x28] sm:$0xff] %vm1148_vm3, %v10977_v58 }
 0xddf   : > { %8123 = vst.msk [vmem:[%s375_s19 + $0x20] sm:$0xff] %vm1148_vm3, %v10979_v50 }
 0xde0   : > { %10993 = shalt.err (!%p10990_p3)
}
 0xde1   : > { %s10994_s12 = scalar_lea.hbm %s13869_s13, 1024  ;;  %s10998_s25 = scalar_lea.hbm %s13929_s11, 2048 }
 0xde2   : > { %p10995_p4 = scmp.ne.s32.totalorder %s13869_s13, %s10994_s12  ;;  %p10999_p9 = scmp.lt.u32.totalorder %s13869_s13, %s13929_s11 }
 0xde3   : > { %p11000_p10 = scmp.lt.u32.totalorder %s10998_s25, %s10994_s12  ;;  %p11002_p12 = scmp.lt.u32.totalorder %s10994_s12, %s13869_s13 }
 0xde4   : > { %p10996_p7 = pnand %p10995_p4, %p11148_p5 }
 0xde5   : > { %p11001_p11 = por %p11000_p10, %p10999_p9 }
 0xde6   : > { %p10997_p8 = pneg %p10996_p7 }
 0xde7   : > { %p11003_p13 = por %p11002_p12, %p11001_p11 }
 0xde9   : > { %p11004_p0 = pnand %p11003_p13, %p10997_p8 }
 0xdeb   : > { %11007 = shalt.err (!%p11004_p0)
}
 0xdec   : > { %s11048_s14 = smov 128   ;;  %s11049_s15 = smov 8  }
 0xded   : > { %9986 = dma.vmem_to_hbm [thread:$0]  (%p11148_p5), %s13871_s29, 1024, %s13869_s13, %s13877_s21, %s11048_s14, %s11048_s14, %s11049_s15  }
 0xdee PF: > { %p9992_p1 = scmp.ge.s32.totalorder %s11042_s20, 2  ;;  %s8156_s16 = sand.u32 1, %s11030_s17  }
 0xdef   : > { %s8157_s22 = scalar_lea.sflag [#allocation3], %s8156_s16 }
 0xdf0   : > { %p9989_p2 = pnand %p9992_p1, %p11152_p6 }
 0xdf2   : > { %11025 = dma.done.wait (!%p9989_p2), %s8157_s22, 1024  }
 0xdf3   : > { %11027 = vsyncadd (!%p9989_p2), %s8157_s22, 4294966272  ;;  %s13937_s12 = sld [smem:[#allocation5_spill]]  ;;  %s13938_s19 = sld [smem:[#allocation6_spill]] }
 0xdf4   : > { %p21_p3 = scmp.ge.s32.totalorder %s11135_s23, 4   ;;  %s13939_s17 = smov %s11034_s18 }
 0xdf5   : > { %s13941_s20 = smov %s11135_s23 }
 0xdf6   :  { %23 = sbr.rel (!%p21_p3) target bundleno = 3 (0x3), region = 110 }
 0xdf9   : > { %s13940_s18 = smov %s13937_s12 }
 0xdfd   :  { %8162 = vsyncpa [#allocation3], 1 }
 0xdfe   :  { %8164 = vsyncpa [#allocation3 + $0x1], 1 }

</bundles_post_ra>
